<compile_context>
chip_gen: v7x
topology: tpu7x:2x2x1
jax: 0.10.0
libtpu: 0.0.40
codegen_flags: <defaults>
</compile_context>

<pallas_src>
import functools

import jax
import jax.numpy as jnp
from jax.experimental import pallas as pl
from jax.experimental.pallas import tpu as pltpu


def ff_sa_kernel(x_ref, wqkv_ref, bqkv_ref, w2_ref, b2_ref, o_ref, *,
                 approx_recip: bool):
    B, TN, D = x_ref.shape
    H3 = wqkv_ref.shape[1]
    H = H3 // 3
    mm_dtype = wqkv_ref.dtype

    # ---- fused fc1: single (B*TN, D) @ (D, 3H) MXU pass, f32 accumulation ----------------
    # Cast x in-kernel (hides under the matmul; avoids an extra wrapper-side HBM pass).
    x2 = x_ref[...].reshape(B * TN, D).astype(mm_dtype)
    qkv = jnp.dot(x2, wqkv_ref[...], preferred_element_type=jnp.float32)
    qkv = (qkv + bqkv_ref[...]).reshape(B, TN, H3)

    q = qkv[..., :H]
    k = qkv[..., H:2 * H]
    v = qkv[..., 2 * H:]

    # ---- attn = softmax(q*k) over the BATCH axis (legacy nn.Softmax() rule for 3-D) -------
    # Only correct because B is whole in every tile (see BlockSpec comment in the wrapper).
    s = q * k
    m = jnp.max(s, axis=0, keepdims=True)
    e = jnp.exp(s - m)
    denom = jnp.sum(e, axis=0, keepdims=True)
    if approx_recip:
        inv = pl.reciprocal(denom, approx=True)      # EUP slot -> essentially free
    else:
        inv = 1.0 / denom
    # Fuse attn * v without materializing attn: (e * v) * (1/denom).
    v = ((e * v) * inv).astype(mm_dtype).reshape(B * TN, H)

    # ---- fc2 (H kept whole per tile -> no cross-tile accumulation needed) -----------------
    out = jnp.dot(v, w2_ref[...], preferred_element_type=jnp.float32) + b2_ref[...]
    o_ref[...] = out.reshape(B, TN, D).astype(o_ref.dtype)


def _round_up(a, m):
    return -(-a // m) * m


def _resident_spec(block_shape):
    """Weights/biases: constant index_map -> fetched once; single-buffer to halve VMEM."""
    index_map = lambda i, _n=len(block_shape): (0,) * _n
    try:
        return pl.BlockSpec(block_shape, index_map, pipeline_mode=pl.Buffered(1))
    except Exception:   # older jax without per-spec pipeline_mode -> default double buffer
        return pl.BlockSpec(block_shape, index_map)


def _choose_token_tile(B, N, D, H, x_itemsize, mm_itemsize, out_itemsize, max_token_tile):
    """Pick the token-tile size + vmem limit from this generation's VMEM capacity."""
    try:
        vmem_cap = int(pltpu.get_tpu_info().vmem_capacity_bytes)   # 64 MiB v7x, 128 MiB v5e/v6e
    except Exception:
        vmem_cap = 128 << 20
    small_vmem = vmem_cap <= (64 << 20)                 # v7x-like
    headroom = (8 << 20) if small_vmem else (16 << 20)  # review: only 8 MiB headroom on v7x
    vmem_limit = vmem_cap - headroom

    # Resident weights/biases: single-buffered (pl.Buffered(1)), so counted once.
    w_bytes = D * 3 * H * mm_itemsize + H * D * mm_itemsize + (3 * H + D) * 4

    # Per (batch, token) row: x tile (2 bufs, native dtype) + in-kernel mm-dtype copy
    # + out tile (2 bufs) + f32/bf16 live temps (qkv 12H, s/e/e*v 12H, cast v 2H).
    per_row = B * (2 * D * x_itemsize + D * mm_itemsize + 2 * D * out_itemsize + 26 * H)

    budget = vmem_limit - w_bytes
    if budget < 16 * per_row:
        # TODO(synk): add a 3H/H grid axis (f32 accumulator + pl.when init/finalize) for
        # production-sized D/H where the resident weights outgrow VMEM (notably v7x, 64 MiB).
        raise ValueError(
            f"FeedForward_SA weights too large for whole-H tiling: need >= "
            f"{w_bytes + 16 * per_row} B of VMEM, budget is {vmem_limit} B.")

    tn = budget // per_row
    tn = max(16, min(int(tn), int(max_token_tile)))
    tn = (tn // 16) * 16                    # bf16 packs 16 rows per sublane tile
    tn = min(tn, _round_up(N, 16))          # never bigger than the (16-padded) token count

    # v7x (2 TensorCores): keep >= 4 parallel tiles so both cores get work + DMA overlap.
    if small_vmem and N >= 4 * 16:
        tn = min(tn, _round_up(-(-N // 4), 16))
    return int(tn), int(vmem_limit)


def feed_forward_sa(x, params, *, max_token_tile=512, use_bf16=True,
                    approx_recip=True, out_dtype=None):
    """x: (B, N, D).  params: {'wqkv': (D,3H), 'bqkv': (1,3H), 'w2': (H,D), 'b2': (1,D)}."""
    B, N, D = x.shape
    H = params["w2"].shape[0]

    mm_dtype = jnp.bfloat16 if use_bf16 else x.dtype
    if out_dtype is None:
        out_dtype = mm_dtype if use_bf16 else x.dtype

    wqkv = params["wqkv"].astype(mm_dtype)
    w2 = params["w2"].astype(mm_dtype)
    bqkv = params["bqkv"].astype(jnp.float32)
    b2 = params["b2"].astype(jnp.float32)

    TN, vmem_limit = _choose_token_tile(
        B, N, D, H,
        x_itemsize=jnp.dtype(x.dtype).itemsize,
        mm_itemsize=jnp.dtype(mm_dtype).itemsize,
        out_itemsize=jnp.dtype(out_dtype).itemsize,
        max_token_tile=max_token_tile)

    n_tiles = -(-N // TN)
    N_pad = n_tiles * TN
    x_in = x
    if N_pad != N:
        # Padded tokens only pollute their own rows (the softmax reduces over B, not N)
        # and are sliced off below.
        x_in = jnp.pad(x, ((0, 0), (0, N_pad - N), (0, 0)))

    kernel = functools.partial(ff_sa_kernel, approx_recip=approx_recip)
    out = pl.pallas_call(
        kernel,
        out_shape=jax.ShapeDtypeStruct((B, N_pad, D), out_dtype),
        grid=(n_tiles,),
        in_specs=[
            # NOTE: B must stay whole inside every tile — the legacy dim-less softmax
            # normalizes over the batch axis; never move B into the grid.
            pl.BlockSpec((B, TN, D), lambda i: (0, i, 0)),   # x: streamed over token tiles
            _resident_spec((D, 3 * H)),                      # W_qkv: VMEM resident, 1 buffer
            _resident_spec((1, 3 * H)),                      # b_qkv
            _resident_spec((H, D)),                          # W2
            _resident_spec((1, D)),                          # b2
        ],
        out_specs=pl.BlockSpec((B, TN, D), lambda i: (0, i, 0)),
        compiler_params=pltpu.CompilerParams(
            dimension_semantics=("parallel",),   # independent token tiles -> megacore on v7x
            vmem_limit_bytes=vmem_limit,
        ),
    )(x_in, wqkv, bqkv, w2, b2)

    if N_pad != N:
        out = out[:, :N, :]
    return out


def init_params(key, dim, hidden_dim):
    """Deterministic synthetic parameters (shapes mirror the nn.Linear layers)."""
    k1, k2, k3, k4 = jax.random.split(key, 4)
    # fc1: weight (3H, D), bias (3H,);  fc2: weight (D, H), bias (D,)
    w1 = jax.random.normal(k1, (3 * hidden_dim, dim), jnp.float32) * 0.05
    b1 = jax.random.normal(k2, (3 * hidden_dim,), jnp.float32) * 0.05
    w2 = jax.random.normal(k3, (dim, hidden_dim), jnp.float32) * 0.05
    b2 = jax.random.normal(k4, (dim,), jnp.float32) * 0.05
    # Fuse q/k/v into a single (D, 3H) operand; column blocks [0:H, H:2H, 2H:3H]
    # reproduce `.chunk(3, dim=-1)` of fc1's output exactly.
    return {
        "wqkv": w1.T,                                # (D, 3H)
        "bqkv": b1.reshape(1, 3 * hidden_dim),       # (1, 3H)
        "w2": w2.T,                                  # (H, D)
        "b2": b2.reshape(1, dim),                    # (1, D)
    }


def reference(x, params):
    """Pure-JAX reference mirroring the PyTorch forward (legacy softmax over dim=0)."""
    H = params["w2"].shape[0]
    qkv = x @ params["wqkv"] + params["bqkv"]
    q, k, v = qkv[..., :H], qkv[..., H:2 * H], qkv[..., 2 * H:]
    attn = jax.nn.softmax(q * k, axis=0)     # nn.Softmax() with no dim -> dim=0 for 3-D input
    return (attn * v) @ params["w2"] + params["b2"]


if __name__ == "__main__":
    # Lane-dense shapes (D, H multiples of 128); N=1000 exercises both the multi-tile path
    # (TN=512 default, or 256 on v7x) and the token-padding path.
    B, N, dim, hidden_dim = 2, 1000, 128, 128

    key = jax.random.PRNGKey(0)
    kx, kp = jax.random.split(key)
    x = jax.random.normal(kx, (B, N, dim), jnp.float32)
    params = init_params(kp, dim, hidden_dim)
    ref = reference(x, params)

    # Exact-precision matmul path (f32 MXU, f32 output); approx EUP reciprocal is the only
    # approximation: tight semantic check.
    out_f32 = jax.block_until_ready(feed_forward_sa(x, params, use_bf16=False))
    assert out_f32.shape == (B, N, dim) and out_f32.dtype == x.dtype
    assert jnp.allclose(out_f32, ref, atol=1e-2, rtol=1e-2), "f32 path mismatch vs reference"

    # Optimized path (bf16 matmuls + bf16 output, f32 accumulate/softmax): relaxed tolerance.
    out_bf16 = jax.block_until_ready(feed_forward_sa(x, params, use_bf16=True))
    assert out_bf16.shape == (B, N, dim) and out_bf16.dtype == jnp.bfloat16
    assert jnp.allclose(out_bf16.astype(jnp.float32), ref, atol=5e-2, rtol=5e-2), \
        "bf16 path mismatch vs reference"

    print("KERNEL_OK")
</pallas_src>

<mosaic_0001>
module attributes {stable_mosaic.version = 11 : i64} {
  func.func @ff_sa_kernel(%arg0: i32, %arg1: memref<2x512x128xf32, #tpu.memory_space<vmem>>, %arg2: memref<128x384xf32, #tpu.memory_space<vmem>>, %arg3: memref<1x384xf32, #tpu.memory_space<vmem>>, %arg4: memref<128x128xf32, #tpu.memory_space<vmem>>, %arg5: memref<1x128xf32, #tpu.memory_space<vmem>>, %arg6: memref<2x512x128xf32, #tpu.memory_space<vmem>>) attributes {dimension_semantics = [#tpu.dimension_semantics<parallel>], iteration_bounds = array<i64: 2>, scalar_prefetch = 0 : i64, scratch_operands = 0 : i64, tpu.core_type = #tpu.core_type<tc>, window_params = [{transform_indices = @transform_0, window_bounds = array<i64: 2, 512, 128>}, {pipeline_mode = #tpu.pipeline_mode<synchronous>, transform_indices = @transform_1, window_bounds = array<i64: 128, 384>}, {pipeline_mode = #tpu.pipeline_mode<synchronous>, transform_indices = @transform_2, window_bounds = array<i64: 1, 384>}, {pipeline_mode = #tpu.pipeline_mode<synchronous>, transform_indices = @transform_3, window_bounds = array<i64: 128, 128>}, {pipeline_mode = #tpu.pipeline_mode<synchronous>, transform_indices = @transform_4, window_bounds = array<i64: 1, 128>}, {transform_indices = @transform_5, window_bounds = array<i64: 2, 512, 128>}]} {
    %c0 = arith.constant 0 : index
    %c0_0 = arith.constant 0 : index
    %c0_1 = arith.constant 0 : index
    %0 = vector.load %arg1[%c0, %c0_0, %c0_1] : memref<2x512x128xf32, #tpu.memory_space<vmem>>, vector<2x512x128xf32>
    %1 = vector.shape_cast %0 : vector<2x512x128xf32> to vector<1024x128xf32>
    %c0_2 = arith.constant 0 : index
    %c0_3 = arith.constant 0 : index
    %2 = vector.load %arg2[%c0_2, %c0_3] : memref<128x384xf32, #tpu.memory_space<vmem>>, vector<128x384xf32>
    %cst = arith.constant dense<0.000000e+00> : vector<1024x384xf32>
    %3 = tpu.matmul %1, %2, %cst {dimension_numbers = #tpu.dot_dimension_numbers<[1], [0], [0], [1], [0, 0, 1, 1], [], []>} : vector<1024x128xf32>, vector<128x384xf32>, vector<1024x384xf32> -> vector<1024x384xf32>
    %c0_4 = arith.constant 0 : index
    %c0_5 = arith.constant 0 : index
    %4 = vector.load %arg3[%c0_4, %c0_5] : memref<1x384xf32, #tpu.memory_space<vmem>>, vector<1x384xf32>
    %5 = vector.broadcast %4 : vector<1x384xf32> to vector<1024x384xf32>
    %6 = arith.addf %3, %5 : vector<1024x384xf32>
    %7 = vector.shape_cast %6 : vector<1024x384xf32> to vector<2x512x384xf32>
    %8 = vector.extract_strided_slice %7 {offsets = [0, 0, 0], sizes = [2, 512, 128], strides = [1, 1, 1]} : vector<2x512x384xf32> to vector<2x512x128xf32>
    %9 = vector.extract_strided_slice %7 {offsets = [0, 0, 128], sizes = [2, 512, 128], strides = [1, 1, 1]} : vector<2x512x384xf32> to vector<2x512x128xf32>
    %10 = vector.extract_strided_slice %7 {offsets = [0, 0, 256], sizes = [2, 512, 128], strides = [1, 1, 1]} : vector<2x512x384xf32> to vector<2x512x128xf32>
    %11 = arith.mulf %8, %9 : vector<2x512x128xf32>
    %cst_6 = arith.constant dense<0xFF800000> : vector<512x128xf32>
    %12 = vector.multi_reduction <maximumf>, %11, %cst_6 [0] : vector<2x512x128xf32> to vector<512x128xf32>
    %13 = vector.shape_cast %12 : vector<512x128xf32> to vector<1x512x128xf32>
    %14 = vector.broadcast %13 : vector<1x512x128xf32> to vector<2x512x128xf32>
    %15 = arith.subf %11, %14 : vector<2x512x128xf32>
    %16 = math.exp %15 : vector<2x512x128xf32>
    %cst_7 = arith.constant dense<0.000000e+00> : vector<512x128xf32>
    %17 = vector.multi_reduction <add>, %16, %cst_7 [0] : vector<2x512x128xf32> to vector<512x128xf32>
    %18 = vector.shape_cast %17 : vector<512x128xf32> to vector<1x512x128xf32>
    %19 = tpu.reciprocal %18 {approx = true} : vector<1x512x128xf32> -> vector<1x512x128xf32>
    %20 = arith.mulf %16, %10 : vector<2x512x128xf32>
    %21 = vector.broadcast %19 : vector<1x512x128xf32> to vector<2x512x128xf32>
    %22 = arith.mulf %20, %21 : vector<2x512x128xf32>
    %23 = vector.shape_cast %22 : vector<2x512x128xf32> to vector<1024x128xf32>
    %c0_8 = arith.constant 0 : index
    %c0_9 = arith.constant 0 : index
    %24 = vector.load %arg4[%c0_8, %c0_9] : memref<128x128xf32, #tpu.memory_space<vmem>>, vector<128x128xf32>
    %cst_10 = arith.constant dense<0.000000e+00> : vector<1024x128xf32>
    %25 = tpu.matmul %23, %24, %cst_10 {dimension_numbers = #tpu.dot_dimension_numbers<[1], [0], [0], [1], [0, 0, 1, 1], [], []>} : vector<1024x128xf32>, vector<128x128xf32>, vector<1024x128xf32> -> vector<1024x128xf32>
    %c0_11 = arith.constant 0 : index
    %c0_12 = arith.constant 0 : index
    %26 = vector.load %arg5[%c0_11, %c0_12] : memref<1x128xf32, #tpu.memory_space<vmem>>, vector<1x128xf32>
    %27 = vector.broadcast %26 : vector<1x128xf32> to vector<1024x128xf32>
    %28 = arith.addf %25, %27 : vector<1024x128xf32>
    %29 = vector.shape_cast %28 : vector<1024x128xf32> to vector<2x512x128xf32>
    %c0_13 = arith.constant 0 : index
    %c0_14 = arith.constant 0 : index
    %c0_15 = arith.constant 0 : index
    %30 = vector.load %arg6[%c0_13, %c0_14, %c0_15] : memref<2x512x128xf32, #tpu.memory_space<vmem>>, vector<2x512x128xf32>
    tpu.vector_store %arg6[%c0_13, %c0_14, %c0_15], %29 {strides = array<i32>} : memref<2x512x128xf32, #tpu.memory_space<vmem>>, vector<2x512x128xf32>,
    return
  }
  func.func @transform_0(%arg0: i32) -> (i32, i32, i32) {
    %c0_i32 = arith.constant 0 : i32
    %c0_i32_0 = arith.constant 0 : i32
    %c0_i32_1 = arith.constant 0 : i32
    return %c0_i32, %arg0, %c0_i32_0 : i32, i32, i32
  }
  func.func @transform_1(%arg0: i32) -> (i32, i32) {
    %c0_i32 = arith.constant 0 : i32
    %c0_i32_0 = arith.constant 0 : i32
    %c0_i32_1 = arith.constant 0 : i32
    return %c0_i32, %c0_i32_0 : i32, i32
  }
  func.func @transform_2(%arg0: i32) -> (i32, i32) {
    %c0_i32 = arith.constant 0 : i32
    %c0_i32_0 = arith.constant 0 : i32
    %c0_i32_1 = arith.constant 0 : i32
    return %c0_i32, %c0_i32_0 : i32, i32
  }
  func.func @transform_3(%arg0: i32) -> (i32, i32) {
    %c0_i32 = arith.constant 0 : i32
    %c0_i32_0 = arith.constant 0 : i32
    %c0_i32_1 = arith.constant 0 : i32
    return %c0_i32, %c0_i32_0 : i32, i32
  }
  func.func @transform_4(%arg0: i32) -> (i32, i32) {
    %c0_i32 = arith.constant 0 : i32
    %c0_i32_0 = arith.constant 0 : i32
    %c0_i32_1 = arith.constant 0 : i32
    return %c0_i32, %c0_i32_0 : i32, i32
  }
  func.func @transform_5(%arg0: i32) -> (i32, i32, i32) {
    %c0_i32 = arith.constant 0 : i32
    %c0_i32_0 = arith.constant 0 : i32
    %c0_i32_1 = arith.constant 0 : i32
    return %c0_i32, %arg0, %c0_i32_0 : i32, i32, i32
  }
}

</mosaic_0001>

<bundles_post_ra>
// kernel: tpu_custom_call.1
= control target key start
LH: loop header
LB: loop body
LE: loop exit
PB: predicated region body
PF: predicated region fallthrough
CT: control target
= control target key end

     0   :  { %s8620_s0 = inlined_call_operand.hbm [shape: f32[2,1024,128], index: 0, kind: input, shape index: {}]   ;;  %s8621_s1 = inlined_call_operand.hbm [shape: f32[128,384], index: 1, kind: input, shape index: {}]   ;;  %s8622_s2 = inlined_call_operand.hbm [shape: f32[1,384], index: 2, kind: input, shape index: {}]   ;;  %s8623_s3 = inlined_call_operand.hbm [shape: f32[128,128], index: 3, kind: input, shape index: {}]   ;;  %s8624_s4 = inlined_call_operand.hbm [shape: f32[1,128], index: 4, kind: input, shape index: {}]   ;;  %s8625_s5 = inlined_call_operand.hbm [shape: f32[2,1024,128], index: 5, kind: output, shape index: {}]  }
   0x1   :  { %8747 = sst [smem:[#allocation161_spill]] %s8621_s1 }
   0x2   :  { %10 = vsyncpa [#allocation3], 0 }
   0x3   :  { %12 = vsyncpa [#allocation3 + $0x1], 0 }
   0x4   :  { %13 = vsyncpa [#allocation6], 0 }
   0x5   :  { %14 = vsyncpa [#allocation9], 0 }
   0x6   :  { %15 = vsyncpa [#allocation4], 0 }
   0x7   :  { %17 = vsyncpa [#allocation4 + $0x1], 0  ;;  %s5595_s18 = smov 0   ;;  %s5597_s19 = smov 0  }
   0x8   :  { %s5599_s20 = smov 0   ;;  %s5601_s21 = smov 0  }
   0x9 LB: > { %8748 = sst [smem:[#allocation21_spill]] %s5529_s18  ;;  %s5616_s22 = sadd.s32 4294967295, %s5541_s21   ;;  %s5541_s21 = sphi %s5601_s21, %s9292_s21   ;;  %s5537_s20 = sphi %s5599_s20, %s9296_s20   ;;  %s5533_s19 = sphi %s5597_s19, %s9295_s19   ;;  %s5529_s18 = sphi %s5595_s18, %s9294_s18  }
   0xa   : > { %s4025_s23 = sadd.s32 4294967294, %s5541_s21   ;;  %s5620_s24 = sadd.s32 1, %s5541_s21  }
   0xb   : > { %8749 = sst [smem:[#allocation22_spill]] %s5620_s24  ;;  %s30_s25 = sadd.s32 1, %s5537_s20 }
   0xc   : > { %s27_s26 = ssub.s32 %s5541_s21, %s5620_s24  ;;  %p37_p0 = scmp.ne.s32.totalorder %s5537_s20, %s5533_s19 }
   0xd   : > { %p28_p1 = scmp.eq.s32.totalorder %s27_s26, 0  ;;  %p38_p2 = scmp.eq.s32.totalorder %s5541_s21, 0 }
   0xe   : > { %p43_p3 = scmp.ne.s32.totalorder %s5533_s19, %s5529_s18  ;;  %p8626_p4 = scmp.eq.s32.totalorder %s5616_s22, 0 }
   0xf   : > { %s5632_s27 = scalar_select %p28_p1, %s5537_s20, %s30_s25  }
  0x10   : > { %p5634_p5 = por %p38_p2, %p37_p0  ;;  %p5640_p6 = por %p8626_p4, %p43_p3 }
  0x11   : > { %8750 = sst [smem:[#allocation23_spill]] %s5632_s27  ;;  %p151_p7 = scmp.eq.s32.totalorder %s5616_s22, 1 }
  0x12   : > { %s8751_s28 = scalar_select %p5634_p5, 1, 0 }
  0x13   : > { %s8752_s29 = scalar_select %p5640_p6, 1, 0 }
  0x14   : > { %p157_p8 = scmp.eq.s32.totalorder %s4025_s23, 1  ;;  %p4026_p9 = scmp.ge.s32.totalorder %s5541_s21, 1 }
  0x15   : > { %p164_p10 = scmp.lt.s32.totalorder %s5541_s21, 3  ;;  %p5647_p11 = por %p151_p7, %p37_p0 }
  0x16   : > { %p5651_p12 = por %p157_p8, %p43_p3  ;;  %s5543_s8 = smov [#allocation5]  }
  0x17   : > { %s8753_s30 = scalar_select %p5647_p11, 1, 0 }
  0x18   : > { %s8754_s6 = scalar_select %p5651_p12, 1, 0 }
  0x19   : > { %p5655_p13 = pnand %p4026_p9, %p164_p10  ;;  %s176_s9 = sshll.u32 %s5543_s8, 4  ;;  %s177_s9 = int_to_ptr.vmem [resolvable:$true] %s176_s9 }
  0x1a   : > { %8755 = sst [smem:[#allocation24_spill]] %s8754_s6  ;;  %s5544_s11 = smov [#allocation8]  }
  0x1b   : > { %s8756_s7 = scalar_select %p5655_p13, 1, 0 }
  0x1c   : > { %p4917_p1 = pneg %p5655_p13  ;;  %s200_s12 = sshll.u32 %s5544_s11, 4  ;;  %s5667_s12 = int_to_ptr.vmem [resolvable:$true] %s200_s12 }
  0x1d   : > { %s8758_s1 = sld [smem:[#allocation161_spill]] }
  0x1e   : > { %p5663_p2 = pnand %p4917_p1, %p8626_p4 }
  0x20   : > { %p5677_p3 = pneg %p5663_p2 }
  0x23   : > { %s5383_s15 = scalar_lea.hbm %s8758_s1, 6144 }
  0x24   : > { %p5384_p0 = scmp.ne.s32.totalorder %s8758_s1, %s5383_s15  ;;  %p5390_p9 = scmp.lt.u32.totalorder %s5383_s15, %s8758_s1 }
  0x26   : > { %p5386_p7 = pnand %p5677_p3, %p5384_p0 }
  0x28   : > { %p5387_p8 = pneg %p5386_p7 }
  0x2a   : > { %p5392_p10 = pnand %p5390_p9, %p5387_p8 }
  0x2c   : > { %5395 = shalt.err (!%p5392_p10)
}
  0x2d   : > { %s5396_s8 = scalar_lea.vmem %s177_s9, 6144  ;;  %p5404_p11 = scmp.lt.s32.totalorder %s177_s9, %s177_s9 }
  0x2e   : > { %p5397_p1 = scmp.ne.s32.totalorder %s177_s9, %s5396_s8  ;;  %p5405_p6 = scmp.lt.s32.totalorder %s5396_s8, %s5396_s8 }
  0x30   : > { %p5399_p4 = pnand %p5397_p1, %p5677_p3  ;;  %p5406_p13 = por %p5405_p6, %p5404_p11 }
  0x32   : > { %p5400_p12 = pneg %p5399_p4 }
  0x34   : > { %p5407_p5 = pnand %p5406_p13, %p5400_p12 }
  0x36   : > { %5410 = shalt.err (!%p5407_p5)
}
  0x37   : > { %s5545_s11 = smov 384   ;;  %s5546_s13 = smov 24  }
  0x38   : > { %4920 = dma.hbm_to_vmem [thread:$0]  (!%p5663_p2), %s8758_s1, 6144, %s177_s9, [#allocation6], %s5545_s11, %s5545_s11, %s5546_s13  }
  0x39   : > { %s5411_s25 = scalar_lea.hbm %s8623_s3, 2048 }
  0x3a   : > { %p5412_p4 = scmp.ne.s32.totalorder %s8623_s3, %s5411_s25  ;;  %p5418_p11 = scmp.lt.u32.totalorder %s5411_s25, %s8623_s3 }
  0x3c   : > { %p5414_p6 = pnand %p5412_p4, %p5677_p3 }
  0x3e   : > { %p5415_p5 = pneg %p5414_p6 }
  0x40   : > { %p5420_p12 = pnand %p5418_p11, %p5415_p5 }
  0x42   : > { %5423 = shalt.err (!%p5420_p12)
}
  0x43   : > { %s5424_s9 = scalar_lea.vmem %s5667_s12, 2048  ;;  %p5432_p8 = scmp.lt.s32.totalorder %s5667_s12, %s5667_s12 }
  0x44   : > { %p5425_p13 = scmp.ne.s32.totalorder %s5667_s12, %s5424_s9  ;;  %p5433_p9 = scmp.lt.s32.totalorder %s5424_s9, %s5424_s9 }
  0x46   : > { %p5427_p0 = pnand %p5425_p13, %p5677_p3  ;;  %p5434_p10 = por %p5433_p9, %p5432_p8 }
  0x48   : > { %p5428_p7 = pneg %p5427_p0 }
  0x4a   : > { %p5435_p1 = pnand %p5434_p10, %p5428_p7 }
  0x4c   : > { %5438 = shalt.err (!%p5435_p1)
}
  0x4d   : > { %s5547_s27 = smov 128   ;;  %s5548_s24 = smov 8  }
  0x4e   : > { %4926 = dma.hbm_to_vmem [thread:$0]  (!%p5663_p2), %s8623_s3, 2048, %s5667_s12, [#allocation9], %s5547_s27, %s5547_s27, %s5548_s24  }
  0x4f   : > { %s5549_s14 = smov [#allocation7]   ;;  %s5550_s16 = smov [#allocation10]  }
  0x50   : > { %s190_s15 = sshll.u32 %s5549_s14, 4  ;;  %s214_s17 = sshll.u32 %s5550_s16, 4  ;;  %s191_s15 = int_to_ptr.vmem [resolvable:$true] %s190_s15  ;;  %s215_s17 = int_to_ptr.vmem [resolvable:$true] %s214_s17 }
  0x51   : > { %s5439_s8 = scalar_lea.hbm %s8622_s2, 48 }
  0x52   : > { %p5440_p4 = scmp.ne.s32.totalorder %s8622_s2, %s5439_s8  ;;  %p5446_p11 = scmp.lt.u32.totalorder %s5439_s8, %s8622_s2 }
  0x54   : > { %p5442_p6 = pnand %p5440_p4, %p5677_p3 }
  0x56   : > { %p5443_p5 = pneg %p5442_p6 }
  0x58   : > { %p5448_p12 = pnand %p5446_p11, %p5443_p5 }
  0x5a   : > { %5451 = shalt.err (!%p5448_p12)
}
  0x5b   : > { %s5452_s12 = scalar_lea.vmem %s191_s15, 48  ;;  %s5459_s27 = scalar_lea.vmem %s191_s15, 64 }
  0x5c   : > { %p5453_p13 = scmp.ne.s32.totalorder %s191_s15, %s5452_s12  ;;  %p5460_p8 = scmp.lt.s32.totalorder %s191_s15, %s191_s15 }
  0x5d   : > { %p5461_p9 = scmp.lt.s32.totalorder %s5459_s27, %s5452_s12 }
  0x5e   : > { %p5455_p0 = pnand %p5453_p13, %p5677_p3 }
  0x5f   : > { %p5462_p10 = por %p5461_p9, %p5460_p8 }
  0x60   : > { %p5456_p7 = pneg %p5455_p0 }
  0x62   : > { %p5463_p1 = pnand %p5462_p10, %p5456_p7 }
  0x64   : > { %5466 = shalt.err (!%p5463_p1)
}
  0x65   : > { %4923 = dma.hbm_to_vmem [thread:$0]  (!%p5663_p2), %s8622_s2, 48, %s191_s15, [#allocation6]  }
  0x66   : > { %s5467_s11 = scalar_lea.hbm %s8624_s4, 16 }
  0x67   : > { %p5468_p4 = scmp.ne.s32.totalorder %s8624_s4, %s5467_s11  ;;  %p5474_p11 = scmp.lt.u32.totalorder %s5467_s11, %s8624_s4 }
  0x69   : > { %p5470_p6 = pnand %p5468_p4, %p5677_p3 }
  0x6b   : > { %p5471_p5 = pneg %p5470_p6 }
  0x6d   : > { %p5476_p12 = pnand %p5474_p11, %p5471_p5 }
  0x6f   : > { %5479 = shalt.err (!%p5476_p12)
}
  0x70   : > { %s5480_s26 = scalar_lea.vmem %s215_s17, 16  ;;  %s5487_s15 = scalar_lea.vmem %s215_s17, 32 }
  0x71   : > { %p5481_p13 = scmp.ne.s32.totalorder %s215_s17, %s5480_s26  ;;  %p5488_p8 = scmp.lt.s32.totalorder %s215_s17, %s215_s17 }
  0x72   : > { %p5489_p9 = scmp.lt.s32.totalorder %s5487_s15, %s5480_s26 }
  0x73   : > { %p5483_p0 = pnand %p5481_p13, %p5677_p3 }
  0x74   : > { %p5490_p10 = por %p5489_p9, %p5488_p8 }
  0x75   : > { %p5484_p7 = pneg %p5483_p0 }
  0x77   : > { %p5491_p1 = pnand %p5490_p10, %p5484_p7 }
  0x79   : > { %5494 = shalt.err (!%p5491_p1)
}
  0x7a   : > { %4929 = dma.hbm_to_vmem [thread:$0]  (!%p5663_p2), %s8624_s4, 16, %s215_s17, [#allocation9]  }
  0x7b   : > { %p4031_p4 = scmp.ge.s32.totalorder %s5541_s21, 2 }
  0x7d   : > { %221 = sbr.rel (%p4031_p4) target bundleno = 147 (0x93), region = 32 }
  0x84   : > { %s225_s23 = sand.u32 1, %s5537_s20   ;;  %s4050_s12 = sshll.u32 %s5541_s21, 13 }
  0x85   : > { %s4032_s10 = sshll.u32 %s225_s23, 10  ;;  %s235_s17 = scalar_lea.hbm %s8620_s0, %s4050_s12 }
  0x86   : > { %p8760_p2 = scmp.ne.s32.totalorder %s8751_s28, 0  ;;  %s229_s18 = scalar_lea.vmem [#allocation2], %s4032_s10 }
  0x87   : > { %s248_s6 = sshll.u32 %s229_s18, 4  ;;  %s5551_s13 = smov 16384   ;;  %s249_s6 = int_to_ptr.vmem [resolvable:$true] %s248_s6 }
  0x88   : > { %s4892_s24 = scalar_select %p8760_p2, [#allocation0], [#allocation16] }
  0x89   : > { %4893 = sst [smem:[#allocation13]] (%p8760_p2), %s5551_s13  ;;  %s5552_s14 = smov 8192  }
  0x8a   : > { %s240_s11 = sld [smem:[%s4892_s24]]   ;;  %s5553_s16 = smov 64  }
  0x8b   : > { %4894 = sst [smem:[#allocation13 + $0x1]] (%p8760_p2), %s5552_s14  ;;  %s5554_s25 = smov 128  }
  0x8c   : > { %4895 = sst [smem:[#allocation13 + $0x2]] (%p8760_p2), %s5553_s16  ;;  %s5555_s15 = smov 8  }
  0x8d   : > { %4896 = sst [smem:[#allocation13 + $0x3]] (%p8760_p2), %s5554_s25  ;;  %s226_s9 = scalar_lea.sflag [#allocation3], %s225_s23 }
  0x8e   : > { %4897 = sst [smem:[#allocation13 + $0x4]] (%p8760_p2), %s5554_s25  ;;  %s5556_s12 = smov [#allocation12]  }
  0x8f   : > { %4898 = sst [smem:[#allocation13 + $0x5]] (%p8760_p2), %s5555_s15 }
  0x90   : > { %s4035_s26 = sshll.u32 %s240_s11, 26 }
  0x91   : > { %s4036_s8 = sadd.s32 134217728, %s4035_s26 }
  0x92   : > { %4899 = dma.general (%p8760_p2), %s235_s17, 16384, %s249_s6, %s226_s9, %s5556_s12, [#allocation13], %s4036_s8, 0  }
  0x93 PF: > { %p8761_p3 = scmp.ne.s32.totalorder %s8756_s7, 0 }
  0x95   : > { %273 = sbr.rel (%p8761_p3) target bundleno = 1320 (0x528), region = 40 }
  0x9c   : > { %s5779_s10 = sand.u32 1, %s5533_s19   ;;  %p8762_p6 = scmp.ne.s32.totalorder %s8752_s29, 0 }
  0x9d   : > { %s4038_s27 = sshll.u32 %s5779_s10, 10  ;;  %s276_s1 = scalar_lea.sflag [#allocation3], %s5779_s10 }
  0x9e   : > { %s5785_s24 = scalar_lea.vmem [#allocation2], %s4038_s27 }
  0x9f   : > { %5512 = dma.done.wait (%p8762_p6), %s276_s1, 16384  }
  0xa0   : > { %5514 = vsyncadd (%p8762_p6), %s276_s1, 4294950912  ;;  %p8763_p5 = scmp.eq.s32.totalorder %s5616_s22, 0 }
  0xa2   : > { %5516 = dma.done.wait (%p8763_p5), [#allocation6], 6192   ;;  %p8764_p11 = pmov %p8763_p5 }
  0xa3   : > { %p8765_p12 = pmov %p8763_p5 }
  0xa4   : > { %5518 = vsyncadd (%p8764_p11), [#allocation6], 4294961104 }
  0xa5   : > { %5520 = dma.done.wait (%p8765_p12), [#allocation9], 2064   ;;  %p8766_p13 = pmov %p8763_p5 }
  0xa6   : > { %v8642_v0 = vmov 0.0   ;;  %v453_v1 = vld [vmem:[#allocation5 + $0x8] sm:$0xff]  ;;  %v456_v2 = vld [vmem:[#allocation5 + $0x20] sm:$0xff]  ;;  %v455_v5 = vld [vmem:[#allocation5 + $0x18] sm:$0xff]  ;;  %s8106_s28 = scalar_lea.vmem [#allocation11], %s4038_s27  ;;  %s3872_s29 = scalar_lea.sflag [#allocation4], %s5779_s10 }
  0xa7   : > { %5522 = vsyncadd (%p8766_p13), [#allocation9], 4294965232  ;;  %581 = vmatprep.mubr.f32.mxu0 %v8642_v0  ;;  %v452_v3 = vld [vmem:[#allocation5] sm:$0xff]  ;;  %v4788_v4 = vpack.c.bf16 %v456_v2, %v453_v1  ;;  %v459_v6 = vld [vmem:[#allocation5 + $0x38] sm:$0xff] }
  0xa8   : > { %v462_v7 = vld [vmem:[#allocation5 + $0x50] sm:$0xff]  ;;  %v4790_v8 = vpack.c.bf16 %v455_v5, %v452_v3  ;;  %v461_v11 = vld [vmem:[#allocation5 + $0x48] sm:$0xff]  ;;  %v468_v13 = vld [vmem:[#allocation5 + $0x80] sm:$0xff] }
  0xa9   : > { %v4792_v9 = vpack.c.bf16 %v462_v7, %v459_v6  ;;  %v458_v10 = vld [vmem:[#allocation5 + $0x30] sm:$0xff]  ;;  %v465_v12 = vld [vmem:[#allocation5 + $0x68] sm:$0xff]  ;;  %4789 = vmatprep.subr.bf16.mxu0 %v4788_v4  ;;  %v464_v16 = vld [vmem:[#allocation5 + $0x60] sm:$0xff] }
  0xaa   : > { %4791 = vmatpush1.bf16.msra.mxu0 %v4790_v8  ;;  %v4794_v14 = vpack.c.bf16 %v461_v11, %v458_v10  ;;  %v4796_v15 = vpack.c.bf16 %v468_v13, %v465_v12  ;;  %v467_v17 = vld [vmem:[#allocation5 + $0x78] sm:$0xff]  ;;  %v474_v19 = vld [vmem:[#allocation5 + $0xb0] sm:$0xff]  ;;  %v473_v23 = vld [vmem:[#allocation5 + $0xa8] sm:$0xff] }
  0xab   : > { %4793 = vmatprep.subr.bf16.mxu0 %v4792_v9  ;;  %v471_v18 = vld [vmem:[#allocation5 + $0x98] sm:$0xff]  ;;  %v4798_v20 = vpack.c.bf16 %v467_v17, %v464_v16  ;;  %v470_v22 = vld [vmem:[#allocation5 + $0x90] sm:$0xff]  ;;  %v477_v24 = vld [vmem:[#allocation5 + $0xc8] sm:$0xff] }
  0xac   : > { %v4800_v21 = vpack.c.bf16 %v474_v19, %v471_v18  ;;  %v480_v25 = vld [vmem:[#allocation5 + $0xe0] sm:$0xff]  ;;  %v4802_v27 = vpack.c.bf16 %v473_v23, %v470_v22  ;;  %v479_v30 = vld [vmem:[#allocation5 + $0xd8] sm:$0xff]  ;;  %v486_v32 = vld [vmem:[#allocation5 + $0x110] sm:$0xff] }
  0xad   : > { %v324_v26 = vld [vmem:[%s5785_s24] sm:$0xff]  ;;  %v4804_v28 = vpack.c.bf16 %v480_v25, %v477_v24  ;;  %v483_v31 = vld [vmem:[#allocation5 + $0xf8] sm:$0xff]  ;;  %v482_v35 = vld [vmem:[#allocation5 + $0xf0] sm:$0xff] }
  0xae   : > { %4795 = vmatpush1.bf16.msra.mxu0 %v4794_v14  ;;  %4372 = vmatprep.mubr.f32.mxu1 %v324_v26  ;;  %v476_v29 = vld [vmem:[#allocation5 + $0xc0] sm:$0xff]  ;;  %v4808_v34 = vpack.c.bf16 %v486_v32, %v483_v31  ;;  %v485_v36 = vld [vmem:[#allocation5 + $0x108] sm:$0xff]  ;;  %v454_v40 = vld [vmem:[#allocation5 + $0x10] sm:$0xff] }
  0xaf   : > { %4797 = vmatprep.subr.bf16.mxu0 %v4796_v15  ;;  %v4806_v33 = vpack.c.bf16 %v479_v30, %v476_v29  ;;  %v489_v37 = vld [vmem:[#allocation5 + $0x128] sm:$0xff]  ;;  %v492_v38 = vld [vmem:[#allocation5 + $0x140] sm:$0xff]  ;;  %v4810_v39 = vpack.c.bf16 %v485_v36, %v482_v35  ;;  %v491_v44 = vld [vmem:[#allocation5 + $0x138] sm:$0xff] }
  0xb0   : > { %v457_v41 = vld [vmem:[#allocation5 + $0x28] sm:$0xff]  ;;  %v4812_v42 = vpack.c.bf16 %v492_v38, %v489_v37  ;;  %v488_v43 = vld [vmem:[#allocation5 + $0x120] sm:$0xff]  ;;  %v495_v46 = vld [vmem:[#allocation5 + $0x158] sm:$0xff] }
  0xb1   : > { %v4820_v45 = vpack.c.bf16 %v457_v41, %v454_v40  ;;  %v498_v47 = vld [vmem:[#allocation5 + $0x170] sm:$0xff]  ;;  %v460_v48 = vld [vmem:[#allocation5 + $0x40] sm:$0xff]  ;;  %v463_v49 = vld [vmem:[#allocation5 + $0x58] sm:$0xff]  ;;  %v4814_v50 = vpack.c.bf16 %v491_v44, %v488_v43 }
  0xb2   : > { %4799 = vmatpush1.bf16.msra.mxu0 %v4798_v20  ;;  %v4824_v51 = vpack.c.bf16 %v463_v49, %v460_v48  ;;  %v4816_v52 = vpack.c.bf16 %v498_v47, %v495_v46  ;;  %v494_v53 = vld [vmem:[#allocation5 + $0x150] sm:$0xff]  ;;  %v497_v54 = vld [vmem:[#allocation5 + $0x168] sm:$0xff]  ;;  %v472_v59 = vld [vmem:[#allocation5 + $0xa0] sm:$0xff] }
  0xb3   : > { %4801 = vmatprep.subr.bf16.mxu0 %v4800_v21  ;;  %4821 = vmatprep.subr.bf16.mxu1 %v4820_v45  ;;  %v466_v55 = vld [vmem:[#allocation5 + $0x70] sm:$0xff]  ;;  %v469_v56 = vld [vmem:[#allocation5 + $0x88] sm:$0xff]  ;;  %v4818_v57 = vpack.c.bf16 %v497_v54, %v494_v53  ;;  %v475_v60 = vld [vmem:[#allocation5 + $0xb8] sm:$0xff] }
  0xb4   : > { %4823 = vmatpush3.bf16.msra.mxu1 %v4820_v45  ;;  %v4828_v58 = vpack.c.bf16 %v469_v56, %v466_v55  ;;  %v4832_v61 = vpack.c.bf16 %v475_v60, %v472_v59  ;;  %v478_v62 = vld [vmem:[#allocation5 + $0xd0] sm:$0xff]  ;;  %v481_v63 = vld [vmem:[#allocation5 + $0xe8] sm:$0xff]  ;;  %v484_v3 = vld [vmem:[#allocation5 + $0x100] sm:$0xff] }
  0xb5   : > { %4825 = vmatprep.subr.bf16.mxu1 %v4824_v51  ;;  %v325_v1 = vld [vmem:[%s5785_s24 + $0x8] sm:$0xff]  ;;  %v4836_v2 = vpack.c.bf16 %v481_v63, %v478_v62  ;;  %v487_v4 = vld [vmem:[#allocation5 + $0x118] sm:$0xff]  ;;  %v326_v5 = vld [vmem:[%s5785_s24 + $0x10] sm:$0xff] }
  0xb6   : > { %4803 = vmatpush1.bf16.msra.mxu0 %v4802_v27  ;;  %v4840_v6 = vpack.c.bf16 %v487_v4, %v484_v3  ;;  %v490_v7 = vld [vmem:[#allocation5 + $0x130] sm:$0xff]  ;;  %v493_v8 = vld [vmem:[#allocation5 + $0x148] sm:$0xff]  ;;  %v327_v9 = vld [vmem:[%s5785_s24 + $0x18] sm:$0xff] }
  0xb7   : > { %4805 = vmatprep.subr.bf16.mxu0 %v4804_v28  ;;  %v4844_v10 = vpack.c.bf16 %v493_v8, %v490_v7  ;;  %v496_v11 = vld [vmem:[#allocation5 + $0x160] sm:$0xff]  ;;  %v499_v12 = vld [vmem:[#allocation5 + $0x178] sm:$0xff]  ;;  %v329_v15 = vld [vmem:[%s5785_s24 + $0x28] sm:$0xff] }
  0xb8   : > { %4827 = vmatpush3.bf16.msra.mxu1 %v4824_v51  ;;  %v328_v13 = vld [vmem:[%s5785_s24 + $0x20] sm:$0xff]  ;;  %v4848_v14 = vpack.c.bf16 %v499_v12, %v496_v11  ;;  %v330_v16 = vld [vmem:[%s5785_s24 + $0x30] sm:$0xff]  ;;  %v331_v17 = vld [vmem:[%s5785_s24 + $0x38] sm:$0xff] }
  0xb9   : > { %4829 = vmatprep.subr.bf16.mxu1 %v4828_v58  ;;  %v332_v18 = vld [vmem:[%s5785_s24 + $0x40] sm:$0xff]  ;;  %v333_v19 = vld [vmem:[%s5785_s24 + $0x48] sm:$0xff]  ;;  %v334_v20 = vld [vmem:[%s5785_s24 + $0x50] sm:$0xff] }
  0xba   : > { %4807 = vmatpush1.bf16.msra.mxu0 %v4806_v33  ;;  %v335_v21 = vld [vmem:[%s5785_s24 + $0x58] sm:$0xff]  ;;  %v336_v22 = vld [vmem:[%s5785_s24 + $0x60] sm:$0xff]  ;;  %v337_v23 = vld [vmem:[%s5785_s24 + $0x68] sm:$0xff] }
  0xbb   : > { %4809 = vmatprep.subr.bf16.mxu0 %v4808_v34  ;;  %v338_v24 = vld [vmem:[%s5785_s24 + $0x70] sm:$0xff]  ;;  %v339_v25 = vld [vmem:[%s5785_s24 + $0x78] sm:$0xff]  ;;  %v341_v27 = vld [vmem:[%s5785_s24 + $0x88] sm:$0xff] }
  0xbc   : > { %4831 = vmatpush3.bf16.msra.mxu1 %v4828_v58  ;;  %v342_v28 = vld [vmem:[%s5785_s24 + $0x90] sm:$0xff]  ;;  %v343_v29 = vld [vmem:[%s5785_s24 + $0x98] sm:$0xff]  ;;  %v344_v30 = vld [vmem:[%s5785_s24 + $0xa0] sm:$0xff] }
  0xbd   : > { %4833 = vmatprep.subr.bf16.mxu1 %v4832_v61  ;;  %v345_v31 = vld [vmem:[%s5785_s24 + $0xa8] sm:$0xff]  ;;  %v346_v32 = vld [vmem:[%s5785_s24 + $0xb0] sm:$0xff]  ;;  %v347_v33 = vld [vmem:[%s5785_s24 + $0xb8] sm:$0xff] }
  0xbe   : > { %4811 = vmatpush1.bf16.msra.mxu0 %v4810_v39  ;;  %v348_v34 = vld [vmem:[%s5785_s24 + $0xc0] sm:$0xff]  ;;  %v349_v35 = vld [vmem:[%s5785_s24 + $0xc8] sm:$0xff]  ;;  %v350_v36 = vld [vmem:[%s5785_s24 + $0xd0] sm:$0xff] }
  0xbf   : > { %4813 = vmatprep.subr.bf16.mxu0 %v4812_v42  ;;  %v351_v37 = vld [vmem:[%s5785_s24 + $0xd8] sm:$0xff]  ;;  %v352_v38 = vld [vmem:[%s5785_s24 + $0xe0] sm:$0xff]  ;;  %v353_v39 = vld [vmem:[%s5785_s24 + $0xe8] sm:$0xff] }
  0xc0   : > { %4835 = vmatpush3.bf16.msra.mxu1 %v4832_v61  ;;  %v5850_v40 = vld [vmem:[%s5785_s24 + $0xf0] sm:$0xff]  ;;  %v5855_v41 = vld [vmem:[%s5785_s24 + $0xf8] sm:$0xff]  ;;  %v5858_v42 = vld [vmem:[%s5785_s24 + $0x100] sm:$0xff] }
  0xc1   : > { %4837 = vmatprep.subr.bf16.mxu1 %v4836_v2  ;;  %v5864_v43 = vld [vmem:[%s5785_s24 + $0x108] sm:$0xff]  ;;  %v5867_v44 = vld [vmem:[%s5785_s24 + $0x110] sm:$0xff]  ;;  %v5873_v45 = vld [vmem:[%s5785_s24 + $0x118] sm:$0xff] }
  0xc2   : > { %4815 = vmatpush1.bf16.msra.mxu0 %v4814_v50  ;;  %v5876_v46 = vld [vmem:[%s5785_s24 + $0x120] sm:$0xff]  ;;  %v5882_v47 = vld [vmem:[%s5785_s24 + $0x128] sm:$0xff]  ;;  %v5885_v48 = vld [vmem:[%s5785_s24 + $0x130] sm:$0xff] }
  0xc3   : > { %4817 = vmatprep.subr.bf16.mxu0 %v4816_v52  ;;  %v5891_v49 = vld [vmem:[%s5785_s24 + $0x138] sm:$0xff]  ;;  %v5894_v50 = vld [vmem:[%s5785_s24 + $0x140] sm:$0xff]  ;;  %v5900_v51 = vld [vmem:[%s5785_s24 + $0x148] sm:$0xff] }
  0xc4   : > { %4839 = vmatpush3.bf16.msra.mxu1 %v4836_v2  ;;  %v5903_v52 = vld [vmem:[%s5785_s24 + $0x150] sm:$0xff]  ;;  %v5909_v53 = vld [vmem:[%s5785_s24 + $0x158] sm:$0xff]  ;;  %v5912_v54 = vld [vmem:[%s5785_s24 + $0x160] sm:$0xff] }
  0xc5   : > { %4841 = vmatprep.subr.bf16.mxu1 %v4840_v6  ;;  %v5918_v55 = vld [vmem:[%s5785_s24 + $0x168] sm:$0xff]  ;;  %v5921_v56 = vld [vmem:[%s5785_s24 + $0x170] sm:$0xff]  ;;  %v5930_v58 = vld [vmem:[%s5785_s24 + $0x180] sm:$0xff] }
  0xc6   : > { %4819 = vmatpush1.bf16.msra.mxu0 %v4818_v57  ;;  %v5927_v57 = vld [vmem:[%s5785_s24 + $0x178] sm:$0xff]  ;;  %v5936_v59 = vld [vmem:[%s5785_s24 + $0x188] sm:$0xff]  ;;  %v5939_v60 = vld [vmem:[%s5785_s24 + $0x190] sm:$0xff] }
  0xc7   : > { %v5945_v61 = vld [vmem:[%s5785_s24 + $0x198] sm:$0xff]  ;;  %v5949_v62 = vld [vmem:[%s5785_s24 + $0x1a0] sm:$0xff]  ;;  %v5955_v63 = vld [vmem:[%s5785_s24 + $0x1a8] sm:$0xff] }
  0xc8   : > { %4843 = vmatpush3.bf16.msra.mxu1 %v4840_v6  ;;  %v5965_v2 = vld [vmem:[%s5785_s24 + $0x1b8] sm:$0xff]  ;;  %v5969_v3 = vld [vmem:[%s5785_s24 + $0x1c0] sm:$0xff]  ;;  %v5975_v4 = vld [vmem:[%s5785_s24 + $0x1c8] sm:$0xff] }
  0xc9   : > { %582 = vmatmul.mubr.f32.vlgmr.msra.gmra.mrb[0].mxu0 %v324_v26  ;;  %4845 = vmatprep.subr.bf16.mxu1 %v4844_v10  ;;  %v340_v26 = vld [vmem:[%s5785_s24 + $0x80] sm:$0xff]  ;;  %v5985_v6 = vld [vmem:[%s5785_s24 + $0x1d8] sm:$0xff]  ;;  %v5995_v8 = vld [vmem:[%s5785_s24 + $0x1e8] sm:$0xff] }
  0xca   : > { %587 = vmatprep.mubr.f32.mxu0 %v8642_v0  ;;  %v5989_v7 = vld [vmem:[%s5785_s24 + $0x1e0] sm:$0xff]  ;;  %v6015_v12 = vld [vmem:[%s5785_s24 + $0x208] sm:$0xff] }
  0xcb   : > { %v6009_v11 = vld [vmem:[%s5785_s24 + $0x200] sm:$0xff] }
  0xcc   : > { %4847 = vmatpush3.bf16.msra.mxu1 %v4844_v10  ;;  %v6005_v10 = vld [vmem:[%s5785_s24 + $0x1f8] sm:$0xff] }
  0xcd   : > { %588 = vmatmul.mubr.f32.gmra.mrb[2].mxu0 %v325_v1  ;;  %4849 = vmatprep.subr.bf16.mxu1 %v4848_v14 }
  0xce   : > { %593 = vmatprep.mubr.f32.mxu0 %v8642_v0 }
  0xd0   : > { %4851 = vmatpush3.bf16.msra.mxu1 %v4848_v14  ;;  %v6025_v14 = vld [vmem:[%s5785_s24 + $0x218] sm:$0xff] }
  0xd1   : > { %594 = vmatmul.mubr.f32.gmra.mrb[4].mxu0 %v326_v5 }
  0xd2   : > { %599 = vmatprep.mubr.f32.mxu0 %v8642_v0 }
  0xd3   : > { %4373 = vmatmul.mubr.f32.vlgmr.msra.gmra.mrb[0].mxu1 %v325_v1  ;;  %v5959_v1 = vld [vmem:[%s5785_s24 + $0x1b0] sm:$0xff] }
  0xd4   : > { %4375 = vmatprep.mubr.f32.mxu1 %v326_v5  ;;  %v5979_v5 = vld [vmem:[%s5785_s24 + $0x1d0] sm:$0xff] }
  0xd5   : > { %600 = vmatmul.mubr.f32.gmra.mrb[6].mxu0 %v327_v9 }
  0xd6   : > { %605 = vmatprep.mubr.f32.mxu0 %v8642_v0 }
  0xd7   : > { %4376 = vmatmul.mubr.f32.gmra.mrb[2].mxu1 %v327_v9  ;;  %v5999_v9 = vld [vmem:[%s5785_s24 + $0x1f0] sm:$0xff] }
  0xd8   : > { %4378 = vmatprep.mubr.f32.mxu1 %v328_v13 }
  0xd9   : > { %606 = vmatmul.mubr.f32.gmra.mrb[8].mxu0 %v328_v13  ;;  %v6019_v13 = vld [vmem:[%s5785_s24 + $0x210] sm:$0xff] }
  0xda   : > { %611 = vmatprep.mubr.f32.mxu0 %v8642_v0 }
  0xdb   : > { %4379 = vmatmul.mubr.f32.gmra.mrb[4].mxu1 %v329_v15 }
  0xdc   : > { %4381 = vmatprep.mubr.f32.mxu1 %v330_v16 }
  0xdd   : > { %612 = vmatmul.mubr.f32.gmra.mrb[10].mxu0 %v329_v15  ;;  %v6029_v15 = vld [vmem:[%s5785_s24 + $0x220] sm:$0xff] }
  0xde   : > { %617 = vmatprep.mubr.f32.mxu0 %v8642_v0 }
  0xdf   : > { %4382 = vmatmul.mubr.f32.gmra.mrb[6].mxu1 %v331_v17 }
  0xe0   : > { %4384 = vmatprep.mubr.f32.mxu1 %v332_v18 }
  0xe1   : > { %618 = vmatmul.mubr.f32.gmra.mrb[12].mxu0 %v330_v16  ;;  %v6035_v16 = vld [vmem:[%s5785_s24 + $0x228] sm:$0xff] }
  0xe2   : > { %623 = vmatprep.mubr.f32.mxu0 %v8642_v0 }
  0xe3   : > { %4385 = vmatmul.mubr.f32.gmra.mrb[8].mxu1 %v333_v19 }
  0xe4   : > { %4387 = vmatprep.mubr.f32.mxu1 %v334_v20 }
  0xe5   : > { %624 = vmatmul.mubr.f32.gmra.mrb[14].mxu0 %v331_v17  ;;  %v6039_v17 = vld [vmem:[%s5785_s24 + $0x230] sm:$0xff] }
  0xe6   : > { %629 = vmatprep.mubr.f32.mxu0 %v8642_v0 }
  0xe7   : > { %4388 = vmatmul.mubr.f32.gmra.mrb[10].mxu1 %v335_v21 }
  0xe8   : > { %4390 = vmatprep.mubr.f32.mxu1 %v336_v22 }
  0xe9   : > { %630 = vmatmul.mubr.f32.gmra.mrb[16].mxu0 %v332_v18  ;;  %v6045_v18 = vld [vmem:[%s5785_s24 + $0x238] sm:$0xff] }
  0xea   : > { %635 = vmatprep.mubr.f32.mxu0 %v8642_v0 }
  0xeb   : > { %4391 = vmatmul.mubr.f32.gmra.mrb[12].mxu1 %v337_v23 }
  0xec   : > { %4393 = vmatprep.mubr.f32.mxu1 %v338_v24 }
  0xed   : > { %636 = vmatmul.mubr.f32.gmra.mrb[18].mxu0 %v333_v19  ;;  %v6049_v19 = vld [vmem:[%s5785_s24 + $0x240] sm:$0xff] }
  0xee   : > { %641 = vmatprep.mubr.f32.mxu0 %v8642_v0 }
  0xef   : > { %4394 = vmatmul.mubr.f32.gmra.mrb[14].mxu1 %v339_v25 }
  0xf0   : > { %4396 = vmatprep.mubr.f32.mxu1 %v340_v26 }
  0xf1   : > { %642 = vmatmul.mubr.f32.gmra.mrb[20].mxu0 %v334_v20  ;;  %v6055_v20 = vld [vmem:[%s5785_s24 + $0x248] sm:$0xff] }
  0xf2   : > { %647 = vmatprep.mubr.f32.mxu0 %v8642_v0 }
  0xf3   : > { %4397 = vmatmul.mubr.f32.gmra.mrb[16].mxu1 %v341_v27 }
  0xf4   : > { %4399 = vmatprep.mubr.f32.mxu1 %v342_v28 }
  0xf5   : > { %648 = vmatmul.mubr.f32.gmra.mrb[22].mxu0 %v335_v21  ;;  %v6061_v21 = vld [vmem:[%s5785_s24 + $0x250] sm:$0xff] }
  0xf6   : > { %653 = vmatprep.mubr.f32.mxu0 %v8642_v0 }
  0xf7   : > { %4400 = vmatmul.mubr.f32.gmra.mrb[18].mxu1 %v343_v29 }
  0xf8   : > { %4402 = vmatprep.mubr.f32.mxu1 %v344_v30 }
  0xf9   : > { %654 = vmatmul.mubr.f32.gmra.mrb[24].mxu0 %v336_v22  ;;  %v6067_v22 = vld [vmem:[%s5785_s24 + $0x258] sm:$0xff] }
  0xfa   : > { %659 = vmatprep.mubr.f32.mxu0 %v8642_v0 }
  0xfb   : > { %4403 = vmatmul.mubr.f32.gmra.mrb[20].mxu1 %v345_v31 }
  0xfc   : > { %4405 = vmatprep.mubr.f32.mxu1 %v346_v32 }
  0xfd   : > { %660 = vmatmul.mubr.f32.gmra.mrb[26].mxu0 %v337_v23  ;;  %v6073_v23 = vld [vmem:[%s5785_s24 + $0x260] sm:$0xff] }
  0xfe   : > { %665 = vmatprep.mubr.f32.mxu0 %v8642_v0 }
  0xff   : > { %4406 = vmatmul.mubr.f32.gmra.mrb[22].mxu1 %v347_v33 }
 0x100   : > { %4408 = vmatprep.mubr.f32.mxu1 %v348_v34 }
 0x101   : > { %666 = vmatmul.mubr.f32.gmra.mrb[28].mxu0 %v338_v24  ;;  %v6079_v24 = vld [vmem:[%s5785_s24 + $0x268] sm:$0xff] }
 0x102   : > { %671 = vmatprep.mubr.f32.mxu0 %v8642_v0 }
 0x103   : > { %4409 = vmatmul.mubr.f32.gmra.mrb[24].mxu1 %v349_v35 }
 0x104   : > { %4411 = vmatprep.mubr.f32.mxu1 %v350_v36 }
 0x105   : > { %672 = vmatmul.mubr.f32.gmra.mrb[30].mxu0 %v339_v25  ;;  %v6085_v25 = vld [vmem:[%s5785_s24 + $0x270] sm:$0xff] }
 0x106   : > { %677 = vmatprep.mubr.f32.mxu0 %v8642_v0 }
 0x107   : > { %4412 = vmatmul.mubr.f32.gmra.mrb[26].mxu1 %v351_v37 }
 0x108   : > { %4414 = vmatprep.mubr.f32.mxu1 %v352_v38 }
 0x109   : > { %678 = vmatmul.mubr.f32.gmra.mrb[32].mxu0 %v340_v26  ;;  %v6091_v26 = vld [vmem:[%s5785_s24 + $0x278] sm:$0xff] }
 0x10a   : > { %683 = vmatprep.mubr.f32.mxu0 %v8642_v0 }
 0x10b   : > { %4415 = vmatmul.mubr.f32.gmra.mrb[28].mxu1 %v353_v39 }
 0x10c   : > { %4417 = vmatprep.mubr.f32.mxu1 %v5850_v40 }
 0x10d   : > { %684 = vmatmul.mubr.f32.gmra.mrb[34].mxu0 %v341_v27  ;;  %v6097_v27 = vld [vmem:[%s5785_s24 + $0x280] sm:$0xff] }
 0x10e   : > { %689 = vmatprep.mubr.f32.mxu0 %v8642_v0 }
 0x10f   : > { %4418 = vmatmul.mubr.f32.gmra.mrb[30].mxu1 %v5855_v41 }
 0x110   : > { %4420 = vmatprep.mubr.f32.mxu1 %v5858_v42 }
 0x111   : > { %690 = vmatmul.mubr.f32.gmra.mrb[36].mxu0 %v342_v28  ;;  %v6103_v28 = vld [vmem:[%s5785_s24 + $0x288] sm:$0xff] }
 0x112   : > { %695 = vmatprep.mubr.f32.mxu0 %v8642_v0 }
 0x113   : > { %4421 = vmatmul.mubr.f32.gmra.mrb[32].mxu1 %v5864_v43 }
 0x114   : > { %4423 = vmatprep.mubr.f32.mxu1 %v5867_v44 }
 0x115   : > { %696 = vmatmul.mubr.f32.gmra.mrb[38].mxu0 %v343_v29  ;;  %v502_v29 = vlaneseq }
 0x116   : > { %701 = vmatprep.mubr.f32.mxu0 %v8642_v0 }
 0x117   : > { %4424 = vmatmul.mubr.f32.gmra.mrb[34].mxu1 %v5873_v45 }
 0x118   : > { %4426 = vmatprep.mubr.f32.mxu1 %v5876_v46 }
 0x119   : > { %702 = vmatmul.mubr.f32.gmra.mrb[40].mxu0 %v344_v30  ;;  %v6109_v30 = vld [vmem:[%s5785_s24 + $0x290] sm:$0xff] }
 0x11a   : > { %707 = vmatprep.mubr.f32.mxu0 %v8642_v0 }
 0x11b   : > { %4427 = vmatmul.mubr.f32.gmra.mrb[36].mxu1 %v5882_v47 }
 0x11c   : > { %4429 = vmatprep.mubr.f32.mxu1 %v5885_v48 }
 0x11d   : > { %708 = vmatmul.mubr.f32.gmra.mrb[42].mxu0 %v345_v31  ;;  %v6112_v31 = vshrl.u32 %v502_v29, 7 }
 0x11e   : > { %713 = vmatprep.mubr.f32.mxu0 %v8642_v0 }
 0x11f   : > { %4430 = vmatmul.mubr.f32.gmra.mrb[38].mxu1 %v5891_v49 }
 0x120   : > { %4432 = vmatprep.mubr.f32.mxu1 %v5894_v50 }
 0x121   : > { %714 = vmatmul.mubr.f32.gmra.mrb[44].mxu0 %v346_v32  ;;  %v6117_v32 = vld [vmem:[%s5785_s24 + $0x298] sm:$0xff] }
 0x122   : > { %719 = vmatprep.mubr.f32.mxu0 %v8642_v0 }
 0x123   : > { %4433 = vmatmul.mubr.f32.gmra.mrb[40].mxu1 %v5900_v51 }
 0x124   : > { %4435 = vmatprep.mubr.f32.mxu1 %v5903_v52 }
 0x125   : > { %720 = vmatmul.mubr.f32.gmra.mrb[46].mxu0 %v347_v33  ;;  %v504_v33 = vsub.s32 0, %v6112_v31 }
 0x126   : > { %725 = vmatprep.mubr.f32.mxu0 %v8642_v0 }
 0x127   : > { %4436 = vmatmul.mubr.f32.gmra.mrb[42].mxu1 %v5909_v53 }
 0x128   : > { %4438 = vmatprep.mubr.f32.mxu1 %v5912_v54 }
 0x129   : > { %726 = vmatmul.mubr.f32.gmra.mrb[48].mxu0 %v348_v34  ;;  %v500_v34 = vld [vmem:[#allocation7] sm:$0x7] }
 0x12a   : > { %731 = vmatprep.mubr.f32.mxu0 %v8642_v0 }
 0x12b   : > { %4439 = vmatmul.mubr.f32.gmra.mrb[44].mxu1 %v5918_v55 }
 0x12c   : > { %4441 = vmatprep.mubr.f32.mxu1 %v5921_v56 }
 0x12d   : > { %732 = vmatmul.mubr.f32.gmra.mrb[50].mxu0 %v349_v35  ;;  %v508_v35 = vsub.s32 1, %v6112_v31 }
 0x12e   : > { %737 = vmatprep.mubr.f32.mxu0 %v8642_v0 }
 0x12f   : > { %4442 = vmatmul.mubr.f32.gmra.mrb[46].mxu1 %v5927_v57 }
 0x130   : > { %4444 = vmatprep.mubr.f32.mxu1 %v5930_v58 }
 0x131   : > { %738 = vmatmul.mubr.f32.gmra.mrb[52].mxu0 %v350_v36  ;;  %v6125_v36 = vld [vmem:[%s5785_s24 + $0x2a0] sm:$0xff] }
 0x132   : > { %743 = vmatprep.mubr.f32.mxu0 %v8642_v0 }
 0x133   : > { %4445 = vmatmul.mubr.f32.gmra.mrb[48].mxu1 %v5936_v59 }
 0x134   : > { %4447 = vmatprep.mubr.f32.mxu1 %v5939_v60 }
 0x135   : > { %744 = vmatmul.mubr.f32.gmra.mrb[54].mxu0 %v351_v37  ;;  %v6128_v37 = vrot.slane %v500_v34, %v504_v33 }
 0x136   : > { %749 = vmatprep.mubr.f32.mxu0 %v8642_v0 }
 0x137   : > { %4448 = vmatmul.mubr.f32.gmra.mrb[50].mxu1 %v5945_v61 }
 0x138   : > { %4450 = vmatprep.mubr.f32.mxu1 %v5949_v62 }
 0x139   : > { %750 = vmatmul.mubr.f32.gmra.mrb[56].mxu0 %v352_v38  ;;  %v6132_v38 = vrot.slane %v500_v34, %v508_v35  ;;  %v6185_v35 = vld [vmem:[%s5785_s24 + $0x2d0] sm:$0xff] }
 0x13a   : > { %755 = vmatprep.mubr.f32.mxu0 %v8642_v0 }
 0x13b   : > { %4451 = vmatmul.mubr.f32.gmra.mrb[52].mxu1 %v5955_v63 }
 0x13c   : > { %4453 = vmatprep.mubr.f32.mxu1 %v5959_v1 }
 0x13d   : > { %756 = vmatmul.mubr.f32.gmra.mrb[58].mxu0 %v353_v39 }
 0x13e   : > { %761 = vmatprep.mubr.f32.mxu0 %v8642_v0 }
 0x13f   : > { %4454 = vmatmul.mubr.f32.gmra.mrb[54].mxu1 %v5965_v2 }
 0x140   : > { %4456 = vmatprep.mubr.f32.mxu1 %v5969_v3 }
 0x141   : > { %762 = vmatmul.mubr.f32.gmra.mrb[60].mxu0 %v5850_v40  ;;  %v6135_v40 = vld [vmem:[%s5785_s24 + $0x2a8] sm:$0xff] }
 0x142   : > { %767 = vmatprep.mubr.f32.mxu0 %v8642_v0 }
 0x143   : > { %4457 = vmatmul.mubr.f32.gmra.mrb[56].mxu1 %v5975_v4 }
 0x144   : > { %4459 = vmatprep.mubr.f32.mxu1 %v5979_v5 }
 0x145   : > { %768 = vmatmul.mubr.f32.gmra.mrb[62].mxu0 %v5855_v41 }
 0x146   : > { %773 = vmatprep.mubr.f32.mxu0 %v8642_v0 }
 0x147   : > { %4460 = vmatmul.mubr.f32.gmra.mrb[58].mxu1 %v5985_v6 }
 0x148   : > { %4462 = vmatprep.mubr.f32.mxu1 %v5989_v7 }
 0x149   : > { %774 = vmatmul.mubr.f32.gmra.mrb[64].mxu0 %v5858_v42 }
 0x14a   : > { %779 = vmatprep.mubr.f32.mxu0 %v8642_v0 }
 0x14b   : > { %4463 = vmatmul.mubr.f32.gmra.mrb[60].mxu1 %v5995_v8 }
 0x14c   : > { %4465 = vmatprep.mubr.f32.mxu1 %v5999_v9 }
 0x14d   : > { %780 = vmatmul.mubr.f32.gmra.mrb[66].mxu0 %v5864_v43 }
 0x14e   : > { %785 = vmatprep.mubr.f32.mxu0 %v8642_v0 }
 0x14f   : > { %4466 = vmatmul.mubr.f32.gmra.mrb[62].mxu1 %v6005_v10 }
 0x150   : > { %4468 = vmatprep.mubr.f32.mxu1 %v6009_v11 }
 0x151   : > { %786 = vmatmul.mubr.f32.gmra.mrb[68].mxu0 %v5867_v44 }
 0x152   : > { %791 = vmatprep.mubr.f32.mxu0 %v8642_v0 }
 0x153   : > { %4469 = vmatmul.mubr.f32.gmra.mrb[64].mxu1 %v6015_v12 }
 0x154   : > { %4471 = vmatprep.mubr.f32.mxu1 %v6019_v13 }
 0x155   : > { %792 = vmatmul.mubr.f32.gmra.mrb[70].mxu0 %v5873_v45 }
 0x156   : > { %797 = vmatprep.mubr.f32.mxu0 %v8642_v0 }
 0x157   : > { %4472 = vmatmul.mubr.f32.gmra.mrb[66].mxu1 %v6025_v14 }
 0x158   : > { %4474 = vmatprep.mubr.f32.mxu1 %v6029_v15 }
 0x159   : > { %798 = vmatmul.mubr.f32.gmra.mrb[72].mxu0 %v5876_v46  ;;  %v6145_v46 = vld [vmem:[%s5785_s24 + $0x2b0] sm:$0xff] }
 0x15a   : > { %803 = vmatprep.mubr.f32.mxu0 %v8642_v0 }
 0x15b   : > { %4475 = vmatmul.mubr.f32.gmra.mrb[68].mxu1 %v6035_v16 }
 0x15c   : > { %4477 = vmatprep.mubr.f32.mxu1 %v6039_v17 }
 0x15d   : > { %804 = vmatmul.mubr.f32.gmra.mrb[74].mxu0 %v5882_v47 }
 0x15e   : > { %809 = vmatprep.mubr.f32.mxu0 %v8642_v0 }
 0x15f   : > { %4478 = vmatmul.mubr.f32.gmra.mrb[70].mxu1 %v6045_v18 }
 0x160   : > { %4480 = vmatprep.mubr.f32.mxu1 %v6049_v19 }
 0x161   : > { %810 = vmatmul.mubr.f32.gmra.mrb[76].mxu0 %v5885_v48 }
 0x162   : > { %815 = vmatprep.mubr.f32.mxu0 %v8642_v0 }
 0x163   : > { %4481 = vmatmul.mubr.f32.gmra.mrb[72].mxu1 %v6055_v20 }
 0x164   : > { %4483 = vmatprep.mubr.f32.mxu1 %v6061_v21 }
 0x165   : > { %816 = vmatmul.mubr.f32.gmra.mrb[78].mxu0 %v5891_v49 }
 0x166   : > { %821 = vmatprep.mubr.f32.mxu0 %v8642_v0 }
 0x167   : > { %4484 = vmatmul.mubr.f32.gmra.mrb[74].mxu1 %v6067_v22 }
 0x168   : > { %4486 = vmatprep.mubr.f32.mxu1 %v6073_v23 }
 0x169   : > { %822 = vmatmul.mubr.f32.gmra.mrb[80].mxu0 %v5894_v50 }
 0x16a   : > { %827 = vmatprep.mubr.f32.mxu0 %v8642_v0 }
 0x16b   : > { %4487 = vmatmul.mubr.f32.gmra.mrb[76].mxu1 %v6079_v24 }
 0x16c   : > { %4489 = vmatprep.mubr.f32.mxu1 %v6085_v25 }
 0x16d   : > { %828 = vmatmul.mubr.f32.gmra.mrb[82].mxu0 %v5900_v51 }
 0x16e   : > { %833 = vmatprep.mubr.f32.mxu0 %v8642_v0 }
 0x16f   : > { %4490 = vmatmul.mubr.f32.gmra.mrb[78].mxu1 %v6091_v26 }
 0x170   : > { %4492 = vmatprep.mubr.f32.mxu1 %v6097_v27 }
 0x171   : > { %834 = vmatmul.mubr.f32.gmra.mrb[84].mxu0 %v5903_v52  ;;  %v6155_v52 = vld [vmem:[%s5785_s24 + $0x2b8] sm:$0xff] }
 0x172   : > { %839 = vmatprep.mubr.f32.mxu0 %v8642_v0 }
 0x173   : > { %4493 = vmatmul.mubr.f32.gmra.mrb[80].mxu1 %v6103_v28 }
 0x174   : > { %4495 = vmatprep.mubr.f32.mxu1 %v6109_v30 }
 0x175   : > { %840 = vmatmul.mubr.f32.gmra.mrb[86].mxu0 %v5909_v53 }
 0x176   : > { %845 = vmatprep.mubr.f32.mxu0 %v8642_v0 }
 0x177   : > { %4496 = vmatmul.mubr.f32.gmra.mrb[82].mxu1 %v6117_v32 }
 0x178   : > { %4498 = vmatprep.mubr.f32.mxu1 %v6125_v36 }
 0x179   : > { %846 = vmatmul.mubr.f32.gmra.mrb[88].mxu0 %v5912_v54 }
 0x17a   : > { %851 = vmatprep.mubr.f32.mxu0 %v8642_v0 }
 0x17b   : > { %4499 = vmatmul.mubr.f32.gmra.mrb[84].mxu1 %v6135_v40 }
 0x17c   : > { %4501 = vmatprep.mubr.f32.mxu1 %v6145_v46 }
 0x17d   : > { %852 = vmatmul.mubr.f32.gmra.mrb[90].mxu0 %v5918_v55 }
 0x17e   : > { %857 = vmatprep.mubr.f32.mxu0 %v8642_v0 }
 0x17f   : > { %4502 = vmatmul.mubr.f32.gmra.mrb[86].mxu1 %v6155_v52 }
 0x181   : > { %858 = vmatmul.mubr.f32.gmra.mrb[92].mxu0 %v5921_v56 }
 0x182   : > { %863 = vmatprep.mubr.f32.mxu0 %v8642_v0 }
 0x185   : > { %864 = vmatmul.mubr.f32.gmra.mrb[94].mxu0 %v5927_v57 }
 0x186   : > { %869 = vmatprep.mubr.f32.mxu0 %v8642_v0 }
 0x189   : > { %870 = vmatmul.mubr.f32.gmra.mrb[96].mxu0 %v5930_v58  ;;  %v6165_v58 = vld [vmem:[%s5785_s24 + $0x2c0] sm:$0xff] }
 0x18a   : > { %875 = vmatprep.mubr.f32.mxu0 %v8642_v0  ;;  %4504 = vmatprep.mubr.f32.mxu1 %v6165_v58 }
 0x18d   : > { %876 = vmatmul.mubr.f32.gmra.mrb[98].mxu0 %v5936_v59 }
 0x18e   : > { %881 = vmatprep.mubr.f32.mxu0 %v8642_v0 }
 0x191   : > { %882 = vmatmul.mubr.f32.gmra.mrb[100].mxu0 %v5939_v60 }
 0x192   : > { %887 = vmatprep.mubr.f32.mxu0 %v8642_v0 }
 0x195   : > { %888 = vmatmul.mubr.f32.gmra.mrb[102].mxu0 %v5945_v61 }
 0x196   : > { %893 = vmatprep.mubr.f32.mxu0 %v8642_v0 }
 0x199   : > { %894 = vmatmul.mubr.f32.gmra.mrb[104].mxu0 %v5949_v62 }
 0x19a   : > { %899 = vmatprep.mubr.f32.mxu0 %v8642_v0 }
 0x19c   : > { %v583_v39 = vpop.f32.mrb[0].mxu0 }
 0x19d   : > { %v584_v41 = vadd.f32 %v583_v39, %v6128_v37  ;;  %v585_v42 = vpop.f32.mrb[1].mxu0  ;;  %900 = vmatmul.mubr.f32.gmra.mrb[106].mxu0 %v5955_v63 }
 0x19e   : > { %v586_v43 = vadd.f32 %v585_v42, %v6132_v38  ;;  %905 = vmatprep.mubr.f32.mxu0 %v8642_v0 }
 0x1a0   : > { %v6142_v44 = vmul.f32 %v586_v43, %v584_v41  ;;  %v589_v45 = vpop.f32.mrb[2].mxu0 }
 0x1a1   : > { %v590_v47 = vadd.f32 %v589_v45, %v6128_v37  ;;  %v591_v48 = vpop.f32.mrb[3].mxu0  ;;  %906 = vmatmul.mubr.f32.gmra.mrb[108].mxu0 %v5959_v1  ;;  %v6175_v1 = vld [vmem:[%s5785_s24 + $0x2c8] sm:$0xff]  ;;  %v6195_v45 = vld [vmem:[%s5785_s24 + $0x2d8] sm:$0xff] }
 0x1a2   : > { %8767 = vst [vmem:[#allocation25_spill] sm:$0xff] %v6142_v44  ;;  %v592_v49 = vadd.f32 %v591_v48, %v6132_v38  ;;  %911 = vmatprep.mubr.f32.mxu0 %v8642_v0  ;;  %4505 = vmatmul.mubr.f32.gmra.mrb[88].mxu1 %v6175_v1 }
 0x1a3   : > { %4507 = vmatprep.mubr.f32.mxu1 %v6185_v35 }
 0x1a4   : > { %v6152_v50 = vmul.f32 %v592_v49, %v590_v47  ;;  %v595_v51 = vpop.f32.mrb[4].mxu0 }
 0x1a5   : > { %v596_v53 = vadd.f32 %v595_v51, %v6128_v37  ;;  %v597_v54 = vpop.f32.mrb[5].mxu0  ;;  %912 = vmatmul.mubr.f32.gmra.mrb[110].mxu0 %v5965_v2 }
 0x1a6   : > { %8768 = vst [vmem:[#allocation26_spill] sm:$0xff] %v6152_v50  ;;  %v598_v55 = vadd.f32 %v597_v54, %v6132_v38  ;;  %917 = vmatprep.mubr.f32.mxu0 %v8642_v0  ;;  %4508 = vmatmul.mubr.f32.gmra.mrb[90].mxu1 %v6195_v45 }
 0x1a8   : > { %v6162_v56 = vmul.f32 %v598_v55, %v596_v53  ;;  %v601_v57 = vpop.f32.mrb[6].mxu0  ;;  %v6205_v53 = vld [vmem:[%s5785_s24 + $0x2e0] sm:$0xff] }
 0x1a9   : > { %v602_v59 = vadd.f32 %v601_v57, %v6128_v37  ;;  %v603_v60 = vpop.f32.mrb[7].mxu0  ;;  %918 = vmatmul.mubr.f32.gmra.mrb[112].mxu0 %v5969_v3  ;;  %4510 = vmatprep.mubr.f32.mxu1 %v6205_v53 }
 0x1aa   : > { %8769 = vst [vmem:[#allocation27_spill] sm:$0xff] %v6162_v56  ;;  %v604_v61 = vadd.f32 %v603_v60, %v6132_v38  ;;  %923 = vmatprep.mubr.f32.mxu0 %v8642_v0  ;;  %v6215_v60 = vld [vmem:[%s5785_s24 + $0x2e8] sm:$0xff] }
 0x1ab   : > { %4511 = vmatmul.mubr.f32.gmra.mrb[92].mxu1 %v6215_v60 }
 0x1ac   : > { %v6172_v62 = vmul.f32 %v604_v61, %v602_v59  ;;  %v607_v63 = vpop.f32.mrb[8].mxu0 }
 0x1ad   : > { %v608_v2 = vadd.f32 %v607_v63, %v6128_v37  ;;  %v609_v29 = vpop.f32.mrb[9].mxu0  ;;  %924 = vmatmul.mubr.f32.gmra.mrb[114].mxu0 %v5975_v4 }
 0x1ae   : > { %8770 = vst [vmem:[#allocation28_spill] sm:$0xff] %v6172_v62  ;;  %v610_v3 = vadd.f32 %v609_v29, %v6132_v38  ;;  %929 = vmatprep.mubr.f32.mxu0 %v8642_v0 }
 0x1b0   : > { %v6182_v33 = vmul.f32 %v610_v3, %v608_v2  ;;  %v613_v34 = vpop.f32.mrb[10].mxu0  ;;  %v6225_v3 = vld [vmem:[%s5785_s24 + $0x2f0] sm:$0xff] }
 0x1b1   : > { %v614_v39 = vadd.f32 %v613_v34, %v6128_v37  ;;  %v615_v41 = vpop.f32.mrb[11].mxu0  ;;  %930 = vmatmul.mubr.f32.gmra.mrb[116].mxu0 %v5979_v5  ;;  %4513 = vmatprep.mubr.f32.mxu1 %v6225_v3 }
 0x1b2   : > { %8771 = vst [vmem:[#allocation29_spill] sm:$0xff] %v6182_v33  ;;  %v616_v4 = vadd.f32 %v615_v41, %v6132_v38  ;;  %935 = vmatprep.mubr.f32.mxu0 %v8642_v0 }
 0x1b4   : > { %v6192_v42 = vmul.f32 %v616_v4, %v614_v39  ;;  %v619_v43 = vpop.f32.mrb[12].mxu0 }
 0x1b5   : > { %v620_v47 = vadd.f32 %v619_v43, %v6128_v37  ;;  %v621_v48 = vpop.f32.mrb[13].mxu0  ;;  %936 = vmatmul.mubr.f32.gmra.mrb[118].mxu0 %v5985_v6  ;;  %v3015_v43 = vld [vmem:[#allocation8] sm:$0xff] }
 0x1b6   : > { %8772 = vst [vmem:[#allocation30_spill] sm:$0xff] %v6192_v42  ;;  %v622_v5 = vadd.f32 %v621_v48, %v6132_v38  ;;  %941 = vmatprep.mubr.f32.mxu0 %v8642_v0  ;;  %v6235_v48 = vld [vmem:[%s5785_s24 + $0x2f8] sm:$0xff] }
 0x1b7   : > { %4514 = vmatmul.mubr.f32.gmra.mrb[94].mxu1 %v6235_v48 }
 0x1b8   : > { %v6202_v49 = vmul.f32 %v622_v5, %v620_v47  ;;  %v625_v51 = vpop.f32.mrb[14].mxu0  ;;  %v3016_v47 = vld [vmem:[#allocation8 + $0x8] sm:$0xff] }
 0x1b9   : > { %v626_v54 = vadd.f32 %v625_v51, %v6128_v37  ;;  %v627_v55 = vpop.f32.mrb[15].mxu0  ;;  %942 = vmatmul.mubr.f32.gmra.mrb[120].mxu0 %v5989_v7 }
 0x1ba   : > { %8773 = vst [vmem:[#allocation31_spill] sm:$0xff] %v6202_v49  ;;  %v628_v6 = vadd.f32 %v627_v55, %v6132_v38  ;;  %947 = vmatprep.mubr.f32.mxu0 %v8642_v0 }
 0x1bc   : > { %v6212_v57 = vmul.f32 %v628_v6, %v626_v54  ;;  %v631_v59 = vpop.f32.mrb[16].mxu0 }
 0x1bd   : > { %v632_v61 = vadd.f32 %v631_v59, %v6128_v37  ;;  %v633_v63 = vpop.f32.mrb[17].mxu0  ;;  %948 = vmatmul.mubr.f32.gmra.mrb[122].mxu0 %v5995_v8  ;;  %v6245_v59 = vld [vmem:[%s5785_s24 + $0x300] sm:$0xff] }
 0x1be   : > { %8774 = vst [vmem:[#allocation32_spill] sm:$0xff] %v6212_v57  ;;  %v634_v7 = vadd.f32 %v633_v63, %v6132_v38  ;;  %953 = vmatprep.mubr.f32.mxu0 %v8642_v0  ;;  %4516 = vmatprep.mubr.f32.mxu1 %v6245_v59  ;;  %v6403_v57 = vld [vmem:[%s5785_s24 + $0x368] sm:$0xff] }
 0x1c0   : > { %v6222_v2 = vmul.f32 %v634_v7, %v632_v61  ;;  %v637_v29 = vpop.f32.mrb[18].mxu0 }
 0x1c1   : > { %v638_v34 = vadd.f32 %v637_v29, %v6128_v37  ;;  %v639_v39 = vpop.f32.mrb[19].mxu0  ;;  %954 = vmatmul.mubr.f32.gmra.mrb[124].mxu0 %v5999_v9  ;;  %v4852_v9 = vpack.c.bf16 %v3016_v47, %v3015_v43  ;;  %v6265_v47 = vld [vmem:[%s5785_s24 + $0x310] sm:$0xff] }
 0x1c2   : > { %8775 = vst [vmem:[#allocation33_spill] sm:$0xff] %v6222_v2  ;;  %v640_v8 = vadd.f32 %v639_v39, %v6132_v38  ;;  %959 = vmatprep.mubr.f32.mxu0 %v8642_v0 }
 0x1c3   : > { %4853 = vmatprep.subr.bf16.mxu1 %v4852_v9 }
 0x1c4   : > { %v6232_v41 = vmul.f32 %v640_v8, %v638_v34  ;;  %v643_v4 = vpop.f32.mrb[20].mxu0  ;;  %4855 = vmatpush3.bf16.msra.mxu1 %v4852_v9  ;;  %v6255_v34 = vld [vmem:[%s5785_s24 + $0x308] sm:$0xff] }
 0x1c5   : > { %v644_v5 = vadd.f32 %v643_v4, %v6128_v37  ;;  %v645_v51 = vpop.f32.mrb[21].mxu0  ;;  %960 = vmatmul.mubr.f32.gmra.mrb[126].mxu0 %v6005_v10  ;;  %4517 = vmatmul.mubr.f32.gmra.mrb[96].mxu1 %v6255_v34 }
 0x1c6   : > { %8776 = vst [vmem:[#allocation34_spill] sm:$0xff] %v6232_v41  ;;  %v646_v54 = vadd.f32 %v645_v51, %v6132_v38  ;;  %965 = vmatprep.mubr.f32.mxu0 %v8642_v0  ;;  %4519 = vmatprep.mubr.f32.mxu1 %v6265_v47 }
 0x1c8   : > { %v6242_v55 = vmul.f32 %v646_v54, %v644_v5  ;;  %v649_v6 = vpop.f32.mrb[22].mxu0 }
 0x1c9   : > { %v650_v61 = vadd.f32 %v649_v6, %v6128_v37  ;;  %v651_v63 = vpop.f32.mrb[23].mxu0  ;;  %966 = vmatmul.mubr.f32.gmra.mrb[128].mxu0 %v6009_v11  ;;  %v6275_v6 = vld [vmem:[%s5785_s24 + $0x318] sm:$0xff] }
 0x1ca   : > { %8777 = vst [vmem:[#allocation35_spill] sm:$0xff] %v6242_v55  ;;  %v652_v10 = vadd.f32 %v651_v63, %v6132_v38  ;;  %971 = vmatprep.mubr.f32.mxu0 %v8642_v0  ;;  %4520 = vmatmul.mubr.f32.gmra.mrb[98].mxu1 %v6275_v6 }
 0x1cc   : > { %v6252_v7 = vmul.f32 %v652_v10, %v650_v61  ;;  %v655_v29 = vpop.f32.mrb[24].mxu0 }
 0x1cd   : > { %v656_v39 = vadd.f32 %v655_v29, %v6128_v37  ;;  %v657_v8 = vpop.f32.mrb[25].mxu0  ;;  %972 = vmatmul.mubr.f32.gmra.mrb[130].mxu0 %v6015_v12 }
 0x1ce   : > { %8778 = vst [vmem:[#allocation36_spill] sm:$0xff] %v6252_v7  ;;  %v658_v11 = vadd.f32 %v657_v8, %v6132_v38  ;;  %977 = vmatprep.mubr.f32.mxu0 %v8642_v0 }
 0x1d0   : > { %v6262_v4 = vmul.f32 %v658_v11, %v656_v39  ;;  %v661_v43 = vpop.f32.mrb[26].mxu0  ;;  %v6285_v39 = vld [vmem:[%s5785_s24 + $0x320] sm:$0xff] }
 0x1d1   : > { %v662_v5 = vadd.f32 %v661_v43, %v6128_v37  ;;  %v663_v51 = vpop.f32.mrb[27].mxu0  ;;  %978 = vmatmul.mubr.f32.gmra.mrb[132].mxu0 %v6019_v13  ;;  %4522 = vmatprep.mubr.f32.mxu1 %v6285_v39 }
 0x1d2   : > { %8779 = vst [vmem:[#allocation37_spill] sm:$0xff] %v6262_v4  ;;  %v664_v12 = vadd.f32 %v663_v51, %v6132_v38  ;;  %983 = vmatprep.mubr.f32.mxu0 %v8642_v0  ;;  %v6295_v51 = vld [vmem:[%s5785_s24 + $0x328] sm:$0xff] }
 0x1d3   : > { %4523 = vmatmul.mubr.f32.gmra.mrb[100].mxu1 %v6295_v51 }
 0x1d4   : > { %v6272_v9 = vmul.f32 %v664_v12, %v662_v5  ;;  %v667_v54 = vpop.f32.mrb[28].mxu0 }
 0x1d5   : > { %v668_v61 = vadd.f32 %v667_v54, %v6128_v37  ;;  %v669_v63 = vpop.f32.mrb[29].mxu0  ;;  %984 = vmatmul.mubr.f32.gmra.mrb[134].mxu0 %v6025_v14 }
 0x1d6   : > { %8780 = vst [vmem:[#allocation38_spill] sm:$0xff] %v6272_v9  ;;  %v670_v13 = vadd.f32 %v669_v63, %v6132_v38  ;;  %989 = vmatprep.mubr.f32.mxu0 %v8642_v0  ;;  %v8789_v9 = vmov 0.0  }
 0x1d8   : > { %v6282_v10 = vmul.f32 %v670_v13, %v668_v61  ;;  %v673_v29 = vpop.f32.mrb[30].mxu0  ;;  %v6305_v13 = vld [vmem:[%s5785_s24 + $0x330] sm:$0xff] }
 0x1d9   : > { %v674_v8 = vadd.f32 %v673_v29, %v6128_v37  ;;  %v675_v11 = vpop.f32.mrb[31].mxu0  ;;  %990 = vmatmul.mubr.f32.gmra.mrb[136].mxu0 %v6029_v15  ;;  %4525 = vmatprep.mubr.f32.mxu1 %v6305_v13 }
 0x1da   : > { %8781 = vst [vmem:[#allocation39_spill] sm:$0xff] %v6282_v10  ;;  %v676_v14 = vadd.f32 %v675_v11, %v6132_v38  ;;  %995 = vmatprep.mubr.f32.mxu0 %v8642_v0  ;;  %v6369_v10 = vld [vmem:[%s5785_s24 + $0x358] sm:$0xff] }
 0x1dc   : > { %v6292_v43 = vmul.f32 %v676_v14, %v674_v8  ;;  %v679_v5 = vpop.f32.mrb[32].mxu0 }
 0x1dd   : > { %v680_v12 = vadd.f32 %v679_v5, %v6128_v37  ;;  %v681_v54 = vpop.f32.mrb[33].mxu0  ;;  %996 = vmatmul.mubr.f32.gmra.mrb[138].mxu0 %v6035_v16  ;;  %v3017_v5 = vld [vmem:[#allocation8 + $0x10] sm:$0xff] }
 0x1de   : > { %8782 = vst [vmem:[#allocation40_spill] sm:$0xff] %v6292_v43  ;;  %v682_v15 = vadd.f32 %v681_v54, %v6132_v38  ;;  %1001 = vmatprep.mubr.f32.mxu0 %v8642_v0  ;;  %v6315_v54 = vld [vmem:[%s5785_s24 + $0x338] sm:$0xff] }
 0x1df   : > { %4526 = vmatmul.mubr.f32.gmra.mrb[102].mxu1 %v6315_v54 }
 0x1e0   : > { %v6302_v61 = vmul.f32 %v682_v15, %v680_v12  ;;  %v685_v63 = vpop.f32.mrb[34].mxu0  ;;  %v3018_v12 = vld [vmem:[#allocation8 + $0x18] sm:$0xff] }
 0x1e1   : > { %v686_v29 = vadd.f32 %v685_v63, %v6128_v37  ;;  %v687_v8 = vpop.f32.mrb[35].mxu0  ;;  %1002 = vmatmul.mubr.f32.gmra.mrb[140].mxu0 %v6039_v17  ;;  %v4856_v17 = vpack.c.bf16 %v3018_v12, %v3017_v5 }
 0x1e2   : > { %8783 = vst [vmem:[#allocation41_spill] sm:$0xff] %v6302_v61  ;;  %v688_v16 = vadd.f32 %v687_v8, %v6132_v38  ;;  %1007 = vmatprep.mubr.f32.mxu0 %v8642_v0 }
 0x1e3   : > { %4857 = vmatprep.subr.bf16.mxu1 %v4856_v17 }
 0x1e4   : > { %v6312_v11 = vmul.f32 %v688_v16, %v686_v29  ;;  %v691_v14 = vpop.f32.mrb[36].mxu0  ;;  %4859 = vmatpush3.bf16.msra.mxu1 %v4856_v17 }
 0x1e5   : > { %v692_v15 = vadd.f32 %v691_v14, %v6128_v37  ;;  %v693_v63 = vpop.f32.mrb[37].mxu0  ;;  %1008 = vmatmul.mubr.f32.gmra.mrb[142].mxu0 %v6045_v18 }
 0x1e6   : > { %8784 = vst [vmem:[#allocation42_spill] sm:$0xff] %v6312_v11  ;;  %v694_v8 = vadd.f32 %v693_v63, %v6132_v38  ;;  %1013 = vmatprep.mubr.f32.mxu0 %v8642_v0  ;;  %v6325_v11 = vld [vmem:[%s5785_s24 + $0x340] sm:$0xff] }
 0x1e7   : > { %4528 = vmatprep.mubr.f32.mxu1 %v6325_v11 }
 0x1e8   : > { %v6322_v29 = vmul.f32 %v694_v8, %v692_v15  ;;  %v697_v16 = vpop.f32.mrb[38].mxu0  ;;  %v6335_v15 = vld [vmem:[%s5785_s24 + $0x348] sm:$0xff]  ;;  %v6342_v8 = vpop.f32.mrb[0].mxu1 }
 0x1e9   : > { %v698_v14 = vadd.f32 %v697_v16, %v6128_v37  ;;  %v699_v61 = vpop.f32.mrb[39].mxu0  ;;  %1014 = vmatmul.mubr.f32.gmra.mrb[144].mxu0 %v6049_v19  ;;  %4529 = vmatmul.mubr.f32.gmra.mrb[104].mxu1 %v6335_v15 }
 0x1ea   : > { %8785 = vst [vmem:[#allocation43_spill] sm:$0xff] %v6322_v29  ;;  %v700_v18 = vadd.f32 %v699_v61, %v6132_v38  ;;  %1019 = vmatprep.mubr.f32.mxu0 %v8642_v0 }
 0x1ec   : > { %v6332_v5 = vmul.f32 %v700_v18, %v698_v14  ;;  %v703_v12 = vpop.f32.mrb[40].mxu0  ;;  %v6346_v14 = vpop.f32.mrb[1].mxu1  ;;  %v6349_v18 = vld [vmem:[%s5785_s24 + $0x350] sm:$0xff] }
 0x1ed   : > { %v704_v63 = vadd.f32 %v703_v12, %v6128_v37  ;;  %v705_v17 = vpop.f32.mrb[41].mxu0  ;;  %1020 = vmatmul.mubr.f32.gmra.mrb[146].mxu0 %v6055_v20  ;;  %v6353_v20 = vpop.f32.mrb[2].mxu1  ;;  %4531 = vmatprep.mubr.f32.mxu1 %v6349_v18 }
 0x1ee   : > { %8786 = vst [vmem:[#allocation44_spill] sm:$0xff] %v6332_v5  ;;  %v706_v19 = vadd.f32 %v705_v17, %v6132_v38  ;;  %1025 = vmatprep.mubr.f32.mxu0 %v8642_v0  ;;  %4532 = vmatmul.mubr.f32.gmra.mrb[106].mxu1 %v6369_v10 }
 0x1f0   : > { %v6344_v61 = vmul.f32 %v706_v19, %v704_v63  ;;  %v709_v16 = vpop.f32.mrb[42].mxu0  ;;  %v6358_v63 = vpop.f32.mrb[3].mxu1 }
 0x1f1   : > { %v710_v12 = vadd.f32 %v709_v16, %v6128_v37  ;;  %v711_v5 = vpop.f32.mrb[43].mxu0  ;;  %1026 = vmatmul.mubr.f32.gmra.mrb[148].mxu0 %v6061_v21  ;;  %v6360_v19 = vpop.f32.mrb[4].mxu1 }
 0x1f2   : > { %8787 = vst [vmem:[#allocation45_spill] sm:$0xff] %v6344_v61  ;;  %v712_v17 = vadd.f32 %v711_v5, %v6132_v38  ;;  %1031 = vmatprep.mubr.f32.mxu0 %v8642_v0  ;;  %v6364_v16 = vpop.f32.mrb[5].mxu1 }
 0x1f3   : > { %v6371_v5 = vpop.f32.mrb[6].mxu1 }
 0x1f4   : > { %v6362_v61 = vmul.f32 %v712_v17, %v710_v12  ;;  %v715_v29 = vpop.f32.mrb[44].mxu0  ;;  %v6375_v4 = vpop.f32.mrb[7].mxu1 }
 0x1f5   : > { %v716_v21 = vadd.f32 %v715_v29, %v6128_v37  ;;  %v717_v43 = vpop.f32.mrb[45].mxu0  ;;  %1032 = vmatmul.mubr.f32.gmra.mrb[150].mxu0 %v6067_v22  ;;  %v6378_v12 = vpop.f32.mrb[8].mxu1  ;;  %v6385_v22 = vld [vmem:[%s5785_s24 + $0x360] sm:$0xff] }
 0x1f6   : > { %8788 = vst [vmem:[#allocation46_spill] sm:$0xff] %v6362_v61  ;;  %v718_v0 = vadd.f32 %v717_v43, %v6132_v38  ;;  %1037 = vmatprep.mubr.f32.mxu0 %v8789_v9  ;;  %v6382_v61 = vpop.f32.mrb[9].mxu1  ;;  %4534 = vmatprep.mubr.f32.mxu1 %v6385_v22 }
 0x1f7   : > { %v6389_v43 = vpop.f32.mrb[10].mxu1  ;;  %4535 = vmatmul.mubr.f32.gmra.mrb[108].mxu1 %v6403_v57 }
 0x1f8   : > { %v6380_v17 = vmul.f32 %v718_v0, %v716_v21  ;;  %v721_v29 = vpop.f32.mrb[46].mxu0  ;;  %v6394_v0 = vpop.f32.mrb[11].mxu1 }
 0x1f9   : > { %v722_v7 = vadd.f32 %v721_v29, %v6128_v37  ;;  %v723_v55 = vpop.f32.mrb[47].mxu0  ;;  %1038 = vmatmul.mubr.f32.gmra.mrb[152].mxu0 %v6073_v23  ;;  %v6396_v21 = vpop.f32.mrb[12].mxu1 }
 0x1fa   : > { %8790 = vst [vmem:[#allocation47_spill] sm:$0xff] %v6380_v17  ;;  %v724_v41 = vadd.f32 %v723_v55, %v6132_v38  ;;  %1043 = vmatprep.mubr.f32.mxu0 %v8789_v9  ;;  %v6400_v29 = vpop.f32.mrb[13].mxu1 }
 0x1fb   : > { %v6407_v55 = vpop.f32.mrb[14].mxu1 }
 0x1fc   : > { %v6398_v17 = vmul.f32 %v724_v41, %v722_v7  ;;  %v727_v2 = vpop.f32.mrb[48].mxu0  ;;  %8792 = vst [vmem:[#allocation49_spill] sm:$0xff] %v6407_v55  ;;  %v6412_v41 = vpop.f32.mrb[15].mxu1 }
 0x1fd   : > { %v728_v23 = vadd.f32 %v727_v2, %v6128_v37  ;;  %v729_v49 = vpop.f32.mrb[49].mxu0  ;;  %1044 = vmatmul.mubr.f32.gmra.mrb[154].mxu0 %v6079_v24  ;;  %8793 = vst [vmem:[#allocation50_spill] sm:$0xff] %v6412_v41  ;;  %v6414_v7 = vpop.f32.mrb[16].mxu1  ;;  %v6421_v2 = vld [vmem:[%s5785_s24 + $0x370] sm:$0xff] }
 0x1fe   : > { %8791 = vst [vmem:[#allocation48_spill] sm:$0xff] %v6398_v17  ;;  %v730_v42 = vadd.f32 %v729_v49, %v6132_v38  ;;  %1049 = vmatprep.mubr.f32.mxu0 %v8789_v9  ;;  %8794 = vst [vmem:[#allocation51_spill] sm:$0xff] %v6414_v7  ;;  %v6418_v62 = vpop.f32.mrb[17].mxu1  ;;  %4537 = vmatprep.mubr.f32.mxu1 %v6421_v2 }
 0x1ff   : > { %8796 = vst [vmem:[#allocation53_spill] sm:$0xff] %v6418_v62  ;;  %v6425_v49 = vpop.f32.mrb[18].mxu1  ;;  %v3019_v62 = vld [vmem:[#allocation8 + $0x20] sm:$0xff] }
 0x200   : > { %v6416_v17 = vmul.f32 %v730_v42, %v728_v23  ;;  %v733_v33 = vpop.f32.mrb[50].mxu0  ;;  %8797 = vst [vmem:[#allocation54_spill] sm:$0xff] %v6425_v49  ;;  %v6430_v42 = vpop.f32.mrb[19].mxu1 }
 0x201   : > { %v734_v24 = vadd.f32 %v733_v33, %v6128_v37  ;;  %v735_v56 = vpop.f32.mrb[51].mxu0  ;;  %1050 = vmatmul.mubr.f32.gmra.mrb[156].mxu0 %v6085_v25  ;;  %v6432_v23 = vpop.f32.mrb[20].mxu1  ;;  %v3020_v33 = vld [vmem:[#allocation8 + $0x28] sm:$0xff]  ;;  %v6439_v25 = vld [vmem:[%s5785_s24 + $0x378] sm:$0xff] }
 0x202   : > { %8795 = vst [vmem:[#allocation52_spill] sm:$0xff] %v6416_v17  ;;  %v736_v50 = vadd.f32 %v735_v56, %v6132_v38  ;;  %1055 = vmatprep.mubr.f32.mxu0 %v8789_v9  ;;  %v6436_v7 = vpop.f32.mrb[21].mxu1  ;;  %v4860_v56 = vpack.c.bf16 %v3020_v33, %v3019_v62  ;;  %4538 = vmatmul.mubr.f32.gmra.mrb[110].mxu1 %v6439_v25  ;;  %v6457_v62 = vld [vmem:[%s5785_s24 + $0x380] sm:$0xff] }
 0x203   : > { %8799 = vst [vmem:[#allocation56_spill] sm:$0xff] %v6436_v7  ;;  %v6443_v55 = vpop.f32.mrb[22].mxu1  ;;  %4540 = vmatprep.mubr.f32.mxu1 %v6457_v62 }
 0x204   : > { %v6434_v17 = vmul.f32 %v736_v50, %v734_v24  ;;  %v739_v44 = vpop.f32.mrb[52].mxu0  ;;  %8800 = vst [vmem:[#allocation57_spill] sm:$0xff] %v6443_v55  ;;  %v6448_v24 = vpop.f32.mrb[23].mxu1  ;;  %4861 = vmatprep.subr.bf16.mxu1 %v4860_v56 }
 0x205   : > { %v740_v49 = vadd.f32 %v739_v44, %v6128_v37  ;;  %v741_v41 = vpop.f32.mrb[53].mxu0  ;;  %1056 = vmatmul.mubr.f32.gmra.mrb[158].mxu0 %v6091_v26  ;;  %4863 = vmatpush3.bf16.msra.mxu1 %v4860_v56 }
 0x206   : > { %8798 = vst [vmem:[#allocation55_spill] sm:$0xff] %v6434_v17  ;;  %v742_v50 = vadd.f32 %v741_v41, %v6132_v38  ;;  %1061 = vmatprep.mubr.f32.mxu0 %v8789_v9  ;;  %v6450_v17 = vpop.f32.mrb[24].mxu1 }
 0x207   : > { %8801 = vst [vmem:[#allocation58_spill] sm:$0xff] %v6450_v17  ;;  %v6454_v26 = vpop.f32.mrb[25].mxu1 }
 0x208   : > { %v6452_v7 = vmul.f32 %v742_v50, %v740_v49  ;;  %v745_v44 = vpop.f32.mrb[54].mxu0  ;;  %8803 = vst [vmem:[#allocation60_spill] sm:$0xff] %v6454_v26  ;;  %v6461_v41 = vpop.f32.mrb[26].mxu1  ;;  %v6475_v26 = vld [vmem:[%s5785_s24 + $0x388] sm:$0xff] }
 0x209   : > { %v746_v33 = vadd.f32 %v745_v44, %v6128_v37  ;;  %v747_v55 = vpop.f32.mrb[55].mxu0  ;;  %1062 = vmatmul.mubr.f32.gmra.mrb[160].mxu0 %v6097_v27  ;;  %8804 = vst [vmem:[#allocation61_spill] sm:$0xff] %v6461_v41  ;;  %v6466_v49 = vpop.f32.mrb[27].mxu1  ;;  %4541 = vmatmul.mubr.f32.gmra.mrb[112].mxu1 %v6475_v26 }
 0x20a   : > { %8802 = vst [vmem:[#allocation59_spill] sm:$0xff] %v6452_v7  ;;  %v748_v17 = vadd.f32 %v747_v55, %v6132_v38  ;;  %1067 = vmatprep.mubr.f32.mxu0 %v8789_v9  ;;  %8805 = vst [vmem:[#allocation62_spill] sm:$0xff] %v6466_v49  ;;  %v6468_v56 = vpop.f32.mrb[28].mxu1 }
 0x20b   : > { %8806 = vst [vmem:[#allocation63_spill] sm:$0xff] %v6468_v56  ;;  %v6472_v44 = vpop.f32.mrb[29].mxu1  ;;  %v6493_v56 = vld [vmem:[%s5785_s24 + $0x390] sm:$0xff] }
 0x20c   : > { %v6470_v50 = vmul.f32 %v748_v17, %v746_v33  ;;  %v751_v7 = vpop.f32.mrb[56].mxu0  ;;  %8808 = vst [vmem:[#allocation65_spill] sm:$0xff] %v6472_v44  ;;  %v6479_v55 = vpop.f32.mrb[30].mxu1  ;;  %4543 = vmatprep.mubr.f32.mxu1 %v6493_v56 }
 0x20d   : > { %v752_v27 = vadd.f32 %v751_v7, %v6128_v37  ;;  %v753_v41 = vpop.f32.mrb[57].mxu0  ;;  %1068 = vmatmul.mubr.f32.gmra.mrb[162].mxu0 %v6103_v28  ;;  %8809 = vst [vmem:[#allocation66_spill] sm:$0xff] %v6479_v55  ;;  %v6484_v17 = vpop.f32.mrb[31].mxu1 }
 0x20e   : > { %8807 = vst [vmem:[#allocation64_spill] sm:$0xff] %v6470_v50  ;;  %v754_v49 = vadd.f32 %v753_v41, %v6132_v38  ;;  %1073 = vmatprep.mubr.f32.mxu0 %v8789_v9  ;;  %8810 = vst [vmem:[#allocation67_spill] sm:$0xff] %v6484_v17  ;;  %v6486_v33 = vpop.f32.mrb[32].mxu1 }
 0x20f   : > { %8811 = vst [vmem:[#allocation68_spill] sm:$0xff] %v6486_v33  ;;  %v6490_v7 = vpop.f32.mrb[33].mxu1  ;;  %v6511_v33 = vld [vmem:[%s5785_s24 + $0x398] sm:$0xff] }
 0x210   : > { %v6488_v50 = vmul.f32 %v754_v49, %v752_v27  ;;  %v757_v44 = vpop.f32.mrb[58].mxu0  ;;  %8813 = vst [vmem:[#allocation70_spill] sm:$0xff] %v6490_v7  ;;  %v6497_v41 = vpop.f32.mrb[34].mxu1  ;;  %4544 = vmatmul.mubr.f32.gmra.mrb[114].mxu1 %v6511_v33 }
 0x211   : > { %v758_v28 = vadd.f32 %v757_v44, %v6128_v37  ;;  %v759_v55 = vpop.f32.mrb[59].mxu0  ;;  %1074 = vmatmul.mubr.f32.gmra.mrb[164].mxu0 %v6109_v30  ;;  %8814 = vst [vmem:[#allocation71_spill] sm:$0xff] %v6497_v41  ;;  %v6502_v49 = vpop.f32.mrb[35].mxu1 }
 0x212   : > { %8812 = vst [vmem:[#allocation69_spill] sm:$0xff] %v6488_v50  ;;  %v760_v17 = vadd.f32 %v759_v55, %v6132_v38  ;;  %1079 = vmatprep.mubr.f32.mxu0 %v8789_v9  ;;  %8815 = vst [vmem:[#allocation72_spill] sm:$0xff] %v6502_v49  ;;  %v6504_v27 = vpop.f32.mrb[36].mxu1 }
 0x213   : > { %8816 = vst [vmem:[#allocation73_spill] sm:$0xff] %v6504_v27  ;;  %v6508_v44 = vpop.f32.mrb[37].mxu1 }
 0x214   : > { %v6506_v50 = vmul.f32 %v760_v17, %v758_v28  ;;  %v763_v7 = vpop.f32.mrb[60].mxu0  ;;  %8818 = vst [vmem:[#allocation75_spill] sm:$0xff] %v6508_v44  ;;  %v6515_v55 = vpop.f32.mrb[38].mxu1 }
 0x215   : > { %v764_v30 = vadd.f32 %v763_v7, %v6128_v37  ;;  %v765_v41 = vpop.f32.mrb[61].mxu0  ;;  %1080 = vmatmul.mubr.f32.gmra.mrb[166].mxu0 %v6117_v32  ;;  %8819 = vst [vmem:[#allocation76_spill] sm:$0xff] %v6515_v55  ;;  %v6520_v17 = vpop.f32.mrb[39].mxu1  ;;  %v6529_v7 = vld [vmem:[%s5785_s24 + $0x3a0] sm:$0xff] }
 0x216   : > { %8817 = vst [vmem:[#allocation74_spill] sm:$0xff] %v6506_v50  ;;  %v766_v49 = vadd.f32 %v765_v41, %v6132_v38  ;;  %1085 = vmatprep.mubr.f32.mxu0 %v8789_v9  ;;  %8820 = vst [vmem:[#allocation77_spill] sm:$0xff] %v6520_v17  ;;  %v6522_v28 = vpop.f32.mrb[40].mxu1  ;;  %4546 = vmatprep.mubr.f32.mxu1 %v6529_v7 }
 0x217   : > { %8821 = vst [vmem:[#allocation78_spill] sm:$0xff] %v6522_v28  ;;  %v6526_v27 = vpop.f32.mrb[41].mxu1 }
 0x218   : > { %v6524_v50 = vmul.f32 %v766_v49, %v764_v30  ;;  %v769_v44 = vpop.f32.mrb[62].mxu0  ;;  %8823 = vst [vmem:[#allocation80_spill] sm:$0xff] %v6526_v27  ;;  %v6533_v41 = vpop.f32.mrb[42].mxu1 }
 0x219   : > { %v770_v32 = vadd.f32 %v769_v44, %v6128_v37  ;;  %v771_v55 = vpop.f32.mrb[63].mxu0  ;;  %1086 = vmatmul.mubr.f32.gmra.mrb[168].mxu0 %v6125_v36  ;;  %8824 = vst [vmem:[#allocation81_spill] sm:$0xff] %v6533_v41  ;;  %v6538_v49 = vpop.f32.mrb[43].mxu1  ;;  %v6549_v41 = vld [vmem:[%s5785_s24 + $0x3a8] sm:$0xff] }
 0x21a   : > { %8822 = vst [vmem:[#allocation79_spill] sm:$0xff] %v6524_v50  ;;  %v772_v17 = vadd.f32 %v771_v55, %v6132_v38  ;;  %1091 = vmatprep.mubr.f32.mxu0 %v8789_v9  ;;  %8825 = vst [vmem:[#allocation82_spill] sm:$0xff] %v6538_v49  ;;  %v6540_v30 = vpop.f32.mrb[44].mxu1  ;;  %4547 = vmatmul.mubr.f32.gmra.mrb[116].mxu1 %v6549_v41 }
 0x21b   : > { %8826 = vst [vmem:[#allocation83_spill] sm:$0xff] %v6540_v30  ;;  %v6544_v28 = vpop.f32.mrb[45].mxu1  ;;  %v6567_v30 = vld [vmem:[%s5785_s24 + $0x3b0] sm:$0xff] }
 0x21c   : > { %v6542_v50 = vmul.f32 %v772_v17, %v770_v32  ;;  %v775_v27 = vpop.f32.mrb[64].mxu0  ;;  %8828 = vst [vmem:[#allocation85_spill] sm:$0xff] %v6544_v28  ;;  %v6553_v49 = vpop.f32.mrb[46].mxu1  ;;  %4549 = vmatprep.mubr.f32.mxu1 %v6567_v30 }
 0x21d   : > { %v776_v44 = vadd.f32 %v775_v27, %v6128_v37  ;;  %v777_v36 = vpop.f32.mrb[65].mxu0  ;;  %1092 = vmatmul.mubr.f32.gmra.mrb[170].mxu0 %v6135_v40  ;;  %8829 = vst [vmem:[#allocation86_spill] sm:$0xff] %v6553_v49  ;;  %v6556_v17 = vpop.f32.mrb[47].mxu1 }
 0x21e   : > { %8827 = vst [vmem:[#allocation84_spill] sm:$0xff] %v6542_v50  ;;  %v778_v55 = vadd.f32 %v777_v36, %v6132_v38  ;;  %1097 = vmatprep.mubr.f32.mxu0 %v8789_v9  ;;  %8830 = vst [vmem:[#allocation87_spill] sm:$0xff] %v6556_v17  ;;  %v6560_v27 = vpop.f32.mrb[48].mxu1 }
 0x21f   : > { %8832 = vst [vmem:[#allocation89_spill] sm:$0xff] %v6560_v27  ;;  %v6564_v36 = vpop.f32.mrb[49].mxu1  ;;  %v6585_v27 = vld [vmem:[%s5785_s24 + $0x3b8] sm:$0xff] }
 0x220   : > { %v6558_v32 = vmul.f32 %v778_v55, %v776_v44  ;;  %v781_v50 = vpop.f32.mrb[66].mxu0  ;;  %8833 = vst [vmem:[#allocation90_spill] sm:$0xff] %v6564_v36  ;;  %v6571_v17 = vpop.f32.mrb[50].mxu1  ;;  %8839 = vst [vmem:[#allocation96_spill] sm:$0xff] %v6585_v27  ;;  %4550 = vmatmul.mubr.f32.gmra.mrb[118].mxu1 %v6585_v27 }
 0x221   : > { %v782_v28 = vadd.f32 %v781_v50, %v6128_v37  ;;  %v783_v40 = vpop.f32.mrb[67].mxu0  ;;  %1098 = vmatmul.mubr.f32.gmra.mrb[172].mxu0 %v6145_v46  ;;  %8834 = vst [vmem:[#allocation91_spill] sm:$0xff] %v6571_v17  ;;  %v6574_v44 = vpop.f32.mrb[51].mxu1 }
 0x222   : > { %8831 = vst [vmem:[#allocation88_spill] sm:$0xff] %v6558_v32  ;;  %v784_v49 = vadd.f32 %v783_v40, %v6132_v38  ;;  %1103 = vmatprep.mubr.f32.mxu0 %v8789_v9  ;;  %8835 = vst [vmem:[#allocation92_spill] sm:$0xff] %v6574_v44  ;;  %v6578_v32 = vpop.f32.mrb[52].mxu1 }
 0x223   : > { %8837 = vst [vmem:[#allocation94_spill] sm:$0xff] %v6578_v32  ;;  %v6582_v40 = vpop.f32.mrb[53].mxu1  ;;  %v6603_v32 = vld [vmem:[%s5785_s24 + $0x3c0] sm:$0xff] }
 0x224   : > { %v6576_v55 = vmul.f32 %v784_v49, %v782_v28  ;;  %v787_v50 = vpop.f32.mrb[68].mxu0  ;;  %8838 = vst [vmem:[#allocation95_spill] sm:$0xff] %v6582_v40  ;;  %v6589_v44 = vpop.f32.mrb[54].mxu1  ;;  %8845 = vst [vmem:[#allocation102_spill] sm:$0xff] %v6603_v32  ;;  %4552 = vmatprep.mubr.f32.mxu1 %v6603_v32 }
 0x225   : > { %v788_v46 = vadd.f32 %v787_v50, %v6128_v37  ;;  %v789_v36 = vpop.f32.mrb[69].mxu0  ;;  %1104 = vmatmul.mubr.f32.gmra.mrb[174].mxu0 %v6155_v52  ;;  %8840 = vst [vmem:[#allocation97_spill] sm:$0xff] %v6589_v44  ;;  %v6592_v28 = vpop.f32.mrb[55].mxu1 }
 0x226   : > { %8836 = vst [vmem:[#allocation93_spill] sm:$0xff] %v6576_v55  ;;  %v790_v17 = vadd.f32 %v789_v36, %v6132_v38  ;;  %1109 = vmatprep.mubr.f32.mxu0 %v8789_v9  ;;  %8841 = vst [vmem:[#allocation98_spill] sm:$0xff] %v6592_v28  ;;  %v6596_v55 = vpop.f32.mrb[56].mxu1 }
 0x227   : > { %8843 = vst [vmem:[#allocation100_spill] sm:$0xff] %v6596_v55  ;;  %v6600_v36 = vpop.f32.mrb[57].mxu1 }
 0x228   : > { %v6594_v49 = vmul.f32 %v790_v17, %v788_v46  ;;  %v793_v50 = vpop.f32.mrb[70].mxu0  ;;  %8844 = vst [vmem:[#allocation101_spill] sm:$0xff] %v6600_v36  ;;  %v6607_v28 = vpop.f32.mrb[58].mxu1 }
 0x229   : > { %v794_v52 = vadd.f32 %v793_v50, %v6128_v37  ;;  %v795_v40 = vpop.f32.mrb[71].mxu0  ;;  %1110 = vmatmul.mubr.f32.gmra.mrb[176].mxu0 %v6165_v58  ;;  %8846 = vst [vmem:[#allocation103_spill] sm:$0xff] %v6607_v28  ;;  %v6610_v17 = vpop.f32.mrb[59].mxu1 }
 0x22a   : > { %8842 = vst [vmem:[#allocation99_spill] sm:$0xff] %v6594_v49  ;;  %v796_v44 = vadd.f32 %v795_v40, %v6132_v38  ;;  %1115 = vmatprep.mubr.f32.mxu0 %v8789_v9  ;;  %8847 = vst [vmem:[#allocation104_spill] sm:$0xff] %v6610_v17  ;;  %v6614_v49 = vpop.f32.mrb[60].mxu1  ;;  %v6621_v40 = vld [vmem:[%s5785_s24 + $0x3c8] sm:$0xff] }
 0x22b   : > { %8849 = vst [vmem:[#allocation106_spill] sm:$0xff] %v6614_v49  ;;  %v6618_v55 = vpop.f32.mrb[61].mxu1  ;;  %4553 = vmatmul.mubr.f32.gmra.mrb[120].mxu1 %v6621_v40  ;;  %v3021_v49 = vld [vmem:[#allocation8 + $0x30] sm:$0xff] }
 0x22c   : > { %v6612_v46 = vmul.f32 %v796_v44, %v794_v52  ;;  %v799_v50 = vpop.f32.mrb[72].mxu0  ;;  %8850 = vst [vmem:[#allocation107_spill] sm:$0xff] %v6618_v55  ;;  %v6625_v17 = vpop.f32.mrb[62].mxu1 }
 0x22d   : > { %v800_v58 = vadd.f32 %v799_v50, %v6128_v37  ;;  %v801_v36 = vpop.f32.mrb[73].mxu0  ;;  %1116 = vmatmul.mubr.f32.gmra.mrb[178].mxu0 %v6175_v1  ;;  %8851 = vst [vmem:[#allocation108_spill] sm:$0xff] %v6625_v17  ;;  %v6628_v44 = vpop.f32.mrb[63].mxu1  ;;  %v3022_v1 = vld [vmem:[#allocation8 + $0x38] sm:$0xff] }
 0x22e   : > { %8848 = vst [vmem:[#allocation105_spill] sm:$0xff] %v6612_v46  ;;  %v802_v28 = vadd.f32 %v801_v36, %v6132_v38  ;;  %1121 = vmatprep.mubr.f32.mxu0 %v8789_v9  ;;  %8852 = vst [vmem:[#allocation109_spill] sm:$0xff] %v6628_v44  ;;  %v6632_v46 = vpop.f32.mrb[64].mxu1  ;;  %v4864_v36 = vpack.c.bf16 %v3022_v1, %v3021_v49  ;;  %v3023_v49 = vld [vmem:[#allocation8 + $0x40] sm:$0xff]  ;;  %v3024_v1 = vld [vmem:[#allocation8 + $0x48] sm:$0xff] }
 0x22f   : > { %v6636_v27 = vpop.f32.mrb[65].mxu1 }
 0x230   : > { %v6630_v52 = vmul.f32 %v802_v28, %v800_v58  ;;  %v805_v50 = vpop.f32.mrb[74].mxu0  ;;  %8854 = vst [vmem:[#allocation111_spill] sm:$0xff] %v6636_v27  ;;  %v6641_v28 = vld [vmem:[%s5785_s24 + $0x3d0] sm:$0xff]  ;;  %4865 = vmatprep.subr.bf16.mxu1 %v4864_v36  ;;  %v4868_v27 = vpack.c.bf16 %v3024_v1, %v3023_v49  ;;  %v6665_v1 = vld [vmem:[%s5785_s24 + $0x3e0] sm:$0xff] }
 0x231   : > { %v806_v55 = vadd.f32 %v805_v50, %v6128_v37  ;;  %v807_v32 = vpop.f32.mrb[75].mxu0  ;;  %1122 = vmatmul.mubr.f32.gmra.mrb[180].mxu0 %v6185_v35  ;;  %4555 = vmatprep.mubr.f32.mxu1 %v6641_v28  ;;  %8860 = vst [vmem:[#allocation117_spill] sm:$0xff] %v6665_v1 }
 0x232   : > { %8853 = vst [vmem:[#allocation110_spill] sm:$0xff] %v6630_v52  ;;  %v808_v17 = vadd.f32 %v807_v32, %v6132_v38  ;;  %1127 = vmatprep.mubr.f32.mxu0 %v8789_v9  ;;  %4867 = vmatpush3.bf16.msra.mxu1 %v4864_v36  ;;  %v6651_v52 = vld [vmem:[%s5785_s24 + $0x3d8] sm:$0xff] }
 0x233   : > { %8856 = vst [vmem:[#allocation113_spill] sm:$0xff] %v6651_v52  ;;  %4556 = vmatmul.mubr.f32.gmra.mrb[122].mxu1 %v6651_v52  ;;  %4869 = vmatprep.subr.bf16.mxu1 %v4868_v27  ;;  %v6675_v52 = vld [vmem:[%s5785_s24 + $0x3e8] sm:$0xff] }
 0x234   : > { %v6644_v58 = vmul.f32 %v808_v17, %v806_v55  ;;  %v811_v44 = vpop.f32.mrb[76].mxu0  ;;  %4558 = vmatprep.mubr.f32.mxu1 %v6665_v1  ;;  %8862 = vst [vmem:[#allocation119_spill] sm:$0xff] %v6675_v52  ;;  %v6685_v1 = vld [vmem:[%s5785_s24 + $0x3f0] sm:$0xff] }
 0x235   : > { %v812_v50 = vadd.f32 %v811_v44, %v6128_v37  ;;  %v813_v35 = vpop.f32.mrb[77].mxu0  ;;  %1128 = vmatmul.mubr.f32.gmra.mrb[182].mxu0 %v6195_v45  ;;  %v6658_v45 = vpop.f32.mrb[66].mxu1 }
 0x236   : > { %8855 = vst [vmem:[#allocation112_spill] sm:$0xff] %v6644_v58  ;;  %v814_v32 = vadd.f32 %v813_v35, %v6132_v38  ;;  %1133 = vmatprep.mubr.f32.mxu0 %v8789_v9  ;;  %8858 = vst [vmem:[#allocation115_spill] sm:$0xff] %v6658_v45  ;;  %4871 = vmatpush3.bf16.msra.mxu1 %v4868_v27  ;;  %v6662_v49 = vpop.f32.mrb[67].mxu1  ;;  %v3027_v27 = vld [vmem:[#allocation8 + $0x60] sm:$0xff] }
 0x237   : > { %8859 = vst [vmem:[#allocation116_spill] sm:$0xff] %v6662_v49  ;;  %4559 = vmatmul.mubr.f32.gmra.mrb[124].mxu1 %v6675_v52 }
 0x238   : > { %v6654_v55 = vmul.f32 %v814_v32, %v812_v50  ;;  %v817_v17 = vpop.f32.mrb[78].mxu0  ;;  %v3025_v50 = vld [vmem:[#allocation8 + $0x50] sm:$0xff]  ;;  %v3026_v32 = vld [vmem:[#allocation8 + $0x58] sm:$0xff]  ;;  %4561 = vmatprep.mubr.f32.mxu1 %v6685_v1 }
 0x239   : > { %v818_v44 = vadd.f32 %v817_v17, %v6128_v37  ;;  %v819_v36 = vpop.f32.mrb[79].mxu0  ;;  %1134 = vmatmul.mubr.f32.gmra.mrb[184].mxu0 %v6205_v53  ;;  %v4872_v49 = vpack.c.bf16 %v3026_v32, %v3025_v50  ;;  %v3029_v50 = vld [vmem:[#allocation8 + $0x70] sm:$0xff]  ;;  %v3030_v32 = vld [vmem:[#allocation8 + $0x78] sm:$0xff] }
 0x23a   : > { %8857 = vst [vmem:[#allocation114_spill] sm:$0xff] %v6654_v55  ;;  %v820_v35 = vadd.f32 %v819_v36, %v6132_v38  ;;  %1139 = vmatprep.mubr.f32.mxu0 %v8789_v9  ;;  %v3028_v36 = vld [vmem:[#allocation8 + $0x68] sm:$0xff] }
 0x23b   : > { %4873 = vmatprep.subr.bf16.mxu1 %v4872_v49 }
 0x23c   : > { %v6668_v17 = vmul.f32 %v820_v35, %v818_v44  ;;  %v823_v55 = vpop.f32.mrb[80].mxu0  ;;  %v4876_v44 = vpack.c.bf16 %v3028_v36, %v3027_v27  ;;  %4875 = vmatpush3.bf16.msra.mxu1 %v4872_v49  ;;  %v4880_v27 = vpack.c.bf16 %v3030_v32, %v3029_v50 }
 0x23d   : > { %v824_v53 = vadd.f32 %v823_v55, %v6128_v37  ;;  %v825_v58 = vpop.f32.mrb[81].mxu0  ;;  %1140 = vmatmul.mubr.f32.gmra.mrb[186].mxu0 %v6215_v60 }
 0x23e   : > { %8861 = vst [vmem:[#allocation118_spill] sm:$0xff] %v6668_v17  ;;  %v826_v45 = vadd.f32 %v825_v58, %v6132_v38  ;;  %1145 = vmatprep.mubr.f32.mxu0 %v8789_v9  ;;  %v6682_v58 = vpop.f32.mrb[68].mxu1  ;;  %4877 = vmatprep.subr.bf16.mxu1 %v4876_v44 }
 0x240   : > { %v6678_v35 = vmul.f32 %v826_v45, %v824_v53  ;;  %v829_v55 = vpop.f32.mrb[82].mxu0  ;;  %v6689_v45 = vpop.f32.mrb[69].mxu1  ;;  %v6692_v53 = vld [vmem:[%s5785_s24 + $0x3f8] sm:$0xff]  ;;  %4879 = vmatpush3.bf16.msra.mxu1 %v4876_v44 }
 0x241   : > { %v830_v60 = vadd.f32 %v829_v55, %v6128_v37  ;;  %v831_v17 = vpop.f32.mrb[83].mxu0  ;;  %1146 = vmatmul.mubr.f32.gmra.mrb[188].mxu0 %v6225_v3  ;;  %4562 = vmatmul.mubr.f32.gmra.mrb[126].mxu1 %v6692_v53  ;;  %v6706_v32 = vpop.f32.mrb[70].mxu1 }
 0x242   : > { %8863 = vst [vmem:[#allocation120_spill] sm:$0xff] %v6678_v35  ;;  %v832_v52 = vadd.f32 %v831_v17, %v6132_v38  ;;  %1151 = vmatprep.mubr.f32.mxu0 %v8789_v9  ;;  %4881 = vmatprep.subr.bf16.mxu1 %v4880_v27 }
 0x244   : > { %v6695_v3 = vmul.f32 %v832_v52, %v830_v60  ;;  %v835_v49 = vpop.f32.mrb[84].mxu0  ;;  %4883 = vmatpush3.bf16.msra.mxu1 %v4880_v27 }
 0x245   : > { %v836_v36 = vadd.f32 %v835_v49, %v6128_v37  ;;  %v837_v55 = vpop.f32.mrb[85].mxu0  ;;  %1152 = vmatmul.mubr.f32.gmra.mrb[190].mxu0 %v6235_v48  ;;  %v6710_v48 = vpop.f32.mrb[71].mxu1 }
 0x246   : > { %8864 = vst [vmem:[#allocation121_spill] sm:$0xff] %v6695_v3  ;;  %v838_v17 = vadd.f32 %v837_v55, %v6132_v38  ;;  %1157 = vmatprep.mubr.f32.mxu0 %v8789_v9 }
 0x248   : > { %v6702_v35 = vmul.f32 %v838_v17, %v836_v36  ;;  %v841_v50 = vpop.f32.mrb[86].mxu0 }
 0x249   : > { %v842_v52 = vadd.f32 %v841_v50, %v6128_v37  ;;  %v843_v60 = vpop.f32.mrb[87].mxu0  ;;  %1158 = vmatmul.mubr.f32.gmra.mrb[192].mxu0 %v6245_v59 }
 0x24a   : > { %8865 = vst [vmem:[#allocation122_spill] sm:$0xff] %v6702_v35  ;;  %v844_v49 = vadd.f32 %v843_v60, %v6132_v38  ;;  %1163 = vmatprep.mubr.f32.mxu0 %v8789_v9 }
 0x24c   : > { %v6712_v44 = vmul.f32 %v844_v49, %v842_v52  ;;  %v847_v55 = vpop.f32.mrb[88].mxu0  ;;  %v6724_v49 = vpop.f32.mrb[72].mxu1 }
 0x24d   : > { %v848_v36 = vadd.f32 %v847_v55, %v6128_v37  ;;  %v849_v17 = vpop.f32.mrb[89].mxu0  ;;  %1164 = vmatmul.mubr.f32.gmra.mrb[194].mxu0 %v6255_v34  ;;  %v6726_v55 = vpop.f32.mrb[73].mxu1 }
 0x24e   : > { %8866 = vst [vmem:[#allocation123_spill] sm:$0xff] %v6712_v44  ;;  %v850_v50 = vadd.f32 %v849_v17, %v6132_v38  ;;  %1169 = vmatprep.mubr.f32.mxu0 %v8789_v9 }
 0x250   : > { %v6718_v59 = vmul.f32 %v850_v50, %v848_v36  ;;  %v853_v27 = vpop.f32.mrb[90].mxu0 }
 0x251   : > { %v854_v60 = vadd.f32 %v853_v27, %v6128_v37  ;;  %v855_v35 = vpop.f32.mrb[91].mxu0  ;;  %1170 = vmatmul.mubr.f32.gmra.mrb[196].mxu0 %v6265_v47 }
 0x252   : > { %8867 = vst [vmem:[#allocation124_spill] sm:$0xff] %v6718_v59  ;;  %v856_v52 = vadd.f32 %v855_v35, %v6132_v38  ;;  %1175 = vmatprep.mubr.f32.mxu0 %v8789_v9 }
 0x254   : > { %v6728_v34 = vmul.f32 %v856_v52, %v854_v60  ;;  %v859_v17 = vpop.f32.mrb[92].mxu0  ;;  %v6740_v52 = vpop.f32.mrb[74].mxu1 }
 0x255   : > { %v860_v36 = vadd.f32 %v859_v17, %v6128_v37  ;;  %v861_v50 = vpop.f32.mrb[93].mxu0  ;;  %1176 = vmatmul.mubr.f32.gmra.mrb[198].mxu0 %v6275_v6  ;;  %v6742_v17 = vpop.f32.mrb[75].mxu1 }
 0x256   : > { %8868 = vst [vmem:[#allocation125_spill] sm:$0xff] %v6728_v34  ;;  %v862_v27 = vadd.f32 %v861_v50, %v6132_v38  ;;  %1181 = vmatprep.mubr.f32.mxu0 %v8789_v9 }
 0x258   : > { %v6734_v47 = vmul.f32 %v862_v27, %v860_v36  ;;  %v865_v35 = vpop.f32.mrb[94].mxu0 }
 0x259   : > { %v866_v59 = vadd.f32 %v865_v35, %v6128_v37  ;;  %v867_v44 = vpop.f32.mrb[95].mxu0  ;;  %1182 = vmatmul.mubr.f32.gmra.mrb[200].mxu0 %v6285_v39 }
 0x25a   : > { %8869 = vst [vmem:[#allocation126_spill] sm:$0xff] %v6734_v47  ;;  %v868_v60 = vadd.f32 %v867_v44, %v6132_v38  ;;  %1187 = vmatprep.mubr.f32.mxu0 %v8789_v9 }
 0x25c   : > { %v6744_v6 = vmul.f32 %v868_v60, %v866_v59  ;;  %v871_v50 = vpop.f32.mrb[96].mxu0  ;;  %v6756_v60 = vpop.f32.mrb[76].mxu1 }
 0x25d   : > { %v872_v36 = vadd.f32 %v871_v50, %v6128_v37  ;;  %v873_v27 = vpop.f32.mrb[97].mxu0  ;;  %1188 = vmatmul.mubr.f32.gmra.mrb[202].mxu0 %v6295_v51  ;;  %v6758_v50 = vpop.f32.mrb[77].mxu1 }
 0x25e   : > { %8870 = vst [vmem:[#allocation127_spill] sm:$0xff] %v6744_v6  ;;  %v874_v35 = vadd.f32 %v873_v27, %v6132_v38  ;;  %1193 = vmatprep.mubr.f32.mxu0 %v8789_v9 }
 0x260   : > { %v6750_v39 = vmul.f32 %v874_v35, %v872_v36  ;;  %v877_v44 = vpop.f32.mrb[98].mxu0 }
 0x261   : > { %v878_v47 = vadd.f32 %v877_v44, %v6128_v37  ;;  %v879_v34 = vpop.f32.mrb[99].mxu0  ;;  %1194 = vmatmul.mubr.f32.gmra.mrb[204].mxu0 %v6305_v13 }
 0x262   : > { %8871 = vst [vmem:[#allocation128_spill] sm:$0xff] %v6750_v39  ;;  %v880_v59 = vadd.f32 %v879_v34, %v6132_v38  ;;  %1199 = vmatprep.mubr.f32.mxu0 %v8789_v9 }
 0x264   : > { %v6760_v51 = vmul.f32 %v880_v59, %v878_v47  ;;  %v883_v27 = vpop.f32.mrb[100].mxu0  ;;  %v6772_v59 = vpop.f32.mrb[78].mxu1 }
 0x265   : > { %v884_v36 = vadd.f32 %v883_v27, %v6128_v37  ;;  %v885_v35 = vpop.f32.mrb[101].mxu0  ;;  %1200 = vmatmul.mubr.f32.gmra.mrb[206].mxu0 %v6315_v54  ;;  %v6774_v27 = vpop.f32.mrb[79].mxu1 }
 0x266   : > { %8872 = vst [vmem:[#allocation129_spill] sm:$0xff] %v6760_v51  ;;  %v886_v44 = vadd.f32 %v885_v35, %v6132_v38  ;;  %1205 = vmatprep.mubr.f32.mxu0 %v8789_v9 }
 0x268   : > { %v6766_v13 = vmul.f32 %v886_v44, %v884_v36  ;;  %v889_v34 = vpop.f32.mrb[102].mxu0 }
 0x269   : > { %v890_v39 = vadd.f32 %v889_v34, %v6128_v37  ;;  %v891_v6 = vpop.f32.mrb[103].mxu0  ;;  %1206 = vmatmul.mubr.f32.gmra.mrb[208].mxu0 %v6325_v11 }
 0x26a   : > { %8873 = vst [vmem:[#allocation130_spill] sm:$0xff] %v6766_v13  ;;  %v892_v47 = vadd.f32 %v891_v6, %v6132_v38  ;;  %1211 = vmatprep.mubr.f32.mxu0 %v8789_v9 }
 0x26c   : > { %v6776_v54 = vmul.f32 %v892_v47, %v890_v39  ;;  %v895_v35 = vpop.f32.mrb[104].mxu0  ;;  %v6788_v47 = vpop.f32.mrb[80].mxu1 }
 0x26d   : > { %v896_v36 = vadd.f32 %v895_v35, %v6128_v37  ;;  %v897_v44 = vpop.f32.mrb[105].mxu0  ;;  %1212 = vmatmul.mubr.f32.gmra.mrb[210].mxu0 %v6335_v15  ;;  %v6790_v35 = vpop.f32.mrb[81].mxu1 }
 0x26e   : > { %8874 = vst [vmem:[#allocation131_spill] sm:$0xff] %v6776_v54  ;;  %v898_v34 = vadd.f32 %v897_v44, %v6132_v38  ;;  %1217 = vmatprep.mubr.f32.mxu0 %v8789_v9 }
 0x270   : > { %v6782_v11 = vmul.f32 %v898_v34, %v896_v36  ;;  %v901_v6 = vpop.f32.mrb[106].mxu0 }
 0x271   : > { %v902_v13 = vadd.f32 %v901_v6, %v6128_v37  ;;  %v903_v51 = vpop.f32.mrb[107].mxu0  ;;  %1218 = vmatmul.mubr.f32.gmra.mrb[212].mxu0 %v6349_v18 }
 0x272   : > { %8875 = vst [vmem:[#allocation132_spill] sm:$0xff] %v6782_v11  ;;  %v904_v39 = vadd.f32 %v903_v51, %v6132_v38  ;;  %1223 = vmatprep.mubr.f32.mxu0 %v8789_v9 }
 0x274   : > { %v6792_v15 = vmul.f32 %v904_v39, %v902_v13  ;;  %v907_v44 = vpop.f32.mrb[108].mxu0  ;;  %v6804_v39 = vpop.f32.mrb[82].mxu1 }
 0x275   : > { %v908_v36 = vadd.f32 %v907_v44, %v6128_v37  ;;  %v909_v34 = vpop.f32.mrb[109].mxu0  ;;  %1224 = vmatmul.mubr.f32.gmra.mrb[214].mxu0 %v6369_v10  ;;  %v6806_v44 = vpop.f32.mrb[83].mxu1 }
 0x276   : > { %8876 = vst [vmem:[#allocation133_spill] sm:$0xff] %v6792_v15  ;;  %v910_v6 = vadd.f32 %v909_v34, %v6132_v38  ;;  %1229 = vmatprep.mubr.f32.mxu0 %v8789_v9 }
 0x278   : > { %v6798_v18 = vmul.f32 %v910_v6, %v908_v36  ;;  %v913_v51 = vpop.f32.mrb[110].mxu0 }
 0x279   : > { %v914_v11 = vadd.f32 %v913_v51, %v6128_v37  ;;  %v915_v54 = vpop.f32.mrb[111].mxu0  ;;  %1230 = vmatmul.mubr.f32.gmra.mrb[216].mxu0 %v6385_v22 }
 0x27a   : > { %8877 = vst [vmem:[#allocation134_spill] sm:$0xff] %v6798_v18  ;;  %v916_v13 = vadd.f32 %v915_v54, %v6132_v38  ;;  %1235 = vmatprep.mubr.f32.mxu0 %v8789_v9 }
 0x27c   : > { %v6808_v10 = vmul.f32 %v916_v13, %v914_v11  ;;  %v919_v34 = vpop.f32.mrb[112].mxu0  ;;  %v6820_v13 = vpop.f32.mrb[84].mxu1 }
 0x27d   : > { %v920_v36 = vadd.f32 %v919_v34, %v6128_v37  ;;  %v921_v6 = vpop.f32.mrb[113].mxu0  ;;  %1236 = vmatmul.mubr.f32.gmra.mrb[218].mxu0 %v6403_v57  ;;  %8880 = vst [vmem:[#allocation137_spill] sm:$0xff] %v6820_v13  ;;  %v6822_v34 = vpop.f32.mrb[85].mxu1 }
 0x27e   : > { %8878 = vst [vmem:[#allocation135_spill] sm:$0xff] %v6808_v10  ;;  %v922_v51 = vadd.f32 %v921_v6, %v6132_v38  ;;  %1241 = vmatprep.mubr.f32.mxu0 %v8789_v9  ;;  %8881 = vst [vmem:[#allocation138_spill] sm:$0xff] %v6822_v34  ;;  %v8989_v34 = vld [vmem:[#allocation113_spill] sm:$0xff] }
 0x280   : > { %v6814_v22 = vmul.f32 %v922_v51, %v920_v36  ;;  %v925_v54 = vpop.f32.mrb[114].mxu0 }
 0x281   : > { %v926_v18 = vadd.f32 %v925_v54, %v6128_v37  ;;  %v927_v15 = vpop.f32.mrb[115].mxu0  ;;  %1242 = vmatmul.mubr.f32.gmra.mrb[220].mxu0 %v6421_v2 }
 0x282   : > { %8879 = vst [vmem:[#allocation136_spill] sm:$0xff] %v6814_v22  ;;  %v928_v11 = vadd.f32 %v927_v15, %v6132_v38  ;;  %1247 = vmatprep.mubr.f32.mxu0 %v8789_v9 }
 0x284   : > { %v6824_v57 = vmul.f32 %v928_v11, %v926_v18  ;;  %v931_v6 = vpop.f32.mrb[116].mxu0  ;;  %v6836_v11 = vpop.f32.mrb[86].mxu1 }
 0x285   : > { %v932_v36 = vadd.f32 %v931_v6, %v6128_v37  ;;  %v933_v51 = vpop.f32.mrb[117].mxu0  ;;  %1248 = vmatmul.mubr.f32.gmra.mrb[222].mxu0 %v6439_v25  ;;  %8884 = vst [vmem:[#allocation141_spill] sm:$0xff] %v6836_v11  ;;  %v6838_v6 = vpop.f32.mrb[87].mxu1 }
 0x286   : > { %8882 = vst [vmem:[#allocation139_spill] sm:$0xff] %v6824_v57  ;;  %v934_v54 = vadd.f32 %v933_v51, %v6132_v38  ;;  %1253 = vmatprep.mubr.f32.mxu0 %v8789_v9  ;;  %8885 = vst [vmem:[#allocation142_spill] sm:$0xff] %v6838_v6 }
 0x288   : > { %v6830_v2 = vmul.f32 %v934_v54, %v932_v36  ;;  %v937_v15 = vpop.f32.mrb[118].mxu0 }
 0x289   : > { %v938_v22 = vadd.f32 %v937_v15, %v6128_v37  ;;  %v939_v10 = vpop.f32.mrb[119].mxu0  ;;  %1254 = vmatmul.mubr.f32.gmra.mrb[224].mxu0 %v6457_v62 }
 0x28a   : > { %8883 = vst [vmem:[#allocation140_spill] sm:$0xff] %v6830_v2  ;;  %v940_v18 = vadd.f32 %v939_v10, %v6132_v38  ;;  %1259 = vmatprep.mubr.f32.mxu0 %v8789_v9  ;;  %v512_v2 = vsub.s32 2, %v6112_v31 }
 0x28c   : > { %v6840_v25 = vmul.f32 %v940_v18, %v938_v22  ;;  %v943_v51 = vpop.f32.mrb[120].mxu0  ;;  %v6853_v18 = vpop.f32.mrb[88].mxu1 }
 0x28d   : > { %v944_v36 = vadd.f32 %v943_v51, %v6128_v37  ;;  %v945_v54 = vpop.f32.mrb[121].mxu0  ;;  %1260 = vmatmul.mubr.f32.gmra.mrb[226].mxu0 %v6475_v26  ;;  %8888 = vst [vmem:[#allocation145_spill] sm:$0xff] %v6853_v18  ;;  %v6855_v26 = vpop.f32.mrb[89].mxu1 }
 0x28e   : > { %8886 = vst [vmem:[#allocation143_spill] sm:$0xff] %v6840_v25  ;;  %v946_v15 = vadd.f32 %v945_v54, %v6132_v38  ;;  %1265 = vmatprep.mubr.f32.mxu0 %v8789_v9  ;;  %8889 = vst [vmem:[#allocation146_spill] sm:$0xff] %v6855_v26  ;;  %v5381_v54 = vld [vmem:[#allocation7] sm:$0x7] }
 0x290   : > { %v6846_v62 = vmul.f32 %v946_v15, %v944_v36  ;;  %v949_v10 = vpop.f32.mrb[122].mxu0  ;;  %v6859_v15 = vrot.slane %v5381_v54, %v512_v2 }
 0x291   : > { %v950_v57 = vadd.f32 %v949_v10, %v6128_v37  ;;  %v951_v3 = vpop.f32.mrb[123].mxu0  ;;  %1266 = vmatmul.mubr.f32.gmra.mrb[228].mxu0 %v6493_v56 }
 0x292   : > { %8887 = vst [vmem:[#allocation144_spill] sm:$0xff] %v6846_v62  ;;  %v952_v22 = vadd.f32 %v951_v3, %v6132_v38  ;;  %1271 = vmatprep.mubr.f32.mxu0 %v8789_v9  ;;  %v6873_v2 = vadd.f32 %v6346_v14, %v6859_v15  ;;  %v6883_v54 = vadd.f32 %v6358_v63, %v6859_v15 }
 0x293   : > { %v6903_v63 = vadd.f32 %v6375_v4, %v6859_v15 }
 0x294   : > { %v6857_v51 = vmul.f32 %v952_v22, %v950_v57  ;;  %v955_v36 = vpop.f32.mrb[124].mxu0  ;;  %v6869_v57 = vadd.f32 %v6342_v8, %v6859_v15  ;;  %v6887_v8 = vadd.f32 %v6360_v19, %v6859_v15  ;;  %v6907_v19 = vadd.f32 %v6378_v12, %v6859_v15 }
 0x295   : > { %v956_v31 = vadd.f32 %v955_v36, %v6128_v37  ;;  %v957_v10 = vpop.f32.mrb[125].mxu0  ;;  %1272 = vmatmul.mubr.f32.gmra.mrb[230].mxu0 %v6511_v33  ;;  %v6879_v33 = vadd.f32 %v6353_v20, %v6859_v15  ;;  %v6899_v20 = vadd.f32 %v6371_v5, %v6859_v15  ;;  %v6921_v5 = vadd.f32 %v6394_v0, %v6859_v15  ;;  %v8896_v0 = vld [vmem:[#allocation50_spill] sm:$0xff] }
 0x296   : > { %8890 = vst [vmem:[#allocation147_spill] sm:$0xff] %v6857_v51  ;;  %v958_v56 = vadd.f32 %v957_v10, %v6132_v38  ;;  %1277 = vmatprep.mubr.f32.mxu0 %v8789_v9  ;;  %v6913_v10 = vadd.f32 %v6382_v61, %v6859_v15  ;;  %v6927_v12 = vadd.f32 %v6396_v21, %v6859_v15  ;;  %v8895_v61 = vld [vmem:[#allocation49_spill] sm:$0xff]  ;;  %v8897_v21 = vld [vmem:[#allocation51_spill] sm:$0xff] }
 0x298   : > { %v6865_v3 = vmul.f32 %v958_v56, %v956_v31  ;;  %v961_v62 = vpop.f32.mrb[126].mxu0 }
 0x299   : > { %v962_v22 = vadd.f32 %v961_v62, %v6128_v37  ;;  %v963_v36 = vpop.f32.mrb[127].mxu0  ;;  %1278 = vmatmul.mubr.f32.gmra.mrb[232].mxu0 %v6529_v7  ;;  %v6891_v62 = vpop.f32.mrb[90].mxu1  ;;  %v6895_v7 = vadd.f32 %v6364_v16, %v6859_v15  ;;  %v6917_v16 = vadd.f32 %v6389_v43, %v6859_v15 }
 0x29a   : > { %8891 = vst [vmem:[#allocation148_spill] sm:$0xff] %v6865_v3  ;;  %v964_v14 = vadd.f32 %v963_v36, %v6132_v38  ;;  %1283 = vmatprep.mubr.f32.mxu0 %v8789_v9  ;;  %8892 = vst [vmem:[#allocation149_spill] sm:$0xff] %v6891_v62  ;;  %v6909_v31 = vpop.f32.mrb[91].mxu1  ;;  %v6931_v36 = vadd.f32 %v6400_v29, %v6859_v15  ;;  %v6935_v3 = vadd.f32 %v8895_v61, %v6859_v15  ;;  %v8899_v29 = vld [vmem:[#allocation53_spill] sm:$0xff] }
 0x29b   : > { %8893 = vst [vmem:[#allocation150_spill] sm:$0xff] %v6909_v31  ;;  %v8909_v31 = vld [vmem:[#allocation58_spill] sm:$0xff] }
 0x29c   : > { %v6923_v4 = vmul.f32 %v964_v14, %v962_v22  ;;  %v967_v56 = vpop.f32.mrb[128].mxu0  ;;  %v6941_v22 = vadd.f32 %v8896_v0, %v6859_v15  ;;  %v6945_v14 = vadd.f32 %v8897_v21, %v6859_v15  ;;  %v6963_v0 = vadd.f32 %v6432_v23, %v6859_v15  ;;  %v8904_v21 = vld [vmem:[#allocation56_spill] sm:$0xff] }
 0x29d   : > { %v968_v43 = vadd.f32 %v967_v56, %v6128_v37  ;;  %v969_v51 = vpop.f32.mrb[129].mxu0  ;;  %1284 = vmatmul.mubr.f32.gmra.mrb[234].mxu0 %v6549_v41  ;;  %v8900_v56 = vld [vmem:[#allocation54_spill] sm:$0xff]  ;;  %v6959_v41 = vadd.f32 %v6430_v42, %v6859_v15  ;;  %v6979_v42 = vadd.f32 %v8909_v31, %v6859_v15  ;;  %v8911_v23 = vld [vmem:[#allocation60_spill] sm:$0xff]  ;;  %v8917_v31 = vld [vmem:[#allocation63_spill] sm:$0xff] }
 0x29e   : > { %8894 = vst [vmem:[#allocation151_spill] sm:$0xff] %v6923_v4  ;;  %8898 = vst [vmem:[#allocation49_spill] sm:$0xff] %v6945_v14  ;;  %v6949_v4 = vadd.f32 %v8899_v29, %v6859_v15  ;;  %v970_v61 = vadd.f32 %v969_v51, %v6132_v38  ;;  %1289 = vmatprep.mubr.f32.mxu0 %v8789_v9  ;;  %v6955_v25 = vadd.f32 %v8900_v56, %v6859_v15  ;;  %v8906_v51 = vld [vmem:[#allocation57_spill] sm:$0xff] }
 0x29f   : > { %8902 = vst [vmem:[#allocation51_spill] sm:$0xff] %v6959_v41  ;;  %8903 = vst [vmem:[#allocation53_spill] sm:$0xff] %v6963_v0  ;;  %v6967_v29 = vadd.f32 %v8904_v21, %v6859_v15  ;;  %v6971_v62 = vadd.f32 %v8906_v51, %v6859_v15  ;;  %v6975_v56 = vadd.f32 %v6448_v24, %v6859_v15  ;;  %v8913_v21 = vld [vmem:[#allocation61_spill] sm:$0xff]  ;;  %v8915_v51 = vld [vmem:[#allocation62_spill] sm:$0xff] }
 0x2a0   : > { %8901 = vst [vmem:[#allocation50_spill] sm:$0xff] %v6955_v25  ;;  %8910 = vst [vmem:[#allocation58_spill] sm:$0xff] %v6979_v42  ;;  %v2119_v26 = vmul.f32 %v970_v61, %v968_v43  ;;  %v973_v18 = vpop.f32.mrb[130].mxu0  ;;  %v6983_v11 = vadd.f32 %v8911_v23, %v6859_v15  ;;  %v6987_v0 = vadd.f32 %v8913_v21, %v6859_v15  ;;  %v8919_v61 = vld [vmem:[#allocation65_spill] sm:$0xff] }
 0x2a1   : > { %8905 = vst [vmem:[#allocation54_spill] sm:$0xff] %v6967_v29  ;;  %8907 = vst [vmem:[#allocation56_spill] sm:$0xff] %v6971_v62  ;;  %v6991_v62 = vadd.f32 %v8915_v51, %v6859_v15  ;;  %v974_v24 = vadd.f32 %v973_v18, %v6128_v37  ;;  %1290 = vmatmul.mubr.f32.gmra.mrb[236].mxu0 %v6567_v30  ;;  %v6997_v43 = vadd.f32 %v8917_v31, %v6859_v15  ;;  %v8921_v42 = vld [vmem:[#allocation25_spill] sm:$0xff]  ;;  %v7006_v51 = vpop.f32.mrb[92].mxu1  ;;  %v8923_v18 = vld [vmem:[#allocation66_spill] sm:$0xff] }
 0x2a2   : > { %8908 = vst [vmem:[#allocation57_spill] sm:$0xff] %v6975_v56  ;;  %8912 = vst [vmem:[#allocation60_spill] sm:$0xff] %v6983_v11  ;;  %v975_v56 = vpop.f32.mrb[131].mxu0  ;;  %v7001_v23 = vadd.f32 %v8919_v61, %v6859_v15  ;;  %v2183_v21 = vmax.f32 %v8921_v42, %v2119_v26  ;;  %1295 = vmatprep.mubr.f32.mxu0 %v8789_v9  ;;  %v8925_v30 = vld [vmem:[#allocation67_spill] sm:$0xff] }
 0x2a3   : > { %8914 = vst [vmem:[#allocation61_spill] sm:$0xff] %v6987_v0  ;;  %8916 = vst [vmem:[#allocation62_spill] sm:$0xff] %v6991_v62  ;;  %v976_v0 = vadd.f32 %v975_v56, %v6132_v38  ;;  %v7010_v62 = vadd.f32 %v8923_v18, %v6859_v15  ;;  %v7014_v31 = vadd.f32 %v8925_v30, %v6859_v15  ;;  %v7024_v56 = vpop.f32.mrb[93].mxu1 }
 0x2a4   : > { %8918 = vst [vmem:[#allocation63_spill] sm:$0xff] %v6997_v43  ;;  %8920 = vst [vmem:[#allocation65_spill] sm:$0xff] %v7001_v23  ;;  %v8927_v43 = vld [vmem:[#allocation68_spill] sm:$0xff]  ;;  %v8929_v23 = vld [vmem:[#allocation70_spill] sm:$0xff]  ;;  %v2247_v18 = vsub.f32 %v8921_v42, %v2183_v21  ;;  %v979_v30 = vpop.f32.mrb[132].mxu0 }
 0x2a5   : > { %8922 = vst [vmem:[#allocation25_spill] sm:$0xff] %v7006_v51  ;;  %8924 = vst [vmem:[#allocation66_spill] sm:$0xff] %v7010_v62  ;;  %v7018_v61 = vadd.f32 %v8927_v43, %v6859_v15  ;;  %v7022_v11 = vadd.f32 %v8929_v23, %v6859_v15  ;;  %v8932_v51 = vld [vmem:[#allocation71_spill] sm:$0xff]  ;;  %v2311_v62 = vsub.f32 %v2119_v26, %v2183_v21  ;;  %v8936_v43 = vld [vmem:[#allocation73_spill] sm:$0xff] }
 0x2a6   : > { %8926 = vst [vmem:[#allocation67_spill] sm:$0xff] %v7014_v31  ;;  %8931 = vst [vmem:[#allocation152_spill] sm:$0xff] %v7024_v56  ;;  %v7028_v29 = vadd.f32 %v8932_v51, %v6859_v15  ;;  %v2120_v6 = vmul.f32 %v976_v0, %v974_v24  ;;  %v8934_v31 = vld [vmem:[#allocation72_spill] sm:$0xff]  ;;  %v8938_v23 = vld [vmem:[#allocation75_spill] sm:$0xff]  ;;  %v980_v51 = vadd.f32 %v979_v30, %v6128_v37  ;;  %v2375_v26 = vmul.f32 1.442695, %v2247_v18 }
 0x2a7   : > { %8928 = vst [vmem:[#allocation68_spill] sm:$0xff] %v7018_v61  ;;  %8930 = vst [vmem:[#allocation70_spill] sm:$0xff] %v7022_v11  ;;  %v7033_v13 = vadd.f32 %v8934_v31, %v6859_v15  ;;  %v7037_v61 = vadd.f32 %v8936_v43, %v6859_v15  ;;  %v7041_v11 = vadd.f32 %v8938_v23, %v6859_v15  ;;  %v8940_v56 = vld [vmem:[#allocation96_spill] sm:$0xff]  ;;  %v2503_v0 = vmul.f32 1.442695, %v2311_v62  ;;  %v8941_v42 = vld [vmem:[#allocation26_spill] sm:$0xff] }
 0x2a8   : > { %8933 = vst [vmem:[#allocation71_spill] sm:$0xff] %v7028_v29  ;;  %v981_v29 = vpop.f32.mrb[133].mxu0  ;;  %1296 = vmatmul.mubr.f32.gmra.mrb[238].mxu0 %v8940_v56  ;;  %v2184_v24 = vmax.f32 %v8941_v42, %v2120_v6  ;;  %v8942_v31 = vld [vmem:[#allocation76_spill] sm:$0xff]  ;;  %v8944_v23 = vld [vmem:[#allocation77_spill] sm:$0xff]  ;;  %v8946_v30 = vld [vmem:[#allocation78_spill] sm:$0xff]  ;;  %4997 = vpow2.f32 %v2375_v26 }
 0x2a9   : > { %8935 = vst [vmem:[#allocation72_spill] sm:$0xff] %v7033_v13  ;;  %8937 = vst [vmem:[#allocation73_spill] sm:$0xff] %v7037_v61  ;;  %v982_v21 = vadd.f32 %v981_v29, %v6132_v38  ;;  %1301 = vmatprep.mubr.f32.mxu0 %v8789_v9  ;;  %v7050_v43 = vadd.f32 %v8942_v31, %v6859_v15  ;;  %v7054_v61 = vadd.f32 %v8944_v23, %v6859_v15  ;;  %v8948_v62 = vld [vmem:[#allocation80_spill] sm:$0xff]  ;;  %v985_v25 = vpop.f32.mrb[134].mxu0  ;;  %v8950_v31 = vld [vmem:[#allocation81_spill] sm:$0xff] }
 0x2aa   : > { %8939 = vst [vmem:[#allocation75_spill] sm:$0xff] %v7041_v11  ;;  %v7058_v11 = vadd.f32 %v8946_v30, %v6859_v15  ;;  %v7062_v56 = vadd.f32 %v8948_v62, %v6859_v15  ;;  %v2248_v29 = vsub.f32 %v8941_v42, %v2184_v24  ;;  %v2312_v18 = vsub.f32 %v2120_v6, %v2184_v24  ;;  %v8952_v23 = vld [vmem:[#allocation82_spill] sm:$0xff]  ;;  %v8955_v42 = vld [vmem:[#allocation27_spill] sm:$0xff]  ;;  %v7078_v24 = vpop.f32.mrb[94].mxu1 }
 0x2ab   : > { %8943 = vst [vmem:[#allocation96_spill] sm:$0xff] %v7050_v43  ;;  %8945 = vst [vmem:[#allocation26_spill] sm:$0xff] %v7054_v61  ;;  %v2121_v13 = vmul.f32 %v982_v21, %v980_v51  ;;  %v7067_v43 = vadd.f32 %v8950_v31, %v6859_v15  ;;  %v7071_v61 = vadd.f32 %v8952_v23, %v6859_v15  ;;  %4999 = vpow2.f32 %v2503_v0  ;;  %v8954_v62 = vld [vmem:[#allocation102_spill] sm:$0xff]  ;;  %v8957_v21 = vld [vmem:[#allocation83_spill] sm:$0xff] }
 0x2ac   : > { %8947 = vst [vmem:[#allocation76_spill] sm:$0xff] %v7058_v11  ;;  %8949 = vst [vmem:[#allocation77_spill] sm:$0xff] %v7062_v56  ;;  %v986_v30 = vadd.f32 %v985_v25, %v6128_v37  ;;  %v987_v11 = vpop.f32.mrb[135].mxu0  ;;  %1302 = vmatmul.mubr.f32.gmra.mrb[240].mxu0 %v8954_v62  ;;  %v2377_v26 = vmul.f32 1.442695, %v2248_v29  ;;  %v7082_v31 = vadd.f32 %v8957_v21, %v6859_v15  ;;  %v8959_v0 = vld [vmem:[#allocation85_spill] sm:$0xff] }
 0x2ad   : > { %8951 = vst [vmem:[#allocation78_spill] sm:$0xff] %v7067_v43  ;;  %8953 = vst [vmem:[#allocation80_spill] sm:$0xff] %v7071_v61  ;;  %v2505_v56 = vmul.f32 1.442695, %v2312_v18  ;;  %v2185_v6 = vmax.f32 %v8955_v42, %v2121_v13  ;;  %v988_v51 = vadd.f32 %v987_v11, %v6132_v38  ;;  %1307 = vmatprep.mubr.f32.mxu0 %v8789_v9  ;;  %v8961_v23 = vld [vmem:[#allocation86_spill] sm:$0xff]  ;;  %v8963_v18 = vld [vmem:[#allocation87_spill] sm:$0xff] }
 0x2ae   : > { %8956 = vst [vmem:[#allocation81_spill] sm:$0xff] %v7078_v24  ;;  %8958 = vst [vmem:[#allocation82_spill] sm:$0xff] %v7082_v31  ;;  %v7086_v25 = vadd.f32 %v8959_v0, %v6859_v15  ;;  %v7090_v29 = vadd.f32 %v8961_v23, %v6859_v15  ;;  %v7094_v62 = vadd.f32 %v8963_v18, %v6859_v15  ;;  %v7096_v11 = vpop.f32.mrb[95].mxu1  ;;  %5001 = vpow2.f32 %v2377_v26  ;;  %v991_v31 = vpop.f32.mrb[136].mxu0  ;;  %v8966_v24 = vld [vmem:[#allocation89_spill] sm:$0xff] }
 0x2af   : > { %8965 = vst [vmem:[#allocation85_spill] sm:$0xff] %v7096_v11  ;;  %v2249_v43 = vsub.f32 %v8955_v42, %v2185_v6  ;;  %v2313_v61 = vsub.f32 %v2121_v13, %v2185_v6  ;;  %v2122_v21 = vmul.f32 %v988_v51, %v986_v30  ;;  %v7101_v0 = vadd.f32 %v8966_v24, %v6859_v15  ;;  %v8970_v42 = vld [vmem:[#allocation28_spill] sm:$0xff]  ;;  %v8971_v6 = vld [vmem:[#allocation91_spill] sm:$0xff] }
 0x2b0   : > { %8960 = vst [vmem:[#allocation102_spill] sm:$0xff] %v7086_v25  ;;  %8962 = vst [vmem:[#allocation27_spill] sm:$0xff] %v7090_v29  ;;  %v8968_v25 = vld [vmem:[#allocation90_spill] sm:$0xff]  ;;  %5003 = vpow2.f32 %v2505_v56  ;;  %v992_v18 = vadd.f32 %v991_v31, %v6128_v37  ;;  %v993_v29 = vpop.f32.mrb[137].mxu0  ;;  %1308 = vmatmul.mubr.f32.gmra.mrb[242].mxu0 %v6621_v40  ;;  %v7114_v51 = vadd.f32 %v8971_v6, %v6859_v15  ;;  %v8973_v24 = vld [vmem:[#allocation92_spill] sm:$0xff] }
 0x2b1   : > { %8964 = vst [vmem:[#allocation83_spill] sm:$0xff] %v7094_v62  ;;  %8967 = vst [vmem:[#allocation86_spill] sm:$0xff] %v7101_v0  ;;  %v7105_v23 = vadd.f32 %v8968_v25, %v6859_v15  ;;  %v2379_v26 = vmul.f32 1.442695, %v2249_v43  ;;  %v2507_v62 = vmul.f32 1.442695, %v2313_v61  ;;  %v2186_v13 = vmax.f32 %v8970_v42, %v2122_v21  ;;  %1313 = vmatprep.mubr.f32.mxu0 %v8789_v9 }
 0x2b2   : > { %v994_v30 = vadd.f32 %v993_v29, %v6132_v38  ;;  %8972 = vst [vmem:[#allocation89_spill] sm:$0xff] %v7114_v51  ;;  %v7118_v56 = vadd.f32 %v8973_v24, %v6859_v15  ;;  %v1742_v31 = vadd.f32 %v6632_v46, %v6859_v15  ;;  %v8975_v40 = vld [vmem:[#allocation111_spill] sm:$0xff]  ;;  %v997_v0 = vpop.f32.mrb[138].mxu0 }
 0x2b3   : > { %8969 = vst [vmem:[#allocation87_spill] sm:$0xff] %v7105_v23  ;;  %v1737_v61 = vadd.f32 %v8975_v40, %v6859_v15  ;;  %5005 = vpow2.f32 %v2379_v26  ;;  %v2250_v43 = vsub.f32 %v8970_v42, %v2186_v13  ;;  %v2314_v25 = vsub.f32 %v2122_v21, %v2186_v13  ;;  %v8976_v23 = vld [vmem:[#allocation94_spill] sm:$0xff]  ;;  %v8978_v51 = vld [vmem:[#allocation95_spill] sm:$0xff]  ;;  %v4998_v26 = vpop.eup %4997  ;;  %v8980_v21 = vld [vmem:[#allocation29_spill] sm:$0xff] }
 0x2b4   : > { %8974 = vst [vmem:[#allocation90_spill] sm:$0xff] %v7118_v56  ;;  %v2123_v29 = vmul.f32 %v994_v30, %v992_v18  ;;  %v7127_v6 = vadd.f32 %v8976_v23, %v6859_v15  ;;  %v7131_v24 = vadd.f32 %v8978_v51, %v6859_v15  ;;  %5007 = vpow2.f32 %v2507_v62  ;;  %v999_v56 = vpop.f32.mrb[139].mxu0  ;;  %1314 = vmatmul.mubr.f32.gmra.mrb[244].mxu0 %v6641_v28  ;;  %v7138_v23 = vpop.f32.mrb[96].mxu1  ;;  %v8982_v51 = vld [vmem:[#allocation97_spill] sm:$0xff]  ;;  %v8986_v28 = vld [vmem:[#allocation100_spill] sm:$0xff] }
 0x2b5   : > { %v998_v46 = vadd.f32 %v997_v0, %v6128_v37  ;;  %v2381_v40 = vmul.f32 1.442695, %v2250_v43  ;;  %v2509_v42 = vmul.f32 1.442695, %v2314_v25  ;;  %v1000_v13 = vadd.f32 %v999_v56, %v6132_v38  ;;  %1319 = vmatprep.mubr.f32.mxu0 %v8789_v9  ;;  %8981 = vst [vmem:[#allocation92_spill] sm:$0xff] %v7138_v23  ;;  %v5000_v30 = vpop.eup %4999  ;;  %v8984_v0 = vld [vmem:[#allocation98_spill] sm:$0xff] }
 0x2b6   : > { %8977 = vst [vmem:[#allocation28_spill] sm:$0xff] %v7127_v6  ;;  %8979 = vst [vmem:[#allocation91_spill] sm:$0xff] %v7131_v24  ;;  %v2187_v18 = vmax.f32 %v8980_v21, %v2123_v29  ;;  %v7142_v62 = vadd.f32 %v8982_v51, %v6859_v15  ;;  %v7146_v6 = vadd.f32 %v8984_v0, %v6859_v15  ;;  %v7155_v56 = vpop.f32.mrb[97].mxu1  ;;  %v1003_v51 = vpop.f32.mrb[140].mxu0 }
 0x2b7   : > { %v7150_v43 = vadd.f32 %v8986_v28, %v6859_v15  ;;  %v7153_v25 = vmul.f32 %v4998_v26, %v6873_v2  ;;  %8988 = vst [vmem:[#allocation29_spill] sm:$0xff] %v7155_v56  ;;  %5009 = vpow2.f32 %v2381_v40  ;;  %v7158_v11 = vmul.f32 %v5000_v30, %v1737_v61  ;;  %v8990_v2 = vld [vmem:[#allocation101_spill] sm:$0xff] }
 0x2b8   : > { %8983 = vst [vmem:[#allocation111_spill] sm:$0xff] %v7142_v62  ;;  %8985 = vst [vmem:[#allocation94_spill] sm:$0xff] %v7146_v6  ;;  %v2251_v24 = vsub.f32 %v8980_v21, %v2187_v18  ;;  %v2315_v23 = vsub.f32 %v2123_v29, %v2187_v18  ;;  %5011 = vpow2.f32 %v2509_v42  ;;  %v2124_v62 = vmul.f32 %v1000_v13, %v998_v46  ;;  %v1005_v6 = vpop.f32.mrb[141].mxu0  ;;  %v8992_v42 = vld [vmem:[#allocation30_spill] sm:$0xff]  ;;  %v8993_v21 = vld [vmem:[#allocation116_spill] sm:$0xff] }
 0x2b9   : > { %8987 = vst [vmem:[#allocation95_spill] sm:$0xff] %v7150_v43  ;;  %v1004_v0 = vadd.f32 %v1003_v51, %v6128_v37  ;;  %1320 = vmatmul.mubr.f32.gmra.mrb[246].mxu0 %v8989_v34  ;;  %v2631_v28 = vadd.f32 %v5000_v30, %v4998_v26  ;;  %v5002_v43 = vpop.eup %5001  ;;  %v7164_v41 = vadd.f32 %v8990_v2, %v6859_v15 }
 0x2ba   : > { %v2383_v40 = vmul.f32 1.442695, %v2251_v24  ;;  %v2511_v56 = vmul.f32 1.442695, %v2315_v23  ;;  %v1006_v29 = vadd.f32 %v1005_v6, %v6132_v38  ;;  %1325 = vmatprep.mubr.f32.mxu0 %v8789_v9  ;;  %v5004_v61 = vpop.eup %5003  ;;  %v2188_v46 = vmax.f32 %v8992_v42, %v2124_v62  ;;  %v1009_v23 = vpop.f32.mrb[142].mxu0 }
 0x2bb   : > { %8991 = vst [vmem:[#allocation97_spill] sm:$0xff] %v7164_v41  ;;  %v1747_v18 = vadd.f32 %v8993_v21, %v6859_v15  ;;  %5013 = vrcp.f32 %v2631_v28  ;;  %v7172_v34 = vmul.f32 %v5002_v43, %v6869_v57  ;;  %v2632_v26 = vadd.f32 %v5004_v61, %v5002_v43  ;;  %v1011_v2 = vpop.f32.mrb[143].mxu0  ;;  %v8995_v41 = vld [vmem:[#allocation117_spill] sm:$0xff]  ;;  %v8996_v57 = vld [vmem:[#allocation104_spill] sm:$0xff]  ;;  %v8998_v43 = vld [vmem:[#allocation31_spill] sm:$0xff] }
 0x2bc   : > { %5015 = vpow2.f32 %v2383_v40  ;;  %v7174_v13 = vmul.f32 %v5004_v61, %v1742_v31  ;;  %v2125_v24 = vmul.f32 %v1006_v29, %v1004_v0  ;;  %v2252_v6 = vsub.f32 %v8992_v42, %v2188_v46  ;;  %v9000_v61 = vld [vmem:[#allocation115_spill] sm:$0xff] }
 0x2bd   : > { %5017 = vpow2.f32 %v2511_v56  ;;  %v2316_v30 = vsub.f32 %v2124_v62, %v2188_v46  ;;  %v1010_v51 = vadd.f32 %v1009_v23, %v6128_v37  ;;  %1326 = vmatmul.mubr.f32.gmra.mrb[248].mxu0 %v8995_v41  ;;  %v5006_v21 = vpop.eup %5005  ;;  %v7181_v28 = vadd.f32 %v8996_v57, %v6859_v15  ;;  %v7186_v56 = vpop.f32.mrb[98].mxu1 }
 0x2be   : > { %8994 = vst [vmem:[#allocation98_spill] sm:$0xff] %v7174_v13  ;;  %5019 = vrcp.f32 %v2632_v26  ;;  %v2189_v31 = vmax.f32 %v8998_v43, %v2125_v24  ;;  %v1012_v0 = vadd.f32 %v1011_v2, %v6132_v38  ;;  %1331 = vmatprep.mubr.f32.mxu0 %v8789_v9  ;;  %8999 = vst [vmem:[#allocation113_spill] sm:$0xff] %v7186_v56  ;;  %v5008_v62 = vpop.eup %5007  ;;  %v2385_v40 = vmul.f32 1.442695, %v2252_v6  ;;  %v7193_v46 = vpop.f32.mrb[99].mxu1 }
 0x2bf   : > { %8997 = vst [vmem:[#allocation100_spill] sm:$0xff] %v7181_v28  ;;  %v2513_v29 = vmul.f32 1.442695, %v2316_v30  ;;  %v1752_v41 = vadd.f32 %v9000_v61, %v6859_v15  ;;  %v7191_v42 = vmul.f32 %v5006_v21, %v6883_v54  ;;  %9001 = vst [vmem:[#allocation101_spill] sm:$0xff] %v7193_v46  ;;  %v7196_v57 = vmul.f32 %v5008_v62, %v1747_v18  ;;  %v1015_v13 = vpop.f32.mrb[144].mxu0  ;;  %v9003_v30 = vld [vmem:[#allocation119_spill] sm:$0xff] }
 0x2c0   : > { %v2253_v26 = vsub.f32 %v8998_v43, %v2189_v31  ;;  %v2317_v23 = vsub.f32 %v2125_v24, %v2189_v31  ;;  %v2126_v2 = vmul.f32 %v1012_v0, %v1010_v51  ;;  %5021 = vpow2.f32 %v2385_v40  ;;  %v1017_v6 = vpop.f32.mrb[145].mxu0  ;;  %v9004_v43 = vld [vmem:[#allocation32_spill] sm:$0xff] }
 0x2c1   : > { %9002 = vst [vmem:[#allocation30_spill] sm:$0xff] %v7196_v57  ;;  %v1016_v28 = vadd.f32 %v1015_v13, %v6128_v37  ;;  %1332 = vmatmul.mubr.f32.gmra.mrb[250].mxu0 %v9003_v30  ;;  %v1757_v61 = vadd.f32 %v6689_v45, %v6859_v15  ;;  %v2633_v54 = vadd.f32 %v5008_v62, %v5006_v21  ;;  %v5010_v56 = vpop.eup %5009  ;;  %5023 = vpow2.f32 %v2513_v29  ;;  %v1021_v62 = vpop.f32.mrb[146].mxu0 }
 0x2c2   : > { %v2387_v46 = vmul.f32 1.442695, %v2253_v26  ;;  %v2515_v14 = vmul.f32 1.442695, %v2317_v23  ;;  %v2190_v24 = vmax.f32 %v9004_v43, %v2126_v2  ;;  %1337 = vmatprep.mubr.f32.mxu0 %v8789_v9  ;;  %v5012_v18 = vpop.eup %5011  ;;  %v1018_v51 = vadd.f32 %v1017_v6, %v6132_v38  ;;  %v1023_v23 = vpop.f32.mrb[147].mxu0 }
 0x2c3   : > { %v1762_v13 = vadd.f32 %v6682_v58, %v6859_v15  ;;  %5025 = vrcp.f32 %v2633_v54  ;;  %v7208_v31 = vmul.f32 %v5010_v56, %v6879_v33  ;;  %v7210_v45 = vmul.f32 %v5012_v18, %v1752_v41 }
 0x2c4   : > { %5027 = vpow2.f32 %v2387_v46  ;;  %v2254_v21 = vsub.f32 %v9004_v43, %v2190_v24  ;;  %v2318_v0 = vsub.f32 %v2126_v2, %v2190_v24  ;;  %v2127_v29 = vmul.f32 %v1018_v51, %v1016_v28  ;;  %v7218_v2 = vpop.f32.mrb[100].mxu1 }
 0x2c5   : > { %9005 = vst [vmem:[#allocation116_spill] sm:$0xff] %v7210_v45  ;;  %v5014_v40 = vpop.eup %5013  ;;  %5029 = vpow2.f32 %v2515_v14  ;;  %v1022_v26 = vadd.f32 %v1021_v62, %v6128_v37  ;;  %1338 = vmatmul.mubr.f32.gmra.mrb[252].mxu0 %v6685_v1  ;;  %v2634_v58 = vadd.f32 %v5012_v18, %v5010_v56  ;;  %v1024_v46 = vadd.f32 %v1023_v23, %v6132_v38  ;;  %v9006_v14 = vld [vmem:[#allocation33_spill] sm:$0xff]  ;;  %v7226_v56 = vpop.f32.mrb[101].mxu1 }
 0x2c6   : > { %v5016_v6 = vpop.eup %5015  ;;  %v2389_v30 = vmul.f32 1.442695, %v2254_v21  ;;  %v2517_v33 = vmul.f32 1.442695, %v2318_v0  ;;  %v2887_v41 = vmul.f32 %v5014_v40, %v7153_v25  ;;  %1343 = vmatprep.mubr.f32.mxu0 %v8789_v9  ;;  %v2191_v28 = vmax.f32 %v9006_v14, %v2127_v29  ;;  %v1027_v18 = vpop.f32.mrb[148].mxu0 }
 0x2c7   : > { %v5018_v54 = vpop.eup %5017  ;;  %v1767_v43 = vadd.f32 %v6710_v48, %v6859_v15  ;;  %5031 = vrcp.f32 %v2634_v58  ;;  %v7224_v1 = vmul.f32 %v5016_v6, %v6895_v7  ;;  %v2128_v9 = vmul.f32 %v1024_v46, %v1022_v26  ;;  %v1029_v62 = vpop.f32.mrb[149].mxu0  ;;  %v9009_v7 = vld [vmem:[#allocation34_spill] sm:$0xff] }
 0x2c8   : > { %v7228_v24 = vpop.eup %5019  ;;  %5033 = vpow2.f32 %v2389_v30  ;;  %v7230_v25 = vmul.f32 %v5018_v54, %v1757_v61  ;;  %4596 = vmatprep.mubr.f32.mxu1 %v2887_v41  ;;  %v2635_v51 = vadd.f32 %v5018_v54, %v5016_v6  ;;  %v2255_v21 = vsub.f32 %v9006_v14, %v2191_v28  ;;  %v1033_v14 = vpop.f32.mrb[150].mxu0 }
 0x2c9   : > { %9007 = vst [vmem:[#allocation117_spill] sm:$0xff] %v7228_v24  ;;  %5035 = vpow2.f32 %v2517_v33  ;;  %v2319_v0 = vsub.f32 %v2127_v29, %v2191_v28  ;;  %v1028_v48 = vadd.f32 %v1027_v18, %v6128_v37  ;;  %1344 = vmatmul.mubr.f32.gmra.mrb[254].mxu0 %v6692_v53  ;;  %v2192_v23 = vmax.f32 %v9009_v7, %v2128_v9 }
 0x2ca   : > { %9008 = vst [vmem:[#allocation104_spill] sm:$0xff] %v7230_v25  ;;  %v1030_v58 = vadd.f32 %v1029_v62, %v6132_v38  ;;  %v2888_v61 = vmul.f32 %v7228_v24, %v7172_v34  ;;  %5037 = vrcp.f32 %v2635_v51  ;;  %v5022_v26 = vpop.eup %5021  ;;  %v2391_v30 = vmul.f32 1.442695, %v2255_v21  ;;  %v1035_v51 = vpop.f32.mrb[151].mxu0 }
 0x2cb   : > { %v2519_v6 = vmul.f32 1.442695, %v2319_v0  ;;  %v1772_v33 = vadd.f32 %v6706_v32, %v6859_v15  ;;  %v7242_v29 = vmul.f32 %v5014_v40, %v7158_v11  ;;  %v5024_v46 = vpop.eup %5023  ;;  %v2256_v53 = vsub.f32 %v9009_v7, %v2192_v23  ;;  %v7254_v62 = vpop.f32.mrb[102].mxu1 }
 0x2cc   : > { %v2320_v41 = vsub.f32 %v2128_v9, %v2192_v23  ;;  %v2129_v54 = vmul.f32 %v1030_v58, %v1028_v48  ;;  %4597 = vmatmul.mubr.f32.vlgmr.msra.gmra.mrb[128].mxu1 %v2888_v61  ;;  %v7246_v28 = vmul.f32 %v5022_v26, %v6887_v8  ;;  %5039 = vpow2.f32 %v2391_v30  ;;  %v9013_v9 = vld [vmem:[#allocation35_spill] sm:$0xff]  ;;  %v7262_v58 = vpop.f32.mrb[103].mxu1 }
 0x2cd   : > { %9010 = vst [vmem:[#allocation31_spill] sm:$0xff] %v7242_v29  ;;  %v7248_v34 = vpop.eup %5025  ;;  %v7250_v18 = vmul.f32 %v5024_v46, %v1762_v13  ;;  %v1034_v32 = vadd.f32 %v1033_v14, %v6128_v37  ;;  %v2636_v11 = vadd.f32 %v5024_v46, %v5022_v26  ;;  %5041 = vpow2.f32 %v2519_v6  ;;  %v1039_v6 = vpop.f32.mrb[152].mxu0 }
 0x2ce   : > { %9011 = vst [vmem:[#allocation115_spill] sm:$0xff] %v7248_v34  ;;  %v5028_v40 = vpop.eup %5027  ;;  %v2393_v21 = vmul.f32 1.442695, %v2256_v53  ;;  %v2521_v0 = vmul.f32 1.442695, %v2320_v41  ;;  %v2193_v48 = vmax.f32 %v9013_v9, %v2129_v54  ;;  %v1036_v8 = vadd.f32 %v1035_v51, %v6132_v38  ;;  %v1041_v41 = vpop.f32.mrb[153].mxu0 }
 0x2cf   : > { %9012 = vst [vmem:[#allocation119_spill] sm:$0xff] %v7250_v18  ;;  %v5030_v7 = vpop.eup %5029  ;;  %v2889_v23 = vmul.f32 %v7248_v34, %v7191_v42  ;;  %5043 = vrcp.f32 %v2636_v11  ;;  %v7260_v13 = vmul.f32 %v5028_v40, %v6903_v63  ;;  %v1040_v42 = vadd.f32 %v1039_v6, %v6128_v37 }
 0x2d0   : > { %5045 = vpow2.f32 %v2393_v21  ;;  %v2257_v61 = vsub.f32 %v9013_v9, %v2193_v48  ;;  %v2321_v26 = vsub.f32 %v2129_v54, %v2193_v48  ;;  %v7265_v30 = vmul.f32 %v5030_v7, %v1767_v43  ;;  %v9016_v9 = vld [vmem:[#allocation36_spill] sm:$0xff] }
 0x2d1   : > { %v7267_v46 = vpop.eup %5031  ;;  %5047 = vpow2.f32 %v2521_v0  ;;  %v2130_v53 = vmul.f32 %v1036_v8, %v1034_v32  ;;  %4599 = vmatprep.mubr.f32.mxu1 %v2889_v23  ;;  %v2637_v14 = vadd.f32 %v5030_v7, %v5028_v40  ;;  %v1042_v21 = vadd.f32 %v1041_v41, %v6132_v38  ;;  %v1045_v23 = vpop.f32.mrb[154].mxu0  ;;  %v9019_v41 = vld [vmem:[#allocation37_spill] sm:$0xff] }
 0x2d2   : > { %9014 = vst [vmem:[#allocation32_spill] sm:$0xff] %v7265_v30  ;;  %9015 = vst [vmem:[#allocation33_spill] sm:$0xff] %v7267_v46  ;;  %v5034_v63 = vpop.eup %5033  ;;  %v2395_v51 = vmul.f32 1.442695, %v2257_v61  ;;  %v2523_v11 = vmul.f32 1.442695, %v2321_v26  ;;  %v2890_v54 = vmul.f32 %v7267_v46, %v7208_v31  ;;  %v1777_v0 = vadd.f32 %v6726_v55, %v6859_v15 }
 0x2d3   : > { %v5036_v43 = vpop.eup %5035  ;;  %v2194_v48 = vmax.f32 %v9016_v9, %v2130_v53  ;;  %5049 = vrcp.f32 %v2637_v14  ;;  %v7277_v32 = vmul.f32 %v5034_v63, %v6899_v20  ;;  %v2131_v7 = vmul.f32 %v1042_v21, %v1040_v42  ;;  %v1047_v55 = vpop.f32.mrb[155].mxu0 }
 0x2d4   : > { %v7279_v8 = vpop.eup %5037  ;;  %5051 = vpow2.f32 %v2395_v51  ;;  %v7281_v40 = vmul.f32 %v5036_v43, %v1772_v33  ;;  %4600 = vmatmul.mubr.f32.gmra.mrb[130].mxu1 %v2890_v54  ;;  %v2638_v61 = vadd.f32 %v5036_v43, %v5034_v63  ;;  %v1046_v6 = vadd.f32 %v1045_v23, %v6128_v37  ;;  %v7289_v33 = vpop.f32.mrb[104].mxu1 }
 0x2d5   : > { %9017 = vst [vmem:[#allocation34_spill] sm:$0xff] %v7279_v8  ;;  %5053 = vpow2.f32 %v2523_v11  ;;  %v2258_v31 = vsub.f32 %v9016_v9, %v2194_v48  ;;  %v2322_v26 = vsub.f32 %v2130_v53, %v2194_v48  ;;  %v2195_v14 = vmax.f32 %v9019_v41, %v2131_v7  ;;  %v7295_v54 = vpop.f32.mrb[105].mxu1 }
 0x2d6   : > { %9018 = vst [vmem:[#allocation35_spill] sm:$0xff] %v7281_v40  ;;  %v1048_v20 = vadd.f32 %v1047_v55, %v6132_v38  ;;  %v2891_v51 = vmul.f32 %v7279_v8, %v7224_v1  ;;  %5055 = vrcp.f32 %v2638_v61  ;;  %v5040_v42 = vpop.eup %5039  ;;  %v1782_v11 = vadd.f32 %v6724_v49, %v6859_v15  ;;  %v1051_v1 = vpop.f32.mrb[156].mxu0 }
 0x2d7   : > { %v2397_v21 = vmul.f32 1.442695, %v2258_v31  ;;  %v2525_v63 = vmul.f32 1.442695, %v2322_v26  ;;  %v1787_v53 = vadd.f32 %v6742_v17, %v6859_v15  ;;  %v5042_v43 = vpop.eup %5041  ;;  %v2259_v9 = vsub.f32 %v9019_v41, %v2195_v14  ;;  %v1053_v17 = vpop.f32.mrb[157].mxu0 }
 0x2d8   : > { %v2323_v48 = vsub.f32 %v2131_v7, %v2195_v14  ;;  %v2132_v23 = vmul.f32 %v1048_v20, %v1046_v6  ;;  %4602 = vmatprep.mubr.f32.mxu1 %v2891_v51  ;;  %v7299_v61 = vmul.f32 %v5040_v42, %v6913_v10  ;;  %v7303_v26 = vmul.f32 %v5042_v43, %v1777_v0  ;;  %v9022_v7 = vld [vmem:[#allocation38_spill] sm:$0xff] }
 0x2d9   : > { %v7301_v31 = vpop.eup %5043  ;;  %5057 = vpow2.f32 %v2397_v21  ;;  %v1052_v49 = vadd.f32 %v1051_v1, %v6128_v37  ;;  %v2639_v55 = vadd.f32 %v5042_v43, %v5040_v42  ;;  %v2399_v30 = vmul.f32 1.442695, %v2259_v9 }
 0x2da   : > { %9020 = vst [vmem:[#allocation36_spill] sm:$0xff] %v7301_v31  ;;  %9021 = vst [vmem:[#allocation37_spill] sm:$0xff] %v7303_v26  ;;  %v5046_v40 = vpop.eup %5045  ;;  %5059 = vpow2.f32 %v2525_v63  ;;  %v2527_v41 = vmul.f32 1.442695, %v2323_v48  ;;  %v2196_v6 = vmax.f32 %v9022_v7, %v2132_v23  ;;  %v1054_v20 = vadd.f32 %v1053_v17, %v6132_v38  ;;  %v1057_v63 = vpop.f32.mrb[158].mxu0 }
 0x2db   : > { %v5048_v14 = vpop.eup %5047  ;;  %v2892_v10 = vmul.f32 %v7301_v31, %v7246_v28  ;;  %5061 = vrcp.f32 %v2639_v55  ;;  %v7311_v0 = vmul.f32 %v5046_v40, %v6907_v19  ;;  %v1058_v48 = vadd.f32 %v1057_v63, %v6128_v37  ;;  %v1059_v1 = vpop.f32.mrb[159].mxu0  ;;  %v9089_v31 = vld [vmem:[#allocation79_spill] sm:$0xff] }
 0x2dc   : > { %5063 = vpow2.f32 %v2399_v30  ;;  %v7313_v51 = vmul.f32 %v5048_v14, %v1782_v11  ;;  %v2260_v42 = vsub.f32 %v9022_v7, %v2196_v6  ;;  %v2324_v21 = vsub.f32 %v2132_v23, %v2196_v6  ;;  %v7322_v7 = vpop.f32.mrb[106].mxu1  ;;  %v9025_v6 = vld [vmem:[#allocation39_spill] sm:$0xff] }
 0x2dd   : > { %v7316_v43 = vpop.eup %5049  ;;  %5065 = vpow2.f32 %v2527_v41  ;;  %v2133_v9 = vmul.f32 %v1054_v20, %v1052_v49  ;;  %4603 = vmatmul.mubr.f32.gmra.mrb[132].mxu1 %v2892_v10  ;;  %v2640_v28 = vadd.f32 %v5048_v14, %v5046_v40  ;;  %v1060_v30 = vadd.f32 %v1059_v1, %v6132_v38  ;;  %v7330_v40 = vpop.f32.mrb[107].mxu1 }
 0x2de   : > { %9023 = vst [vmem:[#allocation38_spill] sm:$0xff] %v7313_v51  ;;  %9024 = vst [vmem:[#allocation153_spill] sm:$0xff] %v7316_v43  ;;  %v5052_v17 = vpop.eup %5051  ;;  %v2401_v55 = vmul.f32 1.442695, %v2260_v42  ;;  %v2529_v19 = vmul.f32 1.442695, %v2324_v21  ;;  %v2893_v11 = vmul.f32 %v7316_v43, %v7260_v13  ;;  %v1792_v49 = vadd.f32 %v6740_v52, %v6859_v15 }
 0x2df   : > { %v5054_v23 = vpop.eup %5053  ;;  %v2197_v51 = vmax.f32 %v9025_v6, %v2133_v9  ;;  %5067 = vrcp.f32 %v2640_v28  ;;  %v7328_v41 = vmul.f32 %v5052_v17, %v6921_v5  ;;  %v2134_v13 = vmul.f32 %v1060_v30, %v1058_v48  ;;  %v1063_v10 = vpop.f32.mrb[160].mxu0  ;;  %v9028_v5 = vld [vmem:[#allocation40_spill] sm:$0xff] }
 0x2e0   : > { %v7332_v14 = vpop.eup %5055  ;;  %5069 = vpow2.f32 %v2401_v55  ;;  %v7334_v20 = vmul.f32 %v5054_v23, %v1787_v53  ;;  %4605 = vmatprep.mubr.f32.mxu1 %v2893_v11  ;;  %v2641_v42 = vadd.f32 %v5054_v23, %v5052_v17  ;;  %v1064_v52 = vadd.f32 %v1063_v10, %v6128_v37  ;;  %v1065_v1 = vpop.f32.mrb[161].mxu0 }
 0x2e1   : > { %9026 = vst [vmem:[#allocation39_spill] sm:$0xff] %v7332_v14  ;;  %5071 = vpow2.f32 %v2529_v19  ;;  %v2261_v21 = vsub.f32 %v9025_v6, %v2197_v51  ;;  %v2325_v63 = vsub.f32 %v2133_v9, %v2197_v51  ;;  %v2198_v28 = vmax.f32 %v9028_v5, %v2134_v13  ;;  %v1069_v6 = vpop.f32.mrb[162].mxu0 }
 0x2e2   : > { %9027 = vst [vmem:[#allocation154_spill] sm:$0xff] %v7334_v20  ;;  %v1066_v26 = vadd.f32 %v1065_v1, %v6132_v38  ;;  %v2894_v55 = vmul.f32 %v7332_v14, %v7277_v32  ;;  %5073 = vrcp.f32 %v2641_v42  ;;  %v1802_v17 = vadd.f32 %v6756_v60, %v6859_v15 }
 0x2e3   : > { %v5058_v53 = vpop.eup %5057  ;;  %v2403_v48 = vmul.f32 1.442695, %v2261_v21  ;;  %v2531_v30 = vmul.f32 1.442695, %v2325_v63  ;;  %v1797_v51 = vadd.f32 %v6758_v50, %v6859_v15  ;;  %v2262_v19 = vsub.f32 %v9028_v5, %v2198_v28  ;;  %v1071_v21 = vpop.f32.mrb[163].mxu0 }
 0x2e4   : > { %v5060_v9 = vpop.eup %5059  ;;  %v2326_v11 = vsub.f32 %v2134_v13, %v2198_v28  ;;  %v2135_v23 = vmul.f32 %v1066_v26, %v1064_v52  ;;  %4606 = vmatmul.mubr.f32.gmra.mrb[134].mxu1 %v2894_v55  ;;  %v7348_v10 = vmul.f32 %v5058_v53, %v6917_v16  ;;  %v1070_v60 = vadd.f32 %v1069_v6, %v6128_v37  ;;  %v9031_v13 = vld [vmem:[#allocation41_spill] sm:$0xff]  ;;  %v7356_v52 = vpop.f32.mrb[108].mxu1 }
 0x2e5   : > { %v7350_v32 = vpop.eup %5061  ;;  %5075 = vpow2.f32 %v2403_v48  ;;  %v7352_v42 = vmul.f32 %v5060_v9, %v1792_v49  ;;  %v2642_v63 = vadd.f32 %v5060_v9, %v5058_v53  ;;  %v2405_v1 = vmul.f32 1.442695, %v2262_v19  ;;  %v7364_v48 = vpop.f32.mrb[109].mxu1 }
 0x2e6   : > { %9029 = vst [vmem:[#allocation40_spill] sm:$0xff] %v7350_v32  ;;  %v5064_v50 = vpop.eup %5063  ;;  %5077 = vpow2.f32 %v2531_v30  ;;  %v2533_v5 = vmul.f32 1.442695, %v2326_v11  ;;  %v2199_v26 = vmax.f32 %v9031_v13, %v2135_v23  ;;  %v1072_v16 = vadd.f32 %v1071_v21, %v6132_v38  ;;  %v1075_v19 = vpop.f32.mrb[164].mxu0 }
 0x2e7   : > { %9030 = vst [vmem:[#allocation155_spill] sm:$0xff] %v7352_v42  ;;  %v5066_v28 = vpop.eup %5065  ;;  %v2895_v55 = vmul.f32 %v7350_v32, %v7299_v61  ;;  %5079 = vrcp.f32 %v2642_v63  ;;  %v7362_v49 = vmul.f32 %v5064_v50, %v6931_v36  ;;  %v1076_v61 = vadd.f32 %v1075_v19, %v6128_v37  ;;  %v1077_v21 = vpop.f32.mrb[165].mxu0 }
 0x2e8   : > { %5081 = vpow2.f32 %v2405_v1  ;;  %v2263_v53 = vsub.f32 %v9031_v13, %v2199_v26  ;;  %v2327_v30 = vsub.f32 %v2135_v23, %v2199_v26  ;;  %v7367_v9 = vmul.f32 %v5066_v28, %v1797_v51  ;;  %v9034_v13 = vld [vmem:[#allocation42_spill] sm:$0xff] }
 0x2e9   : > { %v7369_v11 = vpop.eup %5067  ;;  %5083 = vpow2.f32 %v2533_v5  ;;  %v2136_v6 = vmul.f32 %v1072_v16, %v1070_v60  ;;  %4608 = vmatprep.mubr.f32.mxu1 %v2895_v55  ;;  %v2643_v63 = vadd.f32 %v5066_v28, %v5064_v50  ;;  %v1078_v1 = vadd.f32 %v1077_v21, %v6132_v38  ;;  %v1081_v55 = vpop.f32.mrb[166].mxu0  ;;  %v9037_v21 = vld [vmem:[#allocation43_spill] sm:$0xff] }
 0x2ea   : > { %9032 = vst [vmem:[#allocation41_spill] sm:$0xff] %v7367_v9  ;;  %9033 = vst [vmem:[#allocation156_spill] sm:$0xff] %v7369_v11  ;;  %v5070_v36 = vpop.eup %5069  ;;  %v2407_v42 = vmul.f32 1.442695, %v2263_v53  ;;  %v2535_v20 = vmul.f32 1.442695, %v2327_v30  ;;  %v2896_v23 = vmul.f32 %v7369_v11, %v7311_v0  ;;  %v1807_v5 = vadd.f32 %v6774_v27, %v6859_v15 }
 0x2eb   : > { %v5072_v51 = vpop.eup %5071  ;;  %v2200_v26 = vmax.f32 %v9034_v13, %v2136_v6  ;;  %5085 = vrcp.f32 %v2643_v63  ;;  %v7379_v60 = vmul.f32 %v5070_v36, %v6927_v12  ;;  %v2137_v28 = vmul.f32 %v1078_v1, %v1076_v61  ;;  %v1083_v27 = vpop.f32.mrb[167].mxu0 }
 0x2ec   : > { %v7381_v16 = vpop.eup %5073  ;;  %5087 = vpow2.f32 %v2407_v42  ;;  %v7383_v50 = vmul.f32 %v5072_v51, %v1802_v17  ;;  %4609 = vmatmul.mubr.f32.gmra.mrb[136].mxu1 %v2896_v23  ;;  %v2644_v53 = vadd.f32 %v5072_v51, %v5070_v36  ;;  %v1082_v19 = vadd.f32 %v1081_v55, %v6128_v37  ;;  %v7391_v17 = vpop.f32.mrb[110].mxu1 }
 0x2ed   : > { %9035 = vst [vmem:[#allocation42_spill] sm:$0xff] %v7381_v16  ;;  %5089 = vpow2.f32 %v2535_v20  ;;  %v2264_v0 = vsub.f32 %v9034_v13, %v2200_v26  ;;  %v2328_v30 = vsub.f32 %v2136_v6, %v2200_v26  ;;  %v2201_v63 = vmax.f32 %v9037_v21, %v2137_v28  ;;  %v7397_v23 = vpop.f32.mrb[111].mxu1 }
 0x2ee   : > { %9036 = vst [vmem:[#allocation157_spill] sm:$0xff] %v7383_v50  ;;  %v1084_v12 = vadd.f32 %v1083_v27, %v6132_v38  ;;  %v2897_v42 = vmul.f32 %v7381_v16, %v7328_v41  ;;  %5091 = vrcp.f32 %v2644_v53  ;;  %v1812_v20 = vadd.f32 %v6772_v59, %v6859_v15  ;;  %v1087_v41 = vpop.f32.mrb[168].mxu0 }
 0x2ef   : > { %v5076_v61 = vpop.eup %5075  ;;  %v2409_v1 = vmul.f32 1.442695, %v2264_v0  ;;  %v2537_v36 = vmul.f32 1.442695, %v2328_v30  ;;  %v1817_v6 = vadd.f32 %v6790_v35, %v6859_v15  ;;  %v2265_v13 = vsub.f32 %v9037_v21, %v2201_v63  ;;  %v1089_v35 = vpop.f32.mrb[169].mxu0 }
 0x2f0   : > { %v5078_v51 = vpop.eup %5077  ;;  %v2329_v26 = vsub.f32 %v2137_v28, %v2201_v63  ;;  %v2138_v55 = vmul.f32 %v1084_v12, %v1082_v19  ;;  %4611 = vmatprep.mubr.f32.mxu1 %v2897_v42  ;;  %v7401_v53 = vmul.f32 %v5076_v61, %v6941_v22  ;;  %v1088_v59 = vadd.f32 %v1087_v41, %v6128_v37  ;;  %v9040_v28 = vld [vmem:[#allocation44_spill] sm:$0xff] }
 0x2f1   : > { %v7403_v0 = vpop.eup %5079  ;;  %5093 = vpow2.f32 %v2409_v1  ;;  %v7405_v30 = vmul.f32 %v5078_v51, %v1807_v5  ;;  %v2645_v27 = vadd.f32 %v5078_v51, %v5076_v61  ;;  %v2411_v9 = vmul.f32 1.442695, %v2265_v13 }
 0x2f2   : > { %9038 = vst [vmem:[#allocation43_spill] sm:$0xff] %v7403_v0  ;;  %v5082_v50 = vpop.eup %5081  ;;  %5095 = vpow2.f32 %v2537_v36  ;;  %v2539_v21 = vmul.f32 1.442695, %v2329_v26  ;;  %v2202_v19 = vmax.f32 %v9040_v28, %v2138_v55  ;;  %v1090_v12 = vadd.f32 %v1089_v35, %v6132_v38  ;;  %v1093_v36 = vpop.f32.mrb[170].mxu0 }
 0x2f3   : > { %9039 = vst [vmem:[#allocation158_spill] sm:$0xff] %v7405_v30  ;;  %v5084_v63 = vpop.eup %5083  ;;  %v2898_v22 = vmul.f32 %v7403_v0, %v7348_v10  ;;  %5097 = vrcp.f32 %v2645_v27  ;;  %v7413_v5 = vmul.f32 %v5082_v50, %v6935_v3  ;;  %v1094_v26 = vadd.f32 %v1093_v36, %v6128_v37  ;;  %v1095_v41 = vpop.f32.mrb[171].mxu0 }
 0x2f4   : > { %5099 = vpow2.f32 %v2411_v9  ;;  %v7415_v42 = vmul.f32 %v5084_v63, %v1812_v20  ;;  %v2266_v61 = vsub.f32 %v9040_v28, %v2202_v19  ;;  %v2330_v1 = vsub.f32 %v2138_v55, %v2202_v19  ;;  %v7424_v28 = vpop.f32.mrb[112].mxu1  ;;  %v9043_v19 = vld [vmem:[#allocation45_spill] sm:$0xff] }
 0x2f5   : > { %v7418_v51 = vpop.eup %5085  ;;  %5101 = vpow2.f32 %v2539_v21  ;;  %v2139_v13 = vmul.f32 %v1090_v12, %v1088_v59  ;;  %4612 = vmatmul.mubr.f32.gmra.mrb[138].mxu1 %v2898_v22  ;;  %v2646_v10 = vadd.f32 %v5084_v63, %v5082_v50  ;;  %v1096_v9 = vadd.f32 %v1095_v41, %v6132_v38  ;;  %v7432_v50 = vpop.f32.mrb[113].mxu1 }
 0x2f6   : > { %9041 = vst [vmem:[#allocation44_spill] sm:$0xff] %v7415_v42  ;;  %9042 = vst [vmem:[#allocation159_spill] sm:$0xff] %v7418_v51  ;;  %v5088_v35 = vpop.eup %5087  ;;  %v2413_v27 = vmul.f32 1.442695, %v2266_v61  ;;  %v2541_v3 = vmul.f32 1.442695, %v2330_v1  ;;  %v2899_v20 = vmul.f32 %v7418_v51, %v7362_v49  ;;  %v1822_v59 = vadd.f32 %v6788_v47, %v6859_v15 }
 0x2f7   : > { %v5090_v55 = vpop.eup %5089  ;;  %v2203_v42 = vmax.f32 %v9043_v19, %v2139_v13  ;;  %5103 = vrcp.f32 %v2646_v10  ;;  %v7430_v21 = vmul.f32 %v5088_v35, %v6949_v4  ;;  %v2140_v49 = vmul.f32 %v1096_v9, %v1094_v26  ;;  %v1099_v22 = vpop.f32.mrb[172].mxu0  ;;  %v9046_v4 = vld [vmem:[#allocation46_spill] sm:$0xff] }
 0x2f8   : > { %v7434_v63 = vpop.eup %5091  ;;  %5105 = vpow2.f32 %v2413_v27  ;;  %v7436_v12 = vmul.f32 %v5090_v55, %v1817_v6  ;;  %4614 = vmatprep.mubr.f32.mxu1 %v2899_v20  ;;  %v2647_v61 = vadd.f32 %v5090_v55, %v5088_v35  ;;  %v1100_v47 = vadd.f32 %v1099_v22, %v6128_v37  ;;  %v1101_v41 = vpop.f32.mrb[173].mxu0  ;;  %v9047_v22 = vld [vmem:[#allocation49_spill] sm:$0xff] }
 0x2f9   : > { %9044 = vst [vmem:[#allocation45_spill] sm:$0xff] %v7434_v63  ;;  %5107 = vpow2.f32 %v2541_v3  ;;  %v2267_v1 = vsub.f32 %v9043_v19, %v2203_v42  ;;  %v2331_v36 = vsub.f32 %v2139_v13, %v2203_v42  ;;  %v2204_v10 = vmax.f32 %v9046_v4, %v2140_v49  ;;  %v1105_v19 = vpop.f32.mrb[174].mxu0 }
 0x2fa   : > { %9045 = vst [vmem:[#allocation160_spill] sm:$0xff] %v7436_v12  ;;  %v1102_v30 = vadd.f32 %v1101_v41, %v6132_v38  ;;  %v2900_v27 = vmul.f32 %v7434_v63, %v7379_v60  ;;  %5109 = vrcp.f32 %v2647_v61  ;;  %v1832_v35 = vadd.f32 %v6804_v39, %v6859_v15 }
 0x2fb   : > { %v5094_v6 = vpop.eup %5093  ;;  %v2415_v26 = vmul.f32 1.442695, %v2267_v1  ;;  %v2543_v9 = vmul.f32 1.442695, %v2331_v36  ;;  %v1827_v42 = vadd.f32 %v6806_v44, %v6859_v15  ;;  %v2268_v3 = vsub.f32 %v9046_v4, %v2204_v10  ;;  %v1107_v1 = vpop.f32.mrb[175].mxu0 }
 0x2fc   : > { %v5096_v13 = vpop.eup %5095  ;;  %v2332_v20 = vsub.f32 %v2140_v49, %v2204_v10  ;;  %v2141_v55 = vmul.f32 %v1102_v30, %v1100_v47  ;;  %4615 = vmatmul.mubr.f32.gmra.mrb[140].mxu1 %v2900_v27  ;;  %v7450_v41 = vmul.f32 %v5094_v6, %v9047_v22  ;;  %v1106_v39 = vadd.f32 %v1105_v19, %v6128_v37  ;;  %v9050_v49 = vld [vmem:[#allocation47_spill] sm:$0xff]  ;;  %v7458_v47 = vpop.f32.mrb[114].mxu1 }
 0x2fd   : > { %v7452_v60 = vpop.eup %5097  ;;  %5111 = vpow2.f32 %v2415_v26  ;;  %v7454_v61 = vmul.f32 %v5096_v13, %v1822_v59  ;;  %v2648_v36 = vadd.f32 %v5096_v13, %v5094_v6  ;;  %v2417_v12 = vmul.f32 1.442695, %v2268_v3  ;;  %v9051_v59 = vld [vmem:[#allocation51_spill] sm:$0xff]  ;;  %v7466_v19 = vpop.f32.mrb[115].mxu1 }
 0x2fe   : > { %9048 = vst [vmem:[#allocation46_spill] sm:$0xff] %v7452_v60  ;;  %v5100_v44 = vpop.eup %5099  ;;  %5113 = vpow2.f32 %v2543_v9  ;;  %v2545_v4 = vmul.f32 1.442695, %v2332_v20  ;;  %v2205_v30 = vmax.f32 %v9050_v49, %v2141_v55  ;;  %v1108_v27 = vadd.f32 %v1107_v1, %v6132_v38  ;;  %v1111_v3 = vpop.f32.mrb[176].mxu0 }
 0x2ff   : > { %9049 = vst [vmem:[#allocation49_spill] sm:$0xff] %v7454_v61  ;;  %v5102_v10 = vpop.eup %5101  ;;  %v2901_v26 = vmul.f32 %v7452_v60, %v7401_v53  ;;  %5115 = vrcp.f32 %v2648_v36  ;;  %v7464_v22 = vmul.f32 %v5100_v44, %v9051_v59  ;;  %v1112_v53 = vadd.f32 %v1111_v3, %v6128_v37  ;;  %v1113_v36 = vpop.f32.mrb[177].mxu0 }
 0x300   : > { %5117 = vpow2.f32 %v2417_v12  ;;  %v2269_v6 = vsub.f32 %v9050_v49, %v2205_v30  ;;  %v2333_v9 = vsub.f32 %v2141_v55, %v2205_v30  ;;  %v7469_v13 = vmul.f32 %v5102_v10, %v1827_v42  ;;  %v9054_v49 = vld [vmem:[#allocation48_spill] sm:$0xff] }
 0x301   : > { %v7471_v20 = vpop.eup %5103  ;;  %5119 = vpow2.f32 %v2545_v4  ;;  %v2142_v1 = vmul.f32 %v1108_v27, %v1106_v39  ;;  %4617 = vmatprep.mubr.f32.mxu1 %v2901_v26  ;;  %v2649_v61 = vadd.f32 %v5102_v10, %v5100_v44  ;;  %v1114_v12 = vadd.f32 %v1113_v36, %v6132_v38  ;;  %v9056_v39 = vld [vmem:[#allocation50_spill] sm:$0xff] }
 0x302   : > { %9052 = vst [vmem:[#allocation47_spill] sm:$0xff] %v7469_v13  ;;  %9053 = vst [vmem:[#allocation51_spill] sm:$0xff] %v7471_v20  ;;  %v5106_v59 = vpop.eup %5105  ;;  %v2419_v60 = vmul.f32 1.442695, %v2269_v6  ;;  %v2547_v63 = vmul.f32 1.442695, %v2333_v9  ;;  %v2902_v55 = vmul.f32 %v7471_v20, %v7413_v5 }
 0x303   : > { %v5108_v42 = vpop.eup %5107  ;;  %v2206_v30 = vmax.f32 %v9054_v49, %v2142_v1  ;;  %v9055_v13 = vld [vmem:[#allocation138_spill] sm:$0xff]  ;;  %5121 = vrcp.f32 %v2649_v61  ;;  %v7481_v27 = vmul.f32 %v5106_v59, %v9056_v39  ;;  %v2143_v10 = vmul.f32 %v1114_v12, %v1112_v53  ;;  %v1117_v6 = vpop.f32.mrb[178].mxu0  ;;  %v9059_v61 = vld [vmem:[#allocation52_spill] sm:$0xff] }
 0x304   : > { %v1837_v4 = vadd.f32 %v9055_v13, %v6859_v15  ;;  %v7483_v26 = vpop.eup %5109  ;;  %5123 = vpow2.f32 %v2419_v60  ;;  %v7485_v44 = vmul.f32 %v5108_v42, %v1832_v35  ;;  %4618 = vmatmul.mubr.f32.gmra.mrb[142].mxu1 %v2902_v55  ;;  %v2650_v9 = vadd.f32 %v5108_v42, %v5106_v59  ;;  %v1119_v13 = vpop.f32.mrb[179].mxu0 }
 0x305   : > { %9057 = vst [vmem:[#allocation48_spill] sm:$0xff] %v7483_v26  ;;  %5125 = vpow2.f32 %v2547_v63  ;;  %v2270_v5 = vsub.f32 %v9054_v49, %v2206_v30  ;;  %v2334_v3 = vsub.f32 %v2142_v1, %v2206_v30  ;;  %v1118_v36 = vadd.f32 %v1117_v6, %v6128_v37  ;;  %v7493_v35 = vpop.f32.mrb[116].mxu1  ;;  %v9060_v63 = vld [vmem:[#allocation137_spill] sm:$0xff]  ;;  %v9061_v1 = vld [vmem:[#allocation142_spill] sm:$0xff] }
 0x306   : > { %9058 = vst [vmem:[#allocation138_spill] sm:$0xff] %v7485_v44  ;;  %v2207_v20 = vmax.f32 %v9059_v61, %v2143_v10  ;;  %v1120_v39 = vadd.f32 %v1119_v13, %v6132_v38  ;;  %v2903_v60 = vmul.f32 %v7483_v26, %v7430_v21  ;;  %5127 = vrcp.f32 %v2650_v9  ;;  %v7499_v49 = vpop.f32.mrb[117].mxu1  ;;  %v1123_v21 = vpop.f32.mrb[180].mxu0  ;;  %v9062_v9 = vld [vmem:[#allocation54_spill] sm:$0xff] }
 0x307   : > { %v5112_v53 = vpop.eup %5111  ;;  %v2421_v12 = vmul.f32 1.442695, %v2270_v5  ;;  %v2549_v59 = vmul.f32 1.442695, %v2334_v3  ;;  %v1842_v55 = vadd.f32 %v9060_v63, %v6859_v15  ;;  %v1847_v42 = vadd.f32 %v9061_v1, %v6859_v15  ;;  %v1125_v1 = vpop.f32.mrb[181].mxu0 }
 0x308   : > { %v5114_v30 = vpop.eup %5113  ;;  %v2271_v6 = vsub.f32 %v9059_v61, %v2207_v20  ;;  %v2335_v13 = vsub.f32 %v2143_v10, %v2207_v20  ;;  %v2144_v44 = vmul.f32 %v1120_v39, %v1118_v36  ;;  %4620 = vmatprep.mubr.f32.mxu1 %v2903_v60  ;;  %v7503_v26 = vmul.f32 %v5112_v53, %v9062_v9  ;;  %v9065_v20 = vld [vmem:[#allocation55_spill] sm:$0xff] }
 0x309   : > { %v7505_v5 = vpop.eup %5115  ;;  %5129 = vpow2.f32 %v2421_v12  ;;  %v7507_v3 = vmul.f32 %v5114_v30, %v1837_v4  ;;  %v1124_v63 = vadd.f32 %v1123_v21, %v6128_v37  ;;  %v2651_v51 = vadd.f32 %v5114_v30, %v5112_v53  ;;  %v9066_v12 = vld [vmem:[#allocation53_spill] sm:$0xff]  ;;  %v1129_v30 = vpop.f32.mrb[182].mxu0 }
 0x30a   : > { %9063 = vst [vmem:[#allocation50_spill] sm:$0xff] %v7505_v5  ;;  %v5118_v0 = vpop.eup %5117  ;;  %5131 = vpow2.f32 %v2549_v59  ;;  %v2423_v16 = vmul.f32 1.442695, %v2271_v6  ;;  %v2551_v61 = vmul.f32 1.442695, %v2335_v13  ;;  %v2208_v10 = vmax.f32 %v9065_v20, %v2144_v44 }
 0x30b   : > { %9064 = vst [vmem:[#allocation52_spill] sm:$0xff] %v7507_v3  ;;  %v5120_v36 = vpop.eup %5119  ;;  %v1126_v39 = vadd.f32 %v1125_v1, %v6132_v38  ;;  %v2904_v60 = vmul.f32 %v7505_v5, %v7450_v41  ;;  %5133 = vrcp.f32 %v2651_v51  ;;  %v7515_v4 = vmul.f32 %v5118_v0, %v9066_v12  ;;  %v1131_v1 = vpop.f32.mrb[183].mxu0 }
 0x30c   : > { %5135 = vpow2.f32 %v2423_v16  ;;  %v7517_v21 = vmul.f32 %v5120_v36, %v1842_v55  ;;  %v2272_v53 = vsub.f32 %v9065_v20, %v2208_v10  ;;  %v2336_v59 = vsub.f32 %v2144_v44, %v2208_v10  ;;  %v7526_v20 = vpop.f32.mrb[118].mxu1  ;;  %v9069_v10 = vld [vmem:[#allocation59_spill] sm:$0xff] }
 0x30d   : > { %v7520_v6 = vpop.eup %5121  ;;  %5137 = vpow2.f32 %v2551_v61  ;;  %v2145_v13 = vmul.f32 %v1126_v39, %v1124_v63  ;;  %4621 = vmatmul.mubr.f32.gmra.mrb[144].mxu1 %v2904_v60  ;;  %v1130_v9 = vadd.f32 %v1129_v30, %v6128_v37  ;;  %v2652_v41 = vadd.f32 %v5120_v36, %v5118_v0  ;;  %v9070_v63 = vld [vmem:[#allocation141_spill] sm:$0xff]  ;;  %v7534_v0 = vpop.f32.mrb[119].mxu1 }
 0x30e   : > { %9067 = vst [vmem:[#allocation137_spill] sm:$0xff] %v7517_v21  ;;  %9068 = vst [vmem:[#allocation142_spill] sm:$0xff] %v7520_v6  ;;  %v5124_v51 = vpop.eup %5123  ;;  %v2425_v3 = vmul.f32 1.442695, %v2272_v53  ;;  %v2553_v12 = vmul.f32 1.442695, %v2336_v59  ;;  %v1132_v16 = vadd.f32 %v1131_v1, %v6132_v38  ;;  %v2905_v55 = vmul.f32 %v7520_v6, %v7464_v22 }
 0x30f   : > { %v5126_v44 = vpop.eup %5125  ;;  %v2209_v21 = vmax.f32 %v9069_v10, %v2145_v13  ;;  %v1852_v61 = vadd.f32 %v9070_v63, %v6859_v15  ;;  %5139 = vrcp.f32 %v2652_v41  ;;  %v9071_v39 = vld [vmem:[#allocation57_spill] sm:$0xff]  ;;  %v1135_v59 = vpop.f32.mrb[184].mxu0 }
 0x310   : > { %v7532_v60 = vmul.f32 %v5124_v51, %v9071_v39  ;;  %v7536_v36 = vpop.eup %5127  ;;  %5141 = vpow2.f32 %v2425_v3  ;;  %v7538_v53 = vmul.f32 %v5126_v44, %v1847_v42  ;;  %v2146_v22 = vmul.f32 %v1132_v16, %v1130_v9  ;;  %4623 = vmatprep.mubr.f32.mxu1 %v2905_v55  ;;  %v1137_v63 = vpop.f32.mrb[185].mxu0  ;;  %v9074_v39 = vld [vmem:[#allocation64_spill] sm:$0xff]  ;;  %v9076_v55 = vld [vmem:[#allocation146_spill] sm:$0xff] }
 0x311   : > { %9072 = vst [vmem:[#allocation54_spill] sm:$0xff] %v7536_v36  ;;  %v2653_v30 = vadd.f32 %v5126_v44, %v5124_v51  ;;  %5143 = vpow2.f32 %v2553_v12  ;;  %v2273_v1 = vsub.f32 %v9069_v10, %v2209_v21  ;;  %v2337_v6 = vsub.f32 %v2145_v13, %v2209_v21  ;;  %v9075_v51 = vld [vmem:[#allocation145_spill] sm:$0xff] }
 0x312   : > { %9073 = vst [vmem:[#allocation55_spill] sm:$0xff] %v7538_v53  ;;  %v1136_v41 = vadd.f32 %v1135_v59, %v6128_v37  ;;  %v2210_v5 = vmax.f32 %v9074_v39, %v2146_v22  ;;  %v1138_v11 = vadd.f32 %v1137_v63, %v6132_v38  ;;  %v2906_v3 = vmul.f32 %v7536_v36, %v7481_v27  ;;  %v1141_v63 = vpop.f32.mrb[186].mxu0  ;;  %v9077_v53 = vld [vmem:[#allocation56_spill] sm:$0xff] }
 0x313   : > { %5145 = vrcp.f32 %v2653_v30  ;;  %v5130_v42 = vpop.eup %5129  ;;  %v2427_v9 = vmul.f32 1.442695, %v2273_v1  ;;  %v2555_v16 = vmul.f32 1.442695, %v2337_v6  ;;  %v1862_v12 = vadd.f32 %v9075_v51, %v6859_v15  ;;  %v1143_v1 = vpop.f32.mrb[187].mxu0 }
 0x314   : > { %v1857_v21 = vadd.f32 %v9076_v55, %v6859_v15  ;;  %v5132_v13 = vpop.eup %5131  ;;  %v2274_v44 = vsub.f32 %v9074_v39, %v2210_v5  ;;  %v2338_v10 = vsub.f32 %v2146_v22, %v2210_v5  ;;  %v2147_v59 = vmul.f32 %v1138_v11, %v1136_v41  ;;  %4624 = vmatmul.mubr.f32.gmra.mrb[146].mxu1 %v2906_v3  ;;  %v9080_v5 = vld [vmem:[#allocation69_spill] sm:$0xff]  ;;  %v7560_v22 = vpop.f32.mrb[120].mxu1 }
 0x315   : > { %v7552_v32 = vmul.f32 %v5130_v42, %v9077_v53  ;;  %v7554_v27 = vpop.eup %5133  ;;  %5147 = vpow2.f32 %v2427_v9  ;;  %v7556_v6 = vmul.f32 %v5132_v13, %v1852_v61  ;;  %v1142_v30 = vadd.f32 %v1141_v63, %v6128_v37  ;;  %v9081_v61 = vld [vmem:[#allocation60_spill] sm:$0xff]  ;;  %v7568_v63 = vpop.f32.mrb[121].mxu1 }
 0x316   : > { %9078 = vst [vmem:[#allocation53_spill] sm:$0xff] %v7554_v27  ;;  %v2654_v51 = vadd.f32 %v5132_v13, %v5130_v42  ;;  %v5136_v55 = vpop.eup %5135  ;;  %5149 = vpow2.f32 %v2555_v16  ;;  %v2429_v36 = vmul.f32 1.442695, %v2274_v44  ;;  %v2557_v39 = vmul.f32 1.442695, %v2338_v10  ;;  %v1147_v44 = vpop.f32.mrb[188].mxu0 }
 0x317   : > { %9079 = vst [vmem:[#allocation59_spill] sm:$0xff] %v7556_v6  ;;  %v2211_v11 = vmax.f32 %v9080_v5, %v2147_v59  ;;  %v5138_v41 = vpop.eup %5137  ;;  %v1144_v53 = vadd.f32 %v1143_v1, %v6132_v38  ;;  %v2907_v3 = vmul.f32 %v7554_v27, %v7503_v26  ;;  %v7566_v9 = vmul.f32 %v5136_v55, %v9081_v61 }
 0x318   : > { %5151 = vrcp.f32 %v2654_v51  ;;  %v7571_v13 = vmul.f32 %v5138_v41, %v1857_v21  ;;  %v1148_v26 = vadd.f32 %v1147_v44, %v6128_v37  ;;  %v1149_v51 = vpop.f32.mrb[189].mxu0  ;;  %v2655_v6 = vadd.f32 %v5138_v41, %v5136_v55  ;;  %v7579_v21 = vpop.f32.mrb[122].mxu1 }
 0x319   : > { %5153 = vpow2.f32 %v2429_v36  ;;  %v2275_v42 = vsub.f32 %v9080_v5, %v2211_v11  ;;  %v2339_v16 = vsub.f32 %v2147_v59, %v2211_v11  ;;  %v7573_v10 = vpop.eup %5139  ;;  %v2148_v1 = vmul.f32 %v1144_v53, %v1142_v30  ;;  %4626 = vmatprep.mubr.f32.mxu1 %v2907_v3  ;;  %v9084_v11 = vld [vmem:[#allocation74_spill] sm:$0xff]  ;;  %v7587_v55 = vpop.f32.mrb[123].mxu1 }
 0x31a   : > { %9082 = vst [vmem:[#allocation141_spill] sm:$0xff] %v7571_v13  ;;  %9083 = vst [vmem:[#allocation57_spill] sm:$0xff] %v7573_v10  ;;  %5155 = vpow2.f32 %v2557_v39  ;;  %v5142_v61 = vpop.eup %5141  ;;  %v1150_v36 = vadd.f32 %v1149_v51, %v6132_v38  ;;  %v2908_v59 = vmul.f32 %v7573_v10, %v7515_v4  ;;  %v9085_v30 = vld [vmem:[#allocation150_spill] sm:$0xff]  ;;  %v7593_v51 = vpop.f32.mrb[124].mxu1 }
 0x31b   : > { %v2431_v27 = vmul.f32 1.442695, %v2275_v42  ;;  %v2559_v14 = vmul.f32 1.442695, %v2339_v16  ;;  %v5144_v5 = vpop.eup %5143  ;;  %v2212_v13 = vmax.f32 %v9084_v11, %v2148_v1  ;;  %v1867_v39 = vadd.f32 %v9085_v30, %v6859_v15  ;;  %v9086_v53 = vld [vmem:[#allocation58_spill] sm:$0xff]  ;;  %v1153_v16 = vpop.f32.mrb[190].mxu0 }
 0x31c   : > { %5157 = vrcp.f32 %v2655_v6  ;;  %v7585_v3 = vmul.f32 %v5142_v61, %v9086_v53  ;;  %v7591_v42 = vmul.f32 %v5144_v5, %v1862_v12  ;;  %v2149_v4 = vmul.f32 %v1150_v36, %v1148_v26  ;;  %4627 = vmatmul.mubr.f32.gmra.mrb[148].mxu1 %v2908_v59  ;;  %v1155_v10 = vpop.f32.mrb[191].mxu0  ;;  %v7597_v43 = vpop.f32.mrb[125].mxu1  ;;  %v9091_v59 = vld [vmem:[#allocation152_spill] sm:$0xff] }
 0x31d   : > { %v7589_v41 = vpop.eup %5145  ;;  %5159 = vpow2.f32 %v2431_v27  ;;  %v2656_v44 = vadd.f32 %v5144_v5, %v5142_v61  ;;  %v2276_v30 = vsub.f32 %v9084_v11, %v2212_v13  ;;  %v2340_v6 = vsub.f32 %v2148_v1, %v2212_v13  ;;  %v7603_v26 = vpop.f32.mrb[126].mxu1  ;;  %v9090_v13 = vld [vmem:[#allocation149_spill] sm:$0xff] }
 0x31e   : > { %9087 = vst [vmem:[#allocation64_spill] sm:$0xff] %v7589_v41  ;;  %9088 = vst [vmem:[#allocation145_spill] sm:$0xff] %v7591_v42  ;;  %5161 = vpow2.f32 %v2559_v14  ;;  %v1154_v53 = vadd.f32 %v1153_v16, %v6128_v37  ;;  %v2213_v18 = vmax.f32 %v9089_v31, %v2149_v4  ;;  %v1156_v12 = vadd.f32 %v1155_v10, %v6132_v38  ;;  %v7609_v11 = vpop.f32.mrb[127].mxu1 }
 0x31f   : > { %v2909_v27 = vmul.f32 %v7589_v41, %v7532_v60  ;;  %5163 = vrcp.f32 %v2656_v44  ;;  %v5148_v61 = vpop.eup %5147  ;;  %v2433_v14 = vmul.f32 1.442695, %v2276_v30  ;;  %v2561_v36 = vmul.f32 1.442695, %v2340_v6  ;;  %v1159_v60 = vpop.f32.mrb[192].mxu0  ;;  %v9092_v44 = vld [vmem:[#allocation62_spill] sm:$0xff] }
 0x320   : > { %v1872_v1 = vadd.f32 %v9090_v13, %v6859_v15  ;;  %v1877_v5 = vadd.f32 %v9091_v59, %v6859_v15  ;;  %v5150_v16 = vpop.eup %5149  ;;  %v2277_v10 = vsub.f32 %v9089_v31, %v2213_v18  ;;  %v2341_v42 = vsub.f32 %v2149_v4, %v2213_v18  ;;  %v1161_v59 = vpop.f32.mrb[193].mxu0  ;;  %v9095_v18 = vld [vmem:[#allocation84_spill] sm:$0xff] }
 0x321   : > { %v2150_v8 = vmul.f32 %v1156_v12, %v1154_v53  ;;  %4629 = vmatprep.mubr.f32.mxu1 %v2909_v27  ;;  %v7613_v41 = vmul.f32 %v5148_v61, %v9092_v44  ;;  %5165 = vpow2.f32 %v2433_v14  ;;  %v7617_v6 = vmul.f32 %v5150_v16, %v1867_v39  ;;  %v9096_v14 = vld [vmem:[#allocation61_spill] sm:$0xff] }
 0x322   : > { %v7615_v30 = vpop.eup %5151  ;;  %v1160_v13 = vadd.f32 %v1159_v60, %v6128_v37  ;;  %v2657_v25 = vadd.f32 %v5150_v16, %v5148_v61  ;;  %5167 = vpow2.f32 %v2561_v36  ;;  %v2435_v45 = vmul.f32 1.442695, %v2277_v10  ;;  %v1165_v16 = vpop.f32.mrb[194].mxu0 }
 0x323   : > { %9093 = vst [vmem:[#allocation146_spill] sm:$0xff] %v7615_v30  ;;  %9094 = vst [vmem:[#allocation56_spill] sm:$0xff] %v7617_v6  ;;  %v5154_v46 = vpop.eup %5153  ;;  %v2563_v31 = vmul.f32 1.442695, %v2341_v42  ;;  %v2214_v4 = vmax.f32 %v9095_v18, %v2150_v8  ;;  %v1162_v12 = vadd.f32 %v1161_v59, %v6132_v38  ;;  %v2910_v27 = vmul.f32 %v7615_v30, %v7552_v32  ;;  %v1167_v59 = vpop.f32.mrb[195].mxu0 }
 0x324   : > { %v5156_v53 = vpop.eup %5155  ;;  %5169 = vrcp.f32 %v2657_v25  ;;  %v7625_v39 = vmul.f32 %v5154_v46, %v9096_v14  ;;  %v1166_v44 = vadd.f32 %v1165_v16, %v6128_v37 }
 0x325   : > { %5171 = vpow2.f32 %v2435_v45  ;;  %v7627_v60 = vmul.f32 %v5156_v53, %v1872_v1  ;;  %v2278_v61 = vsub.f32 %v9095_v18, %v2214_v4  ;;  %v2342_v36 = vsub.f32 %v2150_v8, %v2214_v4  ;;  %4630 = vmatmul.mubr.f32.gmra.mrb[150].mxu1 %v2910_v27  ;;  %v9099_v8 = vld [vmem:[#allocation88_spill] sm:$0xff] }
 0x326   : > { %v7630_v42 = vpop.eup %5157  ;;  %5173 = vpow2.f32 %v2563_v31  ;;  %v2151_v10 = vmul.f32 %v1162_v12, %v1160_v13  ;;  %v2658_v32 = vadd.f32 %v5156_v53, %v5154_v46  ;;  %v1168_v45 = vadd.f32 %v1167_v59, %v6132_v38  ;;  %v9101_v13 = vld [vmem:[#allocation65_spill] sm:$0xff] }
 0x327   : > { %9097 = vst [vmem:[#allocation69_spill] sm:$0xff] %v7627_v60  ;;  %9098 = vst [vmem:[#allocation60_spill] sm:$0xff] %v7630_v42  ;;  %v5160_v25 = vpop.eup %5159  ;;  %v2437_v6 = vmul.f32 1.442695, %v2278_v61  ;;  %v2565_v14 = vmul.f32 1.442695, %v2342_v36  ;;  %v2911_v1 = vmul.f32 %v7630_v42, %v7566_v9 }
 0x328   : > { %v5162_v18 = vpop.eup %5161  ;;  %v2215_v4 = vmax.f32 %v9099_v8, %v2151_v10  ;;  %v9100_v60 = vld [vmem:[#allocation25_spill] sm:$0xff]  ;;  %5175 = vrcp.f32 %v2658_v32  ;;  %v7640_v12 = vmul.f32 %v5160_v25, %v9101_v13  ;;  %v2152_v53 = vmul.f32 %v1168_v45, %v1166_v44  ;;  %v1171_v61 = vpop.f32.mrb[196].mxu0 }
 0x329   : > { %v1882_v31 = vadd.f32 %v9100_v60, %v6859_v15  ;;  %v7642_v27 = vpop.eup %5163  ;;  %5177 = vpow2.f32 %v2437_v6  ;;  %v7644_v46 = vmul.f32 %v5162_v18, %v1877_v5  ;;  %4632 = vmatprep.mubr.f32.mxu1 %v2911_v1  ;;  %v2659_v36 = vadd.f32 %v5162_v18, %v5160_v25  ;;  %v1173_v60 = vpop.f32.mrb[197].mxu0  ;;  %v9104_v32 = vld [vmem:[#allocation93_spill] sm:$0xff] }
 0x32a   : > { %9102 = vst [vmem:[#allocation74_spill] sm:$0xff] %v7642_v27  ;;  %5179 = vpow2.f32 %v2565_v14  ;;  %v2279_v9 = vsub.f32 %v9099_v8, %v2215_v4  ;;  %v2343_v16 = vsub.f32 %v2151_v10, %v2215_v4  ;;  %v1172_v59 = vadd.f32 %v1171_v61, %v6128_v37  ;;  %v9105_v25 = vld [vmem:[#allocation81_spill] sm:$0xff] }
 0x32b   : > { %9103 = vst [vmem:[#allocation150_spill] sm:$0xff] %v7644_v46  ;;  %v2216_v42 = vmax.f32 %v9104_v32, %v2152_v53  ;;  %v1174_v13 = vadd.f32 %v1173_v60, %v6132_v38  ;;  %v2912_v6 = vmul.f32 %v7642_v27, %v7585_v3  ;;  %5181 = vrcp.f32 %v2659_v36  ;;  %v5166_v5 = vpop.eup %5165  ;;  %v9106_v1 = vld [vmem:[#allocation85_spill] sm:$0xff]  ;;  %v1177_v60 = vpop.f32.mrb[198].mxu0  ;;  %v9107_v46 = vld [vmem:[#allocation63_spill] sm:$0xff] }
 0x32c   : > { %v2439_v44 = vmul.f32 1.442695, %v2279_v9  ;;  %v2567_v45 = vmul.f32 1.442695, %v2343_v16  ;;  %v1892_v14 = vadd.f32 %v9105_v25, %v6859_v15  ;;  %v1887_v10 = vadd.f32 %v9106_v1, %v6859_v15  ;;  %v5168_v18 = vpop.eup %5167  ;;  %v1179_v16 = vpop.f32.mrb[199].mxu0 }
 0x32d   : > { %v2280_v8 = vsub.f32 %v9104_v32, %v2216_v42  ;;  %v2344_v4 = vsub.f32 %v2152_v53, %v2216_v42  ;;  %v2153_v61 = vmul.f32 %v1174_v13, %v1172_v59  ;;  %4633 = vmatmul.mubr.f32.gmra.mrb[152].mxu1 %v2912_v6  ;;  %v7658_v30 = vmul.f32 %v5166_v5, %v9107_v46  ;;  %v9110_v42 = vld [vmem:[#allocation99_spill] sm:$0xff] }
 0x32e   : > { %v7660_v3 = vpop.eup %5169  ;;  %5183 = vpow2.f32 %v2439_v44  ;;  %v7662_v36 = vmul.f32 %v5168_v18, %v1882_v31  ;;  %v1178_v9 = vadd.f32 %v1177_v60, %v6128_v37  ;;  %v2660_v25 = vadd.f32 %v5168_v18, %v5166_v5  ;;  %v9111_v6 = vld [vmem:[#allocation67_spill] sm:$0xff] }
 0x32f   : > { %9108 = vst [vmem:[#allocation58_spill] sm:$0xff] %v7660_v3  ;;  %v5172_v1 = vpop.eup %5171  ;;  %5185 = vpow2.f32 %v2567_v45  ;;  %v2441_v27 = vmul.f32 1.442695, %v2280_v8  ;;  %v2569_v32 = vmul.f32 1.442695, %v2344_v4  ;;  %v2217_v53 = vmax.f32 %v9110_v42, %v2153_v61  ;;  %v1183_v45 = vpop.f32.mrb[200].mxu0 }
 0x330   : > { %9109 = vst [vmem:[#allocation79_spill] sm:$0xff] %v7662_v36  ;;  %v5174_v59 = vpop.eup %5173  ;;  %v1180_v13 = vadd.f32 %v1179_v16, %v6132_v38  ;;  %v2913_v46 = vmul.f32 %v7660_v3, %v7613_v41  ;;  %5187 = vrcp.f32 %v2660_v25  ;;  %v7670_v31 = vmul.f32 %v5172_v1, %v9111_v6  ;;  %v1185_v16 = vpop.f32.mrb[201].mxu0 }
 0x331   : > { %5189 = vpow2.f32 %v2441_v27  ;;  %v2281_v44 = vsub.f32 %v9110_v42, %v2217_v53  ;;  %v2345_v5 = vsub.f32 %v2153_v61, %v2217_v53  ;;  %v7673_v18 = vmul.f32 %v5174_v59, %v1887_v10  ;;  %v9114_v42 = vld [vmem:[#allocation105_spill] sm:$0xff] }
 0x332   : > { %v7675_v8 = vpop.eup %5175  ;;  %5191 = vpow2.f32 %v2569_v32  ;;  %v2154_v4 = vmul.f32 %v1180_v13, %v1178_v9  ;;  %4635 = vmatprep.mubr.f32.mxu1 %v2913_v46  ;;  %v1184_v60 = vadd.f32 %v1183_v45, %v6128_v37  ;;  %v2661_v41 = vadd.f32 %v5174_v59, %v5172_v1  ;;  %v9116_v9 = vld [vmem:[#allocation66_spill] sm:$0xff] }
 0x333   : > { %9112 = vst [vmem:[#allocation149_spill] sm:$0xff] %v7673_v18  ;;  %9113 = vst [vmem:[#allocation152_spill] sm:$0xff] %v7675_v8  ;;  %v5178_v25 = vpop.eup %5177  ;;  %v2443_v36 = vmul.f32 1.442695, %v2281_v44  ;;  %v2571_v6 = vmul.f32 1.442695, %v2345_v5  ;;  %v1186_v27 = vadd.f32 %v1185_v16, %v6132_v38  ;;  %v2914_v61 = vmul.f32 %v7675_v8, %v7625_v39 }
 0x334   : > { %v5180_v10 = vpop.eup %5179  ;;  %v2218_v53 = vmax.f32 %v9114_v42, %v2154_v4  ;;  %v9115_v18 = vld [vmem:[#allocation29_spill] sm:$0xff]  ;;  %5193 = vrcp.f32 %v2661_v41  ;;  %v7685_v13 = vmul.f32 %v5178_v25, %v9116_v9  ;;  %v1189_v44 = vpop.f32.mrb[202].mxu0  ;;  %v9119_v41 = vld [vmem:[#allocation110_spill] sm:$0xff] }
 0x335   : > { %v1897_v32 = vadd.f32 %v9115_v18, %v6859_v15  ;;  %v7687_v46 = vpop.eup %5181  ;;  %5195 = vpow2.f32 %v2443_v36  ;;  %v7689_v1 = vmul.f32 %v5180_v10, %v1892_v14  ;;  %v2155_v59 = vmul.f32 %v1186_v27, %v1184_v60  ;;  %4636 = vmatmul.mubr.f32.gmra.mrb[154].mxu1 %v2914_v61  ;;  %v1191_v18 = vpop.f32.mrb[203].mxu0  ;;  %v9121_v61 = vld [vmem:[#allocation101_spill] sm:$0xff] }
 0x336   : > { %9117 = vst [vmem:[#allocation62_spill] sm:$0xff] %v7687_v46  ;;  %v2662_v5 = vadd.f32 %v5180_v10, %v5178_v25  ;;  %5197 = vpow2.f32 %v2571_v6  ;;  %v2282_v39 = vsub.f32 %v9114_v42, %v2218_v53  ;;  %v2346_v45 = vsub.f32 %v2154_v4, %v2218_v53  ;;  %v9120_v25 = vld [vmem:[#allocation92_spill] sm:$0xff] }
 0x337   : > { %9118 = vst [vmem:[#allocation84_spill] sm:$0xff] %v7689_v1  ;;  %v1190_v16 = vadd.f32 %v1189_v44, %v6128_v37  ;;  %v2219_v8 = vmax.f32 %v9119_v41, %v2155_v59  ;;  %v1192_v9 = vadd.f32 %v1191_v18, %v6132_v38  ;;  %v2915_v36 = vmul.f32 %v7687_v46, %v7640_v12  ;;  %v1195_v18 = vpop.f32.mrb[204].mxu0  ;;  %v9122_v1 = vld [vmem:[#allocation70_spill] sm:$0xff] }
 0x338   : > { %5199 = vrcp.f32 %v2662_v5  ;;  %v5184_v14 = vpop.eup %5183  ;;  %v2445_v60 = vmul.f32 1.442695, %v2282_v39  ;;  %v2573_v27 = vmul.f32 1.442695, %v2346_v45  ;;  %v1902_v6 = vadd.f32 %v9120_v25, %v6859_v15  ;;  %v1197_v45 = vpop.f32.mrb[205].mxu0 }
 0x339   : > { %v1907_v4 = vadd.f32 %v9121_v61, %v6859_v15  ;;  %v5186_v10 = vpop.eup %5185  ;;  %v2283_v42 = vsub.f32 %v9119_v41, %v2219_v8  ;;  %v2347_v53 = vsub.f32 %v2155_v59, %v2219_v8  ;;  %v2156_v44 = vmul.f32 %v1192_v9, %v1190_v16  ;;  %4638 = vmatprep.mubr.f32.mxu1 %v2915_v36  ;;  %v9125_v8 = vld [vmem:[#allocation112_spill] sm:$0xff] }
 0x33a   : > { %v7703_v3 = vmul.f32 %v5184_v14, %v9122_v1  ;;  %v7705_v12 = vpop.eup %5187  ;;  %5201 = vpow2.f32 %v2445_v60  ;;  %v7707_v5 = vmul.f32 %v5186_v10, %v1897_v32  ;;  %v1196_v39 = vadd.f32 %v1195_v18, %v6128_v37  ;;  %v9126_v36 = vld [vmem:[#allocation68_spill] sm:$0xff] }
 0x33b   : > { %9123 = vst [vmem:[#allocation61_spill] sm:$0xff] %v7705_v12  ;;  %v2663_v25 = vadd.f32 %v5186_v10, %v5184_v14  ;;  %v5190_v61 = vpop.eup %5189  ;;  %5203 = vpow2.f32 %v2573_v27  ;;  %v2447_v46 = vmul.f32 1.442695, %v2283_v42  ;;  %v2575_v41 = vmul.f32 1.442695, %v2347_v53  ;;  %v1201_v10 = vpop.f32.mrb[206].mxu0 }
 0x33c   : > { %9124 = vst [vmem:[#allocation88_spill] sm:$0xff] %v7707_v5  ;;  %v2220_v59 = vmax.f32 %v9125_v8, %v2156_v44  ;;  %v5192_v16 = vpop.eup %5191  ;;  %v1198_v9 = vadd.f32 %v1197_v45, %v6132_v38  ;;  %v2916_v1 = vmul.f32 %v7705_v12, %v7658_v30  ;;  %v7715_v32 = vmul.f32 %v5190_v61, %v9126_v36  ;;  %v1203_v45 = vpop.f32.mrb[207].mxu0 }
 0x33d   : > { %5205 = vrcp.f32 %v2663_v25  ;;  %v7717_v60 = vmul.f32 %v5192_v16, %v1902_v6  ;;  %v1202_v18 = vadd.f32 %v1201_v10, %v6128_v37  ;;  %v2664_v30 = vadd.f32 %v5192_v16, %v5190_v61 }
 0x33e   : > { %5207 = vpow2.f32 %v2447_v46  ;;  %v2284_v14 = vsub.f32 %v9125_v8, %v2220_v59  ;;  %v2348_v27 = vsub.f32 %v2156_v44, %v2220_v59  ;;  %v7720_v42 = vpop.eup %5193  ;;  %v2157_v53 = vmul.f32 %v1198_v9, %v1196_v39  ;;  %4639 = vmatmul.mubr.f32.gmra.mrb[156].mxu1 %v2916_v1  ;;  %v9129_v44 = vld [vmem:[#allocation114_spill] sm:$0xff]  ;;  %v9131_v39 = vld [vmem:[#allocation72_spill] sm:$0xff] }
 0x33f   : > { %9127 = vst [vmem:[#allocation25_spill] sm:$0xff] %v7717_v60  ;;  %9128 = vst [vmem:[#allocation65_spill] sm:$0xff] %v7720_v42  ;;  %5209 = vpow2.f32 %v2575_v41  ;;  %v5196_v25 = vpop.eup %5195  ;;  %v1204_v46 = vadd.f32 %v1203_v45, %v6132_v38  ;;  %v2917_v6 = vmul.f32 %v7720_v42, %v7670_v31  ;;  %v9130_v60 = vld [vmem:[#allocation113_spill] sm:$0xff] }
 0x340   : > { %v2449_v5 = vmul.f32 1.442695, %v2284_v14  ;;  %v2577_v36 = vmul.f32 1.442695, %v2348_v27  ;;  %v5198_v8 = vpop.eup %5197  ;;  %v2221_v59 = vmax.f32 %v9129_v44, %v2157_v53  ;;  %v1912_v41 = vadd.f32 %v9130_v60, %v6859_v15  ;;  %v1207_v14 = vpop.f32.mrb[208].mxu0 }
 0x341   : > { %5211 = vrcp.f32 %v2664_v30  ;;  %v7730_v9 = vmul.f32 %v5196_v25, %v9131_v39  ;;  %v7734_v61 = vmul.f32 %v5198_v8, %v1907_v4  ;;  %v2158_v16 = vmul.f32 %v1204_v46, %v1202_v18  ;;  %4641 = vmatprep.mubr.f32.mxu1 %v2917_v6  ;;  %v1209_v60 = vpop.f32.mrb[209].mxu0  ;;  %v9134_v30 = vld [vmem:[#allocation118_spill] sm:$0xff] }
 0x342   : > { %v7732_v1 = vpop.eup %5199  ;;  %5213 = vpow2.f32 %v2449_v5  ;;  %v2665_v27 = vadd.f32 %v5198_v8, %v5196_v25  ;;  %v2285_v31 = vsub.f32 %v9129_v44, %v2221_v59  ;;  %v2349_v10 = vsub.f32 %v2157_v53, %v2221_v59  ;;  %v1213_v59 = vpop.f32.mrb[210].mxu0 }
 0x343   : > { %9132 = vst [vmem:[#allocation93_spill] sm:$0xff] %v7732_v1  ;;  %9133 = vst [vmem:[#allocation81_spill] sm:$0xff] %v7734_v61  ;;  %5215 = vpow2.f32 %v2577_v36  ;;  %v1208_v45 = vadd.f32 %v1207_v14, %v6128_v37  ;;  %v2222_v42 = vmax.f32 %v9134_v30, %v2158_v16  ;;  %v1210_v39 = vadd.f32 %v1209_v60, %v6132_v38  ;;  %v9135_v14 = vld [vmem:[#allocation71_spill] sm:$0xff] }
 0x344   : > { %v2918_v5 = vmul.f32 %v7732_v1, %v7685_v13  ;;  %5217 = vrcp.f32 %v2665_v27  ;;  %v5202_v4 = vpop.eup %5201  ;;  %v2451_v18 = vmul.f32 1.442695, %v2285_v31  ;;  %v2579_v46 = vmul.f32 1.442695, %v2349_v10  ;;  %v1215_v31 = vpop.f32.mrb[211].mxu0 }
 0x345   : > { %v1922_v25 = vadd.f32 %v7218_v2, %v6859_v15  ;;  %v1917_v53 = vadd.f32 %v7226_v56, %v6859_v15  ;;  %v5204_v36 = vpop.eup %5203  ;;  %v2286_v6 = vsub.f32 %v9134_v30, %v2222_v42  ;;  %v2350_v8 = vsub.f32 %v2158_v16, %v2222_v42  ;;  %v9138_v42 = vld [vmem:[#allocation120_spill] sm:$0xff] }
 0x346   : > { %v2159_v44 = vmul.f32 %v1210_v39, %v1208_v45  ;;  %4642 = vmatmul.mubr.f32.gmra.mrb[158].mxu1 %v2918_v5  ;;  %v7748_v60 = vmul.f32 %v5202_v4, %v9135_v14  ;;  %5219 = vpow2.f32 %v2451_v18  ;;  %v7752_v27 = vmul.f32 %v5204_v36, %v1912_v41  ;;  %v9139_v18 = vld [vmem:[#allocation75_spill] sm:$0xff] }
 0x347   : > { %v7750_v13 = vpop.eup %5205  ;;  %v1214_v2 = vadd.f32 %v1213_v59, %v6128_v37  ;;  %v2666_v10 = vadd.f32 %v5204_v36, %v5202_v4  ;;  %5221 = vpow2.f32 %v2579_v46  ;;  %v2453_v61 = vmul.f32 1.442695, %v2286_v6  ;;  %v1219_v46 = vpop.f32.mrb[212].mxu0 }
 0x348   : > { %9136 = vst [vmem:[#allocation85_spill] sm:$0xff] %v7750_v13  ;;  %9137 = vst [vmem:[#allocation63_spill] sm:$0xff] %v7752_v27  ;;  %v5208_v56 = vpop.eup %5207  ;;  %v2581_v30 = vmul.f32 1.442695, %v2350_v8  ;;  %v2223_v16 = vmax.f32 %v9138_v42, %v2159_v44  ;;  %v1216_v39 = vadd.f32 %v1215_v31, %v6132_v38  ;;  %v2919_v5 = vmul.f32 %v7750_v13, %v7703_v3  ;;  %v1221_v31 = vpop.f32.mrb[213].mxu0 }
 0x349   : > { %v5210_v45 = vpop.eup %5209  ;;  %5223 = vrcp.f32 %v2666_v10  ;;  %v7760_v41 = vmul.f32 %v5208_v56, %v9139_v18  ;;  %v1220_v14 = vadd.f32 %v1219_v46, %v6128_v37 }
 0x34a   : > { %5225 = vpow2.f32 %v2453_v61  ;;  %v2287_v59 = vsub.f32 %v9138_v42, %v2223_v16  ;;  %v2351_v4 = vsub.f32 %v2159_v44, %v2223_v16  ;;  %v7763_v36 = vmul.f32 %v5210_v45, %v1917_v53  ;;  %4644 = vmatprep.mubr.f32.mxu1 %v2919_v5  ;;  %v9142_v42 = vld [vmem:[#allocation121_spill] sm:$0xff] }
 0x34b   : > { %v7765_v6 = vpop.eup %5211  ;;  %5227 = vpow2.f32 %v2581_v30  ;;  %v2160_v8 = vmul.f32 %v1216_v39, %v1214_v2  ;;  %v2667_v3 = vadd.f32 %v5210_v45, %v5208_v56  ;;  %v1222_v61 = vadd.f32 %v1221_v31, %v6132_v38  ;;  %v9143_v2 = vld [vmem:[#allocation73_spill] sm:$0xff] }
 0x34c   : > { %9140 = vst [vmem:[#allocation99_spill] sm:$0xff] %v7763_v36  ;;  %9141 = vst [vmem:[#allocation67_spill] sm:$0xff] %v7765_v6  ;;  %v5214_v10 = vpop.eup %5213  ;;  %v2455_v27 = vmul.f32 1.442695, %v2287_v59  ;;  %v2583_v18 = vmul.f32 1.442695, %v2351_v4  ;;  %v2920_v44 = vmul.f32 %v7765_v6, %v7715_v32  ;;  %v1927_v30 = vadd.f32 %v7262_v58, %v6859_v15 }
 0x34d   : > { %v5216_v53 = vpop.eup %5215  ;;  %v2224_v16 = vmax.f32 %v9142_v42, %v2160_v8  ;;  %5229 = vrcp.f32 %v2667_v3  ;;  %v7775_v39 = vmul.f32 %v5214_v10, %v9143_v2  ;;  %v2161_v45 = vmul.f32 %v1222_v61, %v1220_v14  ;;  %v1225_v59 = vpop.f32.mrb[214].mxu0  ;;  %v9146_v3 = vld [vmem:[#allocation122_spill] sm:$0xff] }
 0x34e   : > { %v7777_v5 = vpop.eup %5217  ;;  %5231 = vpow2.f32 %v2455_v27  ;;  %v7779_v56 = vmul.f32 %v5216_v53, %v1922_v25  ;;  %4645 = vmatmul.mubr.f32.gmra.mrb[160].mxu1 %v2920_v44  ;;  %v2668_v4 = vadd.f32 %v5216_v53, %v5214_v10  ;;  %v1226_v31 = vadd.f32 %v1225_v59, %v6128_v37  ;;  %v1227_v58 = vpop.f32.mrb[215].mxu0  ;;  %v9147_v59 = vld [vmem:[#allocation26_spill] sm:$0xff] }
 0x34f   : > { %9144 = vst [vmem:[#allocation105_spill] sm:$0xff] %v7777_v5  ;;  %5233 = vpow2.f32 %v2583_v18  ;;  %v2288_v32 = vsub.f32 %v9142_v42, %v2224_v16  ;;  %v2352_v46 = vsub.f32 %v2160_v8, %v2224_v16  ;;  %v2225_v36 = vmax.f32 %v9146_v3, %v2161_v45  ;;  %v1231_v16 = vpop.f32.mrb[216].mxu0 }
 0x350   : > { %9145 = vst [vmem:[#allocation29_spill] sm:$0xff] %v7779_v56  ;;  %v1228_v2 = vadd.f32 %v1227_v58, %v6132_v38  ;;  %v2921_v27 = vmul.f32 %v7777_v5, %v7730_v9  ;;  %5235 = vrcp.f32 %v2668_v4  ;;  %v5220_v25 = vpop.eup %5219  ;;  %v1932_v10 = vadd.f32 %v7254_v62, %v6859_v15 }
 0x351   : > { %v2457_v14 = vmul.f32 1.442695, %v2288_v32  ;;  %v2585_v61 = vmul.f32 1.442695, %v2352_v46  ;;  %v1937_v8 = vadd.f32 %v7295_v54, %v6859_v15  ;;  %v5222_v18 = vpop.eup %5221  ;;  %v2289_v44 = vsub.f32 %v9146_v3, %v2225_v36  ;;  %v1233_v32 = vpop.f32.mrb[217].mxu0 }
 0x352   : > { %v2353_v53 = vsub.f32 %v2161_v45, %v2225_v36  ;;  %v2162_v42 = vmul.f32 %v1228_v2, %v1226_v31  ;;  %4647 = vmatprep.mubr.f32.mxu1 %v2921_v27  ;;  %v7793_v58 = vmul.f32 %v5220_v25, %v9147_v59  ;;  %v7797_v4 = vmul.f32 %v5222_v18, %v1927_v30  ;;  %v9150_v36 = vld [vmem:[#allocation123_spill] sm:$0xff] }
 0x353   : > { %v7795_v9 = vpop.eup %5223  ;;  %5237 = vpow2.f32 %v2457_v14  ;;  %v1232_v62 = vadd.f32 %v1231_v16, %v6128_v37  ;;  %v2669_v46 = vadd.f32 %v5222_v18, %v5220_v25  ;;  %v2459_v56 = vmul.f32 1.442695, %v2289_v44  ;;  %v9151_v14 = vld [vmem:[#allocation96_spill] sm:$0xff]  ;;  %v1237_v18 = vpop.f32.mrb[218].mxu0 }
 0x354   : > { %9148 = vst [vmem:[#allocation66_spill] sm:$0xff] %v7795_v9  ;;  %9149 = vst [vmem:[#allocation110_spill] sm:$0xff] %v7797_v4  ;;  %v5226_v54 = vpop.eup %5225  ;;  %5239 = vpow2.f32 %v2585_v61  ;;  %v2587_v3 = vmul.f32 1.442695, %v2353_v53  ;;  %v2226_v45 = vmax.f32 %v9150_v36, %v2162_v42  ;;  %v1234_v2 = vadd.f32 %v1233_v32, %v6132_v38  ;;  %v1239_v32 = vpop.f32.mrb[219].mxu0 }
 0x355   : > { %v5228_v31 = vpop.eup %5227  ;;  %v2922_v27 = vmul.f32 %v7795_v9, %v7748_v60  ;;  %5241 = vrcp.f32 %v2669_v46  ;;  %v7805_v30 = vmul.f32 %v5226_v54, %v9151_v14  ;;  %v1238_v59 = vadd.f32 %v1237_v18, %v6128_v37 }
 0x356   : > { %5243 = vpow2.f32 %v2459_v56  ;;  %v7807_v16 = vmul.f32 %v5228_v31, %v1932_v10  ;;  %v2290_v25 = vsub.f32 %v9150_v36, %v2226_v45  ;;  %v2354_v61 = vsub.f32 %v2162_v42, %v2226_v45  ;;  %v9154_v42 = vld [vmem:[#allocation124_spill] sm:$0xff] }
 0x357   : > { %v7810_v44 = vpop.eup %5229  ;;  %5245 = vpow2.f32 %v2587_v3  ;;  %v2163_v53 = vmul.f32 %v1234_v2, %v1232_v62  ;;  %4648 = vmatmul.mubr.f32.gmra.mrb[162].mxu1 %v2922_v27  ;;  %v2670_v60 = vadd.f32 %v5228_v31, %v5226_v54  ;;  %v1240_v56 = vadd.f32 %v1239_v32, %v6132_v38  ;;  %v9155_v62 = vld [vmem:[#allocation77_spill] sm:$0xff] }
 0x358   : > { %9152 = vst [vmem:[#allocation92_spill] sm:$0xff] %v7807_v16  ;;  %9153 = vst [vmem:[#allocation101_spill] sm:$0xff] %v7810_v44  ;;  %v5232_v46 = vpop.eup %5231  ;;  %v2461_v4 = vmul.f32 1.442695, %v2290_v25  ;;  %v2589_v14 = vmul.f32 1.442695, %v2354_v61  ;;  %v2923_v10 = vmul.f32 %v7810_v44, %v7760_v41  ;;  %v1942_v3 = vadd.f32 %v7289_v33, %v6859_v15 }
 0x359   : > { %v5234_v36 = vpop.eup %5233  ;;  %v2227_v45 = vmax.f32 %v9154_v42, %v2163_v53  ;;  %5247 = vrcp.f32 %v2670_v60  ;;  %v7820_v2 = vmul.f32 %v5232_v46, %v9155_v62  ;;  %v2164_v31 = vmul.f32 %v1240_v56, %v1238_v59  ;;  %v1243_v25 = vpop.f32.mrb[220].mxu0  ;;  %v9158_v60 = vld [vmem:[#allocation125_spill] sm:$0xff] }
 0x35a   : > { %v7822_v27 = vpop.eup %5235  ;;  %5249 = vpow2.f32 %v2461_v4  ;;  %v7824_v54 = vmul.f32 %v5234_v36, %v1937_v8  ;;  %4650 = vmatprep.mubr.f32.mxu1 %v2923_v10  ;;  %v2671_v61 = vadd.f32 %v5234_v36, %v5232_v46  ;;  %v1244_v32 = vadd.f32 %v1243_v25, %v6128_v37  ;;  %v1245_v33 = vpop.f32.mrb[221].mxu0  ;;  %v9159_v25 = vld [vmem:[#allocation76_spill] sm:$0xff] }
 0x35b   : > { %9156 = vst [vmem:[#allocation70_spill] sm:$0xff] %v7822_v27  ;;  %5251 = vpow2.f32 %v2589_v14  ;;  %v2291_v41 = vsub.f32 %v9154_v42, %v2227_v45  ;;  %v2355_v18 = vsub.f32 %v2163_v53, %v2227_v45  ;;  %v2228_v16 = vmax.f32 %v9158_v60, %v2164_v31  ;;  %v1249_v45 = vpop.f32.mrb[222].mxu0 }
 0x35c   : > { %9157 = vst [vmem:[#allocation112_spill] sm:$0xff] %v7824_v54  ;;  %v1246_v62 = vadd.f32 %v1245_v33, %v6132_v38  ;;  %v2924_v4 = vmul.f32 %v7822_v27, %v7775_v39  ;;  %5253 = vrcp.f32 %v2671_v61  ;;  %v1952_v46 = vadd.f32 %v7322_v7, %v6859_v15 }
 0x35d   : > { %v5238_v8 = vpop.eup %5237  ;;  %v2463_v59 = vmul.f32 1.442695, %v2291_v41  ;;  %v2591_v56 = vmul.f32 1.442695, %v2355_v18  ;;  %v1947_v53 = vadd.f32 %v7330_v40, %v6859_v15  ;;  %v2292_v10 = vsub.f32 %v9158_v60, %v2228_v16  ;;  %v1251_v41 = vpop.f32.mrb[223].mxu0 }
 0x35e   : > { %v5240_v14 = vpop.eup %5239  ;;  %v2356_v36 = vsub.f32 %v2164_v31, %v2228_v16  ;;  %v2165_v42 = vmul.f32 %v1246_v62, %v1244_v32  ;;  %4651 = vmatmul.mubr.f32.gmra.mrb[164].mxu1 %v2924_v4  ;;  %v7838_v33 = vmul.f32 %v5238_v8, %v9159_v25  ;;  %v1250_v7 = vadd.f32 %v1249_v45, %v6128_v37  ;;  %v9162_v16 = vld [vmem:[#allocation126_spill] sm:$0xff] }
 0x35f   : > { %v7840_v39 = vpop.eup %5241  ;;  %5255 = vpow2.f32 %v2463_v59  ;;  %v7842_v61 = vmul.f32 %v5240_v14, %v1942_v3  ;;  %v2672_v18 = vadd.f32 %v5240_v14, %v5238_v8  ;;  %v2465_v54 = vmul.f32 1.442695, %v2292_v10  ;;  %v9163_v59 = vld [vmem:[#allocation80_spill] sm:$0xff] }
 0x360   : > { %9160 = vst [vmem:[#allocation68_spill] sm:$0xff] %v7840_v39  ;;  %v5244_v40 = vpop.eup %5243  ;;  %5257 = vpow2.f32 %v2591_v56  ;;  %v2593_v60 = vmul.f32 1.442695, %v2356_v36  ;;  %v2229_v31 = vmax.f32 %v9162_v16, %v2165_v42  ;;  %v1252_v62 = vadd.f32 %v1251_v41, %v6132_v38  ;;  %v1255_v56 = vpop.f32.mrb[224].mxu0 }
 0x361   : > { %9161 = vst [vmem:[#allocation114_spill] sm:$0xff] %v7842_v61  ;;  %v5246_v32 = vpop.eup %5245  ;;  %v2925_v4 = vmul.f32 %v7840_v39, %v7793_v58  ;;  %5259 = vrcp.f32 %v2672_v18  ;;  %v7850_v3 = vmul.f32 %v5244_v40, %v9163_v59  ;;  %v1256_v25 = vadd.f32 %v1255_v56, %v6128_v37  ;;  %v1257_v41 = vpop.f32.mrb[225].mxu0 }
 0x362   : > { %5261 = vpow2.f32 %v2465_v54  ;;  %v2293_v45 = vsub.f32 %v9162_v16, %v2229_v31  ;;  %v2357_v8 = vsub.f32 %v2165_v42, %v2229_v31  ;;  %v7853_v14 = vmul.f32 %v5246_v32, %v1947_v53  ;;  %v9165_v16 = vld [vmem:[#allocation127_spill] sm:$0xff] }
 0x363   : > { %v7855_v10 = vpop.eup %5247  ;;  %5263 = vpow2.f32 %v2593_v60  ;;  %v2166_v36 = vmul.f32 %v1252_v62, %v1250_v7  ;;  %4653 = vmatprep.mubr.f32.mxu1 %v2925_v4  ;;  %v2673_v58 = vadd.f32 %v5246_v32, %v5244_v40  ;;  %v1258_v54 = vadd.f32 %v1257_v41, %v6132_v38  ;;  %v9166_v7 = vld [vmem:[#allocation78_spill] sm:$0xff] }
 0x364   : > { %9164 = vst [vmem:[#allocation113_spill] sm:$0xff] %v7855_v10  ;;  %v5250_v18 = vpop.eup %5249  ;;  %v2467_v61 = vmul.f32 1.442695, %v2293_v45  ;;  %v2595_v59 = vmul.f32 1.442695, %v2357_v8  ;;  %v2926_v42 = vmul.f32 %v7855_v10, %v7805_v30  ;;  %v1957_v60 = vadd.f32 %v7364_v48, %v6859_v15  ;;  %v1261_v45 = vpop.f32.mrb[226].mxu0 }
 0x365   : > { %v5252_v53 = vpop.eup %5251  ;;  %v2230_v31 = vmax.f32 %v9165_v16, %v2166_v36  ;;  %5265 = vrcp.f32 %v2673_v58  ;;  %v7865_v62 = vmul.f32 %v5250_v18, %v9166_v7  ;;  %v2167_v32 = vmul.f32 %v1258_v54, %v1256_v25  ;;  %v1263_v48 = vpop.f32.mrb[227].mxu0  ;;  %v9168_v58 = vld [vmem:[#allocation128_spill] sm:$0xff] }
 0x366   : > { %v7867_v4 = vpop.eup %5253  ;;  %5267 = vpow2.f32 %v2467_v61  ;;  %v7869_v40 = vmul.f32 %v5252_v53, %v1952_v46  ;;  %4654 = vmatmul.mubr.f32.gmra.mrb[166].mxu1 %v2926_v42  ;;  %v2674_v8 = vadd.f32 %v5252_v53, %v5250_v18  ;;  %v1262_v41 = vadd.f32 %v1261_v45, %v6128_v37  ;;  %v9169_v45 = vld [vmem:[#allocation102_spill] sm:$0xff] }
 0x367   : > { %9167 = vst [vmem:[#allocation72_spill] sm:$0xff] %v7867_v4  ;;  %5269 = vpow2.f32 %v2595_v59  ;;  %v2294_v30 = vsub.f32 %v9165_v16, %v2230_v31  ;;  %v2358_v56 = vsub.f32 %v2166_v36, %v2230_v31  ;;  %v2231_v10 = vmax.f32 %v9168_v58, %v2167_v32  ;;  %v1267_v31 = vpop.f32.mrb[228].mxu0 }
 0x368   : > { %v1264_v7 = vadd.f32 %v1263_v48, %v6132_v38  ;;  %v2927_v61 = vmul.f32 %v7867_v4, %v7820_v2  ;;  %5271 = vrcp.f32 %v2674_v8  ;;  %v1962_v18 = vadd.f32 %v7356_v52, %v6859_v15 }
 0x369   : > { %v5256_v46 = vpop.eup %5255  ;;  %v2469_v25 = vmul.f32 1.442695, %v2294_v30  ;;  %v2597_v54 = vmul.f32 1.442695, %v2358_v56  ;;  %v1967_v36 = vadd.f32 %v7397_v23, %v6859_v15  ;;  %v2295_v42 = vsub.f32 %v9168_v58, %v2231_v10  ;;  %v1269_v30 = vpop.f32.mrb[229].mxu0 }
 0x36a   : > { %v5258_v59 = vpop.eup %5257  ;;  %v2359_v53 = vsub.f32 %v2167_v32, %v2231_v10  ;;  %v2168_v16 = vmul.f32 %v1264_v7, %v1262_v41  ;;  %4656 = vmatprep.mubr.f32.mxu1 %v2927_v61  ;;  %v7883_v48 = vmul.f32 %v5256_v46, %v9169_v45  ;;  %v1268_v52 = vadd.f32 %v1267_v31, %v6128_v37  ;;  %v9171_v10 = vld [vmem:[#allocation129_spill] sm:$0xff] }
 0x36b   : > { %v7885_v2 = vpop.eup %5259  ;;  %5273 = vpow2.f32 %v2469_v25  ;;  %v7887_v8 = vmul.f32 %v5258_v59, %v1957_v60  ;;  %v2675_v56 = vadd.f32 %v5258_v59, %v5256_v46  ;;  %v2471_v4 = vmul.f32 1.442695, %v2295_v42  ;;  %v9172_v25 = vld [vmem:[#allocation82_spill] sm:$0xff]  ;;  %v1273_v59 = vpop.f32.mrb[230].mxu0 }
 0x36c   : > { %9170 = vst [vmem:[#allocation118_spill] sm:$0xff] %v7885_v2  ;;  %v5262_v23 = vpop.eup %5261  ;;  %5275 = vpow2.f32 %v2597_v54  ;;  %v2599_v58 = vmul.f32 1.442695, %v2359_v53  ;;  %v2232_v32 = vmax.f32 %v9171_v10, %v2168_v16  ;;  %v1270_v7 = vadd.f32 %v1269_v30, %v6132_v38  ;;  %v1275_v30 = vpop.f32.mrb[231].mxu0 }
 0x36d   : > { %v5264_v41 = vpop.eup %5263  ;;  %v2928_v61 = vmul.f32 %v7885_v2, %v7838_v33  ;;  %5277 = vrcp.f32 %v2675_v56  ;;  %v7895_v60 = vmul.f32 %v5262_v23, %v9172_v25  ;;  %v1274_v45 = vadd.f32 %v1273_v59, %v6128_v37 }
 0x36e   : > { %5279 = vpow2.f32 %v2471_v4  ;;  %v7897_v31 = vmul.f32 %v5264_v41, %v1962_v18  ;;  %v2296_v46 = vsub.f32 %v9171_v10, %v2232_v32  ;;  %v2360_v54 = vsub.f32 %v2168_v16, %v2232_v32  ;;  %v9173_v16 = vld [vmem:[#allocation130_spill] sm:$0xff] }
 0x36f   : > { %v7900_v42 = vpop.eup %5265  ;;  %5281 = vpow2.f32 %v2599_v58  ;;  %v2169_v53 = vmul.f32 %v1270_v7, %v1268_v52  ;;  %4657 = vmatmul.mubr.f32.gmra.mrb[168].mxu1 %v2928_v61  ;;  %v2676_v33 = vadd.f32 %v5264_v41, %v5262_v23  ;;  %v1276_v4 = vadd.f32 %v1275_v30, %v6132_v38  ;;  %v9174_v52 = vld [vmem:[#allocation83_spill] sm:$0xff] }
 0x370   : > { %v5268_v56 = vpop.eup %5267  ;;  %v2473_v2 = vmul.f32 1.442695, %v2296_v46  ;;  %v2601_v25 = vmul.f32 1.442695, %v2360_v54  ;;  %v2929_v18 = vmul.f32 %v7900_v42, %v7850_v3  ;;  %v1972_v58 = vadd.f32 %v7391_v17, %v6859_v15  ;;  %v1279_v46 = vpop.f32.mrb[232].mxu0 }
 0x371   : > { %v5270_v10 = vpop.eup %5269  ;;  %v2233_v32 = vmax.f32 %v9173_v16, %v2169_v53  ;;  %5283 = vrcp.f32 %v2676_v33  ;;  %v7910_v7 = vmul.f32 %v5268_v56, %v9174_v52  ;;  %v2170_v41 = vmul.f32 %v1276_v4, %v1274_v45  ;;  %v1281_v17 = vpop.f32.mrb[233].mxu0  ;;  %v9175_v33 = vld [vmem:[#allocation131_spill] sm:$0xff] }
 0x372   : > { %v7912_v61 = vpop.eup %5271  ;;  %5285 = vpow2.f32 %v2473_v2  ;;  %v7914_v23 = vmul.f32 %v5270_v10, %v1967_v36  ;;  %4659 = vmatprep.mubr.f32.mxu1 %v2929_v18  ;;  %v2677_v54 = vadd.f32 %v5270_v10, %v5268_v56  ;;  %v1280_v30 = vadd.f32 %v1279_v46, %v6128_v37  ;;  %v9176_v46 = vld [vmem:[#allocation27_spill] sm:$0xff] }
 0x373   : > { %5287 = vpow2.f32 %v2601_v25  ;;  %v2297_v3 = vsub.f32 %v9173_v16, %v2233_v32  ;;  %v2361_v59 = vsub.f32 %v2169_v53, %v2233_v32  ;;  %v2234_v39 = vmax.f32 %v9175_v33, %v2170_v41  ;;  %v1285_v32 = vpop.f32.mrb[234].mxu0 }
 0x374   : > { %v1282_v52 = vadd.f32 %v1281_v17, %v6132_v38  ;;  %v2930_v2 = vmul.f32 %v7912_v61, %v7865_v62  ;;  %5289 = vrcp.f32 %v2677_v54  ;;  %v1982_v56 = vadd.f32 %v7424_v28, %v6859_v15 }
 0x375   : > { %v5274_v36 = vpop.eup %5273  ;;  %v2475_v45 = vmul.f32 1.442695, %v2297_v3  ;;  %v2603_v4 = vmul.f32 1.442695, %v2361_v59  ;;  %v1977_v53 = vadd.f32 %v7432_v50, %v6859_v15  ;;  %v2298_v18 = vsub.f32 %v9175_v33, %v2234_v39  ;;  %v1287_v3 = vpop.f32.mrb[235].mxu0 }
 0x376   : > { %v5276_v25 = vpop.eup %5275  ;;  %v2362_v10 = vsub.f32 %v2170_v41, %v2234_v39  ;;  %v2171_v16 = vmul.f32 %v1282_v52, %v1280_v30  ;;  %4660 = vmatmul.mubr.f32.gmra.mrb[170].mxu1 %v2930_v2  ;;  %v7928_v17 = vmul.f32 %v5274_v36, %v9176_v46  ;;  %v1286_v28 = vadd.f32 %v1285_v32, %v6128_v37  ;;  %v9177_v39 = vld [vmem:[#allocation132_spill] sm:$0xff] }
 0x377   : > { %v7930_v62 = vpop.eup %5277  ;;  %5291 = vpow2.f32 %v2475_v45  ;;  %v7932_v54 = vmul.f32 %v5276_v25, %v1972_v58  ;;  %v2678_v59 = vadd.f32 %v5276_v25, %v5274_v36  ;;  %v2477_v27 = vmul.f32 1.442695, %v2298_v18  ;;  %v9178_v45 = vld [vmem:[#allocation87_spill] sm:$0xff] }
 0x378   : > { %v5280_v50 = vpop.eup %5279  ;;  %5293 = vpow2.f32 %v2603_v4  ;;  %v2605_v33 = vmul.f32 1.442695, %v2362_v10  ;;  %v2235_v41 = vmax.f32 %v9177_v39, %v2171_v16  ;;  %v1288_v52 = vadd.f32 %v1287_v3, %v6132_v38  ;;  %v1291_v4 = vpop.f32.mrb[236].mxu0 }
 0x379   : > { %v5282_v30 = vpop.eup %5281  ;;  %v2931_v2 = vmul.f32 %v7930_v62, %v7883_v48  ;;  %5295 = vrcp.f32 %v2678_v59  ;;  %v7940_v58 = vmul.f32 %v5280_v50, %v9178_v45  ;;  %v1292_v46 = vadd.f32 %v1291_v4, %v6128_v37  ;;  %v1293_v3 = vpop.f32.mrb[237].mxu0 }
 0x37a   : > { %5297 = vpow2.f32 %v2477_v27  ;;  %v2299_v32 = vsub.f32 %v9177_v39, %v2235_v41  ;;  %v2363_v36 = vsub.f32 %v2171_v16, %v2235_v41  ;;  %v7943_v25 = vmul.f32 %v5282_v30, %v1977_v53  ;;  %v9179_v39 = vld [vmem:[#allocation133_spill] sm:$0xff] }
 0x37b   : > { %v7945_v18 = vpop.eup %5283  ;;  %5299 = vpow2.f32 %v2605_v33  ;;  %v2172_v10 = vmul.f32 %v1288_v52, %v1286_v28  ;;  %4662 = vmatprep.mubr.f32.mxu1 %v2931_v2  ;;  %v2679_v48 = vadd.f32 %v5282_v30, %v5280_v50  ;;  %v1294_v27 = vadd.f32 %v1293_v3, %v6132_v38  ;;  %v9180_v28 = vld [vmem:[#allocation86_spill] sm:$0xff] }
 0x37c   : > { %v5286_v59 = vpop.eup %5285  ;;  %v2479_v44 = vmul.f32 1.442695, %v2299_v32  ;;  %v2607_v45 = vmul.f32 1.442695, %v2363_v36  ;;  %v2932_v16 = vmul.f32 %v7945_v18, %v7895_v60  ;;  %v1987_v33 = vadd.f32 %v7466_v19, %v6859_v15  ;;  %v1297_v32 = vpop.f32.mrb[238].mxu0 }
 0x37d   : > { %v5288_v53 = vpop.eup %5287  ;;  %v2236_v41 = vmax.f32 %v9179_v39, %v2172_v10  ;;  %5301 = vrcp.f32 %v2679_v48  ;;  %v7955_v52 = vmul.f32 %v5286_v59, %v9180_v28  ;;  %v2173_v30 = vmul.f32 %v1294_v27, %v1292_v46  ;;  %v1299_v19 = vpop.f32.mrb[239].mxu0  ;;  %v9181_v48 = vld [vmem:[#allocation134_spill] sm:$0xff] }
 0x37e   : > { %v7957_v2 = vpop.eup %5289  ;;  %5303 = vpow2.f32 %v2479_v44  ;;  %v7959_v50 = vmul.f32 %v5288_v53, %v1982_v56  ;;  %4663 = vmatmul.mubr.f32.gmra.mrb[172].mxu1 %v2932_v16  ;;  %v2680_v36 = vadd.f32 %v5288_v53, %v5286_v59  ;;  %v1298_v3 = vadd.f32 %v1297_v32, %v6128_v37  ;;  %v9182_v32 = vld [vmem:[#allocation90_spill] sm:$0xff] }
 0x37f   : > { %5305 = vpow2.f32 %v2607_v45  ;;  %v2300_v60 = vsub.f32 %v9179_v39, %v2236_v41  ;;  %v2364_v4 = vsub.f32 %v2172_v10, %v2236_v41  ;;  %v2237_v9 = vmax.f32 %v9181_v48, %v2173_v30  ;;  %v1303_v41 = vpop.f32.mrb[240].mxu0 }
 0x380   : > { %v1300_v28 = vadd.f32 %v1299_v19, %v6132_v38  ;;  %v2933_v44 = vmul.f32 %v7957_v2, %v7910_v7  ;;  %5307 = vrcp.f32 %v2680_v36  ;;  %v1992_v59 = vadd.f32 %v7458_v47, %v6859_v15 }
 0x381   : > { %v5292_v56 = vpop.eup %5291  ;;  %v2481_v46 = vmul.f32 1.442695, %v2300_v60  ;;  %v2609_v27 = vmul.f32 1.442695, %v2364_v4  ;;  %v1997_v10 = vadd.f32 %v7499_v49, %v6859_v15  ;;  %v2301_v16 = vsub.f32 %v9181_v48, %v2237_v9  ;;  %v1305_v60 = vpop.f32.mrb[241].mxu0 }
 0x382   : > { %v5294_v45 = vpop.eup %5293  ;;  %v2365_v53 = vsub.f32 %v2173_v30, %v2237_v9  ;;  %v2174_v39 = vmul.f32 %v1300_v28, %v1298_v3  ;;  %4665 = vmatprep.mubr.f32.mxu1 %v2933_v44  ;;  %v7973_v19 = vmul.f32 %v5292_v56, %v9182_v32  ;;  %v1304_v47 = vadd.f32 %v1303_v41, %v6128_v37  ;;  %v9183_v9 = vld [vmem:[#allocation135_spill] sm:$0xff] }
 0x383   : > { %v7975_v7 = vpop.eup %5295  ;;  %5309 = vpow2.f32 %v2481_v46  ;;  %v7977_v36 = vmul.f32 %v5294_v45, %v1987_v33  ;;  %v2681_v4 = vadd.f32 %v5294_v45, %v5292_v56  ;;  %v2483_v5 = vmul.f32 1.442695, %v2301_v16  ;;  %v9184_v46 = vld [vmem:[#allocation89_spill] sm:$0xff]  ;;  %v1309_v45 = vpop.f32.mrb[242].mxu0 }
 0x384   : > { %v5298_v49 = vpop.eup %5297  ;;  %5311 = vpow2.f32 %v2609_v27  ;;  %v2611_v48 = vmul.f32 1.442695, %v2365_v53  ;;  %v2238_v30 = vmax.f32 %v9183_v9, %v2174_v39  ;;  %v1306_v28 = vadd.f32 %v1305_v60, %v6132_v38  ;;  %v1311_v60 = vpop.f32.mrb[243].mxu0 }
 0x385   : > { %v5300_v3 = vpop.eup %5299  ;;  %v2934_v44 = vmul.f32 %v7975_v7, %v7928_v17  ;;  %5313 = vrcp.f32 %v2681_v4  ;;  %v7985_v33 = vmul.f32 %v5298_v49, %v9184_v46  ;;  %v1310_v32 = vadd.f32 %v1309_v45, %v6128_v37 }
 0x386   : > { %5315 = vpow2.f32 %v2483_v5  ;;  %v7987_v41 = vmul.f32 %v5300_v3, %v1992_v59  ;;  %v2302_v56 = vsub.f32 %v9183_v9, %v2238_v30  ;;  %v2366_v27 = vsub.f32 %v2174_v39, %v2238_v30  ;;  %v9185_v39 = vld [vmem:[#allocation136_spill] sm:$0xff] }
 0x387   : > { %v7990_v16 = vpop.eup %5301  ;;  %5317 = vpow2.f32 %v2611_v48  ;;  %v2175_v53 = vmul.f32 %v1306_v28, %v1304_v47  ;;  %4666 = vmatmul.mubr.f32.gmra.mrb[174].mxu1 %v2934_v44  ;;  %v2682_v17 = vadd.f32 %v5300_v3, %v5298_v49  ;;  %v1312_v5 = vadd.f32 %v1311_v60, %v6132_v38  ;;  %v9186_v47 = vld [vmem:[#allocation91_spill] sm:$0xff] }
 0x388   : > { %v5304_v4 = vpop.eup %5303  ;;  %v2485_v6 = vmul.f32 1.442695, %v2302_v56  ;;  %v2613_v46 = vmul.f32 1.442695, %v2366_v27  ;;  %v2935_v59 = vmul.f32 %v7990_v16, %v7940_v58  ;;  %v2002_v48 = vadd.f32 %v7493_v35, %v6859_v15  ;;  %v1315_v56 = vpop.f32.mrb[244].mxu0 }
 0x389   : > { %v5306_v9 = vpop.eup %5305  ;;  %v2239_v30 = vmax.f32 %v9185_v39, %v2175_v53  ;;  %5319 = vrcp.f32 %v2682_v17  ;;  %v8000_v28 = vmul.f32 %v5304_v4, %v9186_v47  ;;  %v2176_v3 = vmul.f32 %v1312_v5, %v1310_v32  ;;  %v1317_v35 = vpop.f32.mrb[245].mxu0  ;;  %v9187_v17 = vld [vmem:[#allocation139_spill] sm:$0xff] }
 0x38a   : > { %v8002_v44 = vpop.eup %5307  ;;  %5321 = vpow2.f32 %v2485_v6  ;;  %v8004_v49 = vmul.f32 %v5306_v9, %v1997_v10  ;;  %4668 = vmatprep.mubr.f32.mxu1 %v2935_v59  ;;  %v2683_v27 = vadd.f32 %v5306_v9, %v5304_v4  ;;  %v1316_v60 = vadd.f32 %v1315_v56, %v6128_v37  ;;  %v9188_v56 = vld [vmem:[#allocation28_spill] sm:$0xff] }
 0x38b   : > { %5323 = vpow2.f32 %v2613_v46  ;;  %v2303_v58 = vsub.f32 %v9185_v39, %v2239_v30  ;;  %v2367_v45 = vsub.f32 %v2175_v53, %v2239_v30  ;;  %v2240_v13 = vmax.f32 %v9187_v17, %v2176_v3 }
 0x38c   : > { %v1318_v47 = vadd.f32 %v1317_v35, %v6132_v38  ;;  %v2936_v6 = vmul.f32 %v8002_v44, %v7955_v52  ;;  %5325 = vrcp.f32 %v2683_v27  ;;  %v2012_v4 = vadd.f32 %v7526_v20, %v6859_v15  ;;  %v1321_v30 = vpop.f32.mrb[246].mxu0 }
 0x38d   : > { %v5310_v10 = vpop.eup %5309  ;;  %v2487_v32 = vmul.f32 1.442695, %v2303_v58  ;;  %v2615_v5 = vmul.f32 1.442695, %v2367_v45  ;;  %v2007_v53 = vadd.f32 %v7534_v0, %v6859_v15  ;;  %v2304_v59 = vsub.f32 %v9187_v17, %v2240_v13  ;;  %v1323_v58 = vpop.f32.mrb[247].mxu0 }
 0x38e   : > { %v5312_v46 = vpop.eup %5311  ;;  %v2368_v9 = vsub.f32 %v2176_v3, %v2240_v13  ;;  %v2177_v39 = vmul.f32 %v1318_v47, %v1316_v60  ;;  %4669 = vmatmul.mubr.f32.gmra.mrb[176].mxu1 %v2936_v6  ;;  %v8018_v35 = vmul.f32 %v5310_v10, %v9188_v56  ;;  %v1322_v20 = vadd.f32 %v1321_v30, %v6128_v37  ;;  %v9189_v13 = vld [vmem:[#allocation140_spill] sm:$0xff] }
 0x38f   : > { %v8020_v52 = vpop.eup %5313  ;;  %5327 = vpow2.f32 %v2487_v32  ;;  %v8022_v27 = vmul.f32 %v5312_v46, %v2002_v48  ;;  %v2684_v45 = vadd.f32 %v5312_v46, %v5310_v10  ;;  %v2489_v1 = vmul.f32 1.442695, %v2304_v59  ;;  %v9190_v32 = vld [vmem:[#allocation94_spill] sm:$0xff] }
 0x390   : > { %v5316_v0 = vpop.eup %5315  ;;  %5329 = vpow2.f32 %v2615_v5  ;;  %v2617_v17 = vmul.f32 1.442695, %v2368_v9  ;;  %v2241_v3 = vmax.f32 %v9189_v13, %v2177_v39  ;;  %v1324_v47 = vadd.f32 %v1323_v58, %v6132_v38  ;;  %v1327_v5 = vpop.f32.mrb[248].mxu0 }
 0x391   : > { %v5318_v60 = vpop.eup %5317  ;;  %v2937_v6 = vmul.f32 %v8020_v52, %v7973_v19  ;;  %5331 = vrcp.f32 %v2684_v45  ;;  %v8030_v48 = vmul.f32 %v5316_v0, %v9190_v32  ;;  %v1328_v56 = vadd.f32 %v1327_v5, %v6128_v37  ;;  %v1329_v58 = vpop.f32.mrb[249].mxu0 }
 0x392   : > { %5333 = vpow2.f32 %v2489_v1  ;;  %v2305_v30 = vsub.f32 %v9189_v13, %v2241_v3  ;;  %v2369_v10 = vsub.f32 %v2177_v39, %v2241_v3  ;;  %v8033_v46 = vmul.f32 %v5318_v60, %v2007_v53  ;;  %v9191_v13 = vld [vmem:[#allocation143_spill] sm:$0xff] }
 0x393   : > { %v8035_v59 = vpop.eup %5319  ;;  %5335 = vpow2.f32 %v2617_v17  ;;  %v2178_v9 = vmul.f32 %v1324_v47, %v1322_v20  ;;  %4671 = vmatprep.mubr.f32.mxu1 %v2937_v6  ;;  %v2685_v19 = vadd.f32 %v5318_v60, %v5316_v0  ;;  %v1330_v1 = vadd.f32 %v1329_v58, %v6132_v38  ;;  %v9192_v20 = vld [vmem:[#allocation111_spill] sm:$0xff] }
 0x394   : > { %v5322_v45 = vpop.eup %5321  ;;  %v2491_v12 = vmul.f32 1.442695, %v2305_v30  ;;  %v2619_v32 = vmul.f32 1.442695, %v2369_v10  ;;  %v2938_v39 = vmul.f32 %v8035_v59, %v7985_v33  ;;  %v2017_v17 = vadd.f32 %v7568_v63, %v6859_v15  ;;  %v1333_v30 = vpop.f32.mrb[250].mxu0 }
 0x395   : > { %v5324_v53 = vpop.eup %5323  ;;  %v2242_v3 = vmax.f32 %v9191_v13, %v2178_v9  ;;  %5337 = vrcp.f32 %v2685_v19  ;;  %v8045_v47 = vmul.f32 %v5322_v45, %v9192_v20  ;;  %v2179_v60 = vmul.f32 %v1330_v1, %v1328_v56  ;;  %v1335_v63 = vpop.f32.mrb[251].mxu0  ;;  %v9193_v19 = vld [vmem:[#allocation144_spill] sm:$0xff] }
 0x396   : > { %v8047_v6 = vpop.eup %5325  ;;  %5339 = vpow2.f32 %v2491_v12  ;;  %v8049_v0 = vmul.f32 %v5324_v53, %v2012_v4  ;;  %4672 = vmatmul.mubr.f32.gmra.mrb[178].mxu1 %v2938_v39  ;;  %v2686_v10 = vadd.f32 %v5324_v53, %v5322_v45  ;;  %v1334_v58 = vadd.f32 %v1333_v30, %v6128_v37  ;;  %v9194_v30 = vld [vmem:[#allocation97_spill] sm:$0xff] }
 0x397   : > { %5341 = vpow2.f32 %v2619_v32  ;;  %v2306_v33 = vsub.f32 %v9191_v13, %v2242_v3  ;;  %v2370_v5 = vsub.f32 %v2178_v9, %v2242_v3  ;;  %v2243_v34 = vmax.f32 %v9193_v19, %v2179_v60 }
 0x398   : > { %v1336_v20 = vadd.f32 %v1335_v63, %v6132_v38  ;;  %v2939_v12 = vmul.f32 %v8047_v6, %v8000_v28  ;;  %5343 = vrcp.f32 %v2686_v10  ;;  %v2022_v45 = vadd.f32 %v7560_v22, %v6859_v15  ;;  %v1339_v3 = vpop.f32.mrb[252].mxu0 }
 0x399   : > { %v5328_v4 = vpop.eup %5327  ;;  %v2493_v56 = vmul.f32 1.442695, %v2306_v33  ;;  %v2621_v1 = vmul.f32 1.442695, %v2370_v5  ;;  %v2027_v9 = vadd.f32 %v7587_v55, %v6859_v15  ;;  %v2307_v39 = vsub.f32 %v9193_v19, %v2243_v34  ;;  %v1341_v33 = vpop.f32.mrb[253].mxu0 }
 0x39a   : > { %v5330_v32 = vpop.eup %5329  ;;  %v2371_v53 = vsub.f32 %v2179_v60, %v2243_v34  ;;  %v2180_v13 = vmul.f32 %v1336_v20, %v1334_v58  ;;  %4674 = vmatprep.mubr.f32.mxu1 %v2939_v12  ;;  %v8063_v63 = vmul.f32 %v5328_v4, %v9194_v30  ;;  %v1340_v22 = vadd.f32 %v1339_v3, %v6128_v37  ;;  %v9195_v34 = vld [vmem:[#allocation147_spill] sm:$0xff] }
 0x39b   : > { %v8065_v28 = vpop.eup %5331  ;;  %5345 = vpow2.f32 %v2493_v56  ;;  %v8067_v10 = vmul.f32 %v5330_v32, %v2017_v17  ;;  %v2687_v5 = vadd.f32 %v5330_v32, %v5328_v4  ;;  %v2495_v57 = vmul.f32 1.442695, %v2307_v39  ;;  %v9196_v56 = vld [vmem:[#allocation95_spill] sm:$0xff] }
 0x39c   : > { %v5334_v55 = vpop.eup %5333  ;;  %5347 = vpow2.f32 %v2621_v1  ;;  %v2623_v19 = vmul.f32 1.442695, %v2371_v53  ;;  %v2244_v60 = vmax.f32 %v9195_v34, %v2180_v13  ;;  %v1342_v20 = vadd.f32 %v1341_v33, %v6132_v38  ;;  %v1345_v32 = vpop.f32.mrb[254].mxu0 }
 0x39d   : > { %v5336_v58 = vpop.eup %5335  ;;  %v2940_v12 = vmul.f32 %v8065_v28, %v8018_v35  ;;  %5349 = vrcp.f32 %v2687_v5  ;;  %v8075_v17 = vmul.f32 %v5334_v55, %v9196_v56  ;;  %v1346_v30 = vadd.f32 %v1345_v32, %v6128_v37  ;;  %v1347_v33 = vpop.f32.mrb[255].mxu0  ;;  %v8083_v35 = vld [vmem:[#allocation10] ss:$0 sm:$0xff] }
 0x39e   : > { %5351 = vpow2.f32 %v2495_v57  ;;  %v8077_v3 = vmul.f32 %v5336_v58, %v2022_v45  ;;  %v2308_v4 = vsub.f32 %v9195_v34, %v2244_v60  ;;  %v2372_v1 = vsub.f32 %v2180_v13, %v2244_v60  ;;  %v9198_v37 = vld [vmem:[#allocation100_spill] sm:$0xff] }
 0x39f   : > { %v8080_v39 = vpop.eup %5337  ;;  %5353 = vpow2.f32 %v2623_v19  ;;  %v2181_v53 = vmul.f32 %v1342_v20, %v1340_v22  ;;  %4675 = vmatmul.mubr.f32.gmra.mrb[180].mxu1 %v2940_v12  ;;  %v2688_v5 = vadd.f32 %v5336_v58, %v5334_v55  ;;  %v1348_v45 = vadd.f32 %v1347_v33, %v6132_v38  ;;  %v9197_v22 = vld [vmem:[#allocation148_spill] sm:$0xff]  ;;  %v4598_v20 = vpop.f32.mrb[128].mxu1  ;;  %v9199_v33 = vld [vmem:[#allocation103_spill] sm:$0xff] }
 0x3a0   : > { %v5340_v56 = vpop.eup %5339  ;;  %v2497_v24 = vmul.f32 1.442695, %v2308_v4  ;;  %v2625_v57 = vmul.f32 1.442695, %v2372_v1  ;;  %v2941_v13 = vmul.f32 %v8080_v39, %v8030_v48  ;;  %v2032_v19 = vadd.f32 %v7579_v21, %v6859_v15  ;;  %v3104_v4 = vpop.f32.mrb[129].mxu1 }
 0x3a1   : > { %v5342_v34 = vpop.eup %5341  ;;  %v2245_v60 = vmax.f32 %v9197_v22, %v2181_v53  ;;  %5355 = vrcp.f32 %v2688_v5  ;;  %v8092_v12 = vmul.f32 %v5340_v56, %v9198_v37  ;;  %v2182_v38 = vmul.f32 %v1348_v45, %v1346_v30  ;;  %v9200_v37 = vld [vmem:[#allocation151_spill] sm:$0xff] }
 0x3a2   : > { %v8094_v55 = vpop.eup %5343  ;;  %5357 = vpow2.f32 %v2497_v24  ;;  %v8096_v58 = vmul.f32 %v5342_v34, %v2027_v9  ;;  %v3110_v48 = vadd.f32 %v4598_v20, %v8083_v35  ;;  %4677 = vmatprep.mubr.f32.mxu1 %v2941_v13  ;;  %v3105_v32 = vadd.f32 %v8083_v35, %v3104_v4 }
 0x3a3   : > { %5359 = vpow2.f32 %v2625_v57  ;;  %v2309_v21 = vsub.f32 %v9197_v22, %v2245_v60  ;;  %v2373_v1 = vsub.f32 %v2181_v53, %v2245_v60  ;;  %v1712_v5 = vadd.f32 %v9199_v33, %v6859_v15 }
 0x3a4   : > { %v2246_v29 = vmax.f32 %v9200_v37, %v2182_v38  ;;  %3744 = vst [vmem:[%s8106_s28 + $0x8] sm:$0xff] %v3110_v48  ;;  %v2942_v24 = vmul.f32 %v8094_v55, %v8045_v47  ;;  %v2689_v9 = vadd.f32 %v5342_v34, %v5340_v56  ;;  %v2037_v45 = vadd.f32 %v7597_v43, %v6859_v15  ;;  %v9201_v47 = vld [vmem:[#allocation107_spill] sm:$0xff] }
 0x3a5   : > { %v5346_v30 = vpop.eup %5345  ;;  %v2499_v57 = vmul.f32 1.442695, %v2309_v21  ;;  %v2627_v53 = vmul.f32 1.442695, %v2373_v1  ;;  %3743 = vst [vmem:[%s8106_s28] sm:$0xff] %v3105_v32  ;;  %v1717_v56 = vadd.f32 %v9201_v47, %v6859_v15  ;;  %v2042_v32 = vadd.f32 %v7593_v51, %v6859_v15 }
 0x3a6   : > { %v5348_v13 = vpop.eup %5347  ;;  %v2310_v22 = vsub.f32 %v9200_v37, %v2246_v29  ;;  %v2374_v60 = vsub.f32 %v2182_v38, %v2246_v29  ;;  %4678 = vmatmul.mubr.f32.gmra.mrb[182].mxu1 %v2942_v24  ;;  %5361 = vrcp.f32 %v2689_v9  ;;  %v8115_v20 = vmul.f32 %v5346_v30, %v1712_v5 }
 0x3a7   : > { %v8117_v48 = vpop.eup %5349  ;;  %v8121_v34 = vmul.f32 %v5348_v13, %v2032_v19  ;;  %5363 = vpow2.f32 %v2499_v57  ;;  %v2690_v4 = vadd.f32 %v5348_v13, %v5346_v30  ;;  %v4601_v33 = vpop.f32.mrb[130].mxu1 }
 0x3a8   : > { %v5352_v21 = vpop.eup %5351  ;;  %5365 = vpow2.f32 %v2627_v53  ;;  %v2501_v43 = vmul.f32 1.442695, %v2310_v22  ;;  %v2629_v1 = vmul.f32 1.442695, %v2374_v60  ;;  %v2943_v29 = vmul.f32 %v8117_v48, %v8063_v63  ;;  %v3114_v24 = vpop.f32.mrb[131].mxu1  ;;  %v9202_v63 = vld [vmem:[#allocation106_spill] sm:$0xff] }
 0x3a9   : > { %v5354_v38 = vpop.eup %5353  ;;  %5367 = vrcp.f32 %v2690_v4  ;;  %v8127_v5 = vmul.f32 %v5352_v21, %v1717_v56  ;;  %v3120_v37 = vadd.f32 %v4601_v33, %v8083_v35  ;;  %v1722_v57 = vadd.f32 %v9202_v63, %v6859_v15  ;;  %v9203_v22 = vld [vmem:[#allocation108_spill] sm:$0xff]  ;;  %v9204_v56 = vld [vmem:[#allocation109_spill] sm:$0xff] }
 0x3aa   : > { %v8129_v19 = vmul.f32 %v5354_v38, %v2037_v45  ;;  %5369 = vpow2.f32 %v2501_v43  ;;  %4680 = vmatprep.mubr.f32.mxu1 %v2943_v29  ;;  %v2691_v9 = vadd.f32 %v5354_v38, %v5352_v21  ;;  %v3115_v51 = vadd.f32 %v8083_v35, %v3114_v24 }
 0x3ab   : > { %v5356_v30 = vpop.eup %5355  ;;  %5371 = vpow2.f32 %v2629_v1  ;;  %3746 = vst [vmem:[%s8106_s28 + $0x18] sm:$0xff] %v3120_v37  ;;  %v1732_v60 = vadd.f32 %v9203_v22, %v6859_v15  ;;  %v1727_v4 = vadd.f32 %v9204_v56, %v6859_v15  ;;  %v2052_v43 = vadd.f32 %v7603_v26, %v6859_v15  ;;  %v9206_v56 = vld [vmem:[#allocation98_spill] sm:$0xff] }
 0x3ac   : > { %v5358_v53 = vpop.eup %5357  ;;  %v2944_v13 = vmul.f32 %v5356_v30, %v8075_v17  ;;  %5373 = vrcp.f32 %v2691_v9  ;;  %3745 = vst [vmem:[%s8106_s28 + $0x10] sm:$0xff] %v3115_v51  ;;  %v2047_v29 = vadd.f32 %v7609_v11, %v6859_v15  ;;  %v8148_v17 = vmul.f32 %v7900_v42, %v7853_v14 }
 0x3ad   : > { %v5360_v45 = vpop.eup %5359  ;;  %v2820_v47 = vmul.f32 %v5358_v53, %v1722_v57  ;;  %v8152_v38 = vmul.f32 %v7912_v61, %v7869_v40  ;;  %v8156_v33 = vmul.f32 %v7930_v62, %v7887_v8  ;;  %v8160_v26 = vmul.f32 %v7945_v18, %v7897_v31 }
 0x3ae   : > { %v2884_v21 = vmul.f32 %v5360_v45, %v2042_v32  ;;  %4681 = vmatmul.mubr.f32.gmra.mrb[184].mxu1 %v2944_v13  ;;  %v2692_v1 = vadd.f32 %v5360_v45, %v5358_v53  ;;  %v8164_v15 = vmul.f32 %v7957_v2, %v7914_v23  ;;  %v8168_v11 = vmul.f32 %v7975_v7, %v7932_v54 }
 0x3af   : > { %v8173_v8 = vmul.f32 %v7990_v16, %v7943_v25  ;;  %v8177_v42 = vmul.f32 %v8002_v44, %v7959_v50  ;;  %v8181_v31 = vmul.f32 %v8020_v52, %v7977_v36  ;;  %v8185_v54 = vmul.f32 %v8035_v59, %v7987_v41 }
 0x3b0   : > { %v5362_v32 = vpop.eup %5361  ;;  %5375 = vrcp.f32 %v2692_v1  ;;  %v4604_v23 = vpop.f32.mrb[132].mxu1  ;;  %v8189_v25 = vmul.f32 %v8047_v6, %v8004_v49  ;;  %v8193_v18 = vmul.f32 %v8065_v28, %v8022_v27  ;;  %v8198_v41 = vmul.f32 %v8080_v39, %v8033_v46  ;;  %v9209_v1 = vld [vmem:[#allocation115_spill] sm:$0xff] }
 0x3b1   : > { %v5364_v14 = vpop.eup %5363  ;;  %v2945_v40 = vmul.f32 %v5362_v32, %v8092_v12  ;;  %v3130_v7 = vadd.f32 %v4604_v23, %v8083_v35  ;;  %v3124_v36 = vpop.f32.mrb[133].mxu1  ;;  %v8204_v27 = vmul.f32 %v8094_v55, %v8049_v0  ;;  %v8208_v59 = vmul.f32 %v8117_v48, %v8067_v10  ;;  %v9211_v23 = vld [vmem:[#allocation33_spill] sm:$0xff] }
 0x3b2   : > { %v5366_v61 = vpop.eup %5365  ;;  %v2821_v62 = vmul.f32 %v5364_v14, %v1727_v4  ;;  %v3125_v49 = vadd.f32 %v8083_v35, %v3124_v36  ;;  %v8212_v46 = vmul.f32 %v5356_v30, %v8077_v3  ;;  %v8215_v39 = vmul.f32 %v5362_v32, %v8096_v58  ;;  %v9207_v4 = vld [vmem:[#allocation117_spill] sm:$0xff] }
 0x3b3   : > { %v5368_v2 = vpop.eup %5367  ;;  %v2885_v50 = vmul.f32 %v5366_v61, %v2047_v29  ;;  %4683 = vmatprep.mubr.f32.mxu1 %v2945_v40  ;;  %v2693_v16 = vadd.f32 %v5366_v61, %v5364_v14  ;;  %3748 = vst [vmem:[%s8106_s28 + $0x28] sm:$0xff] %v3130_v7  ;;  %v9210_v61 = vld [vmem:[#allocation116_spill] sm:$0xff]  ;;  %v9213_v7 = vld [vmem:[#allocation34_spill] sm:$0xff] }
 0x3b4   : > { %v5370_v44 = vpop.eup %5369  ;;  %v2946_v52 = vmul.f32 %v5368_v2, %v8115_v20  ;;  %3747 = vst [vmem:[%s8106_s28 + $0x20] sm:$0xff] %v3125_v49  ;;  %v8219_v55 = vmul.f32 %v5368_v2, %v8121_v34 }
 0x3b5   : > { %v5372_v6 = vpop.eup %5371  ;;  %5377 = vrcp.f32 %v2693_v16  ;;  %v2822_v28 = vmul.f32 %v5370_v44, %v1732_v60  ;;  %v9214_v16 = vld [vmem:[#allocation119_spill] sm:$0xff] }
 0x3b6   : > { %v5374_v12 = vpop.eup %5373  ;;  %4684 = vmatmul.mubr.f32.gmra.mrb[186].mxu1 %v2946_v52  ;;  %v2694_v0 = vadd.f32 %v5372_v6, %v5370_v44  ;;  %v2886_v10 = vmul.f32 %v5372_v6, %v2052_v43  ;;  %v9208_v43 = vld [vmem:[#allocation30_spill] sm:$0xff]  ;;  %v9215_v44 = vld [vmem:[#allocation36_spill] sm:$0xff]  ;;  %v9217_v6 = vld [vmem:[#allocation153_spill] sm:$0xff] }
 0x3b7   : > { %v2947_v20 = vmul.f32 %v5374_v12, %v8127_v5  ;;  %v8223_v48 = vmul.f32 %v5374_v12, %v8129_v19  ;;  %v4607_v3 = vpop.f32.mrb[134].mxu1  ;;  %v2953_v29 = vmul.f32 %v9209_v1, %v9208_v43  ;;  %v2956_v49 = vmul.f32 %v9215_v44, %v9214_v16  ;;  %v9216_v52 = vld [vmem:[#allocation32_spill] sm:$0xff]  ;;  %v9228_v1 = vld [vmem:[#allocation41_spill] sm:$0xff]  ;;  %v9235_v44 = vld [vmem:[#allocation51_spill] sm:$0xff] }
 0x3b8   : > { %5379 = vrcp.f32 %v2694_v0  ;;  %v3140_v37 = vadd.f32 %v4607_v3, %v8083_v35  ;;  %v3134_v24 = vpop.f32.mrb[135].mxu1  ;;  %v9218_v3 = vld [vmem:[#allocation35_spill] sm:$0xff]  ;;  %v9234_v16 = vld [vmem:[#allocation44_spill] sm:$0xff] }
 0x3b9   : > { %4686 = vmatprep.mubr.f32.mxu1 %v2947_v20  ;;  %v3135_v9 = vadd.f32 %v8083_v35, %v3134_v24  ;;  %v9220_v24 = vld [vmem:[#allocation37_spill] sm:$0xff] }
 0x3ba   : > { %v5376_v58 = vpop.eup %5375  ;;  %3750 = vst [vmem:[%s8106_s28 + $0x38] sm:$0xff] %v3140_v37 }
 0x3bb   : > { %v2948_v30 = vmul.f32 %v5376_v58, %v2820_v47  ;;  %v8227_v63 = vmul.f32 %v5376_v58, %v2884_v21  ;;  %3749 = vst [vmem:[%s8106_s28 + $0x30] sm:$0xff] %v3135_v9  ;;  %v9205_v47 = vld [vmem:[#allocation31_spill] sm:$0xff]  ;;  %v2952_v21 = vmul.f32 %v9207_v4, %v9206_v56  ;;  %v9221_v9 = vld [vmem:[#allocation40_spill] sm:$0xff] }
 0x3bc   : > { %v9219_v58 = vld [vmem:[#allocation39_spill] sm:$0xff] }
 0x3bd   : > { %4687 = vmatmul.mubr.f32.gmra.mrb[188].mxu1 %v2948_v30  ;;  %v2958_v37 = vmul.f32 %v9219_v58, %v9218_v3  ;;  %v2959_v30 = vmul.f32 %v9221_v9, %v9220_v24  ;;  %v9226_v4 = vld [vmem:[#allocation155_spill] sm:$0xff]  ;;  %v9241_v58 = vld [vmem:[#allocation142_spill] sm:$0xff] }
 0x3be   : > { %v9240_v3 = vld [vmem:[#allocation47_spill] sm:$0xff] }
 0x3bf   : > { %v5378_v34 = vpop.eup %5377  ;;  %v4610_v57 = vpop.f32.mrb[136].mxu1 }
 0x3c0   : > { %v2949_v5 = vmul.f32 %v5378_v34, %v2821_v62  ;;  %v8231_v19 = vmul.f32 %v5378_v34, %v2885_v50  ;;  %v3150_v53 = vadd.f32 %v4610_v57, %v8083_v35  ;;  %v3144_v13 = vpop.f32.mrb[137].mxu1  ;;  %v2954_v62 = vmul.f32 %v9211_v23, %v9210_v61  ;;  %v9212_v50 = vld [vmem:[#allocation104_spill] sm:$0xff]  ;;  %v9222_v34 = vld [vmem:[#allocation38_spill] sm:$0xff] }
 0x3c1   : > { %v3145_v45 = vadd.f32 %v8083_v35, %v3144_v13  ;;  %v2955_v36 = vmul.f32 %v9213_v7, %v9212_v50  ;;  %v9232_v23 = vld [vmem:[#allocation158_spill] sm:$0xff] }
 0x3c2   : > { %v5380_v51 = vpop.eup %5379  ;;  %4689 = vmatprep.mubr.f32.mxu1 %v2949_v5  ;;  %3752 = vst [vmem:[%s8106_s28 + $0x48] sm:$0xff] %v3150_v53  ;;  %v9223_v5 = vld [vmem:[#allocation156_spill] sm:$0xff]  ;;  %v9225_v53 = vld [vmem:[#allocation42_spill] sm:$0xff] }
 0x3c3   : > { %v2950_v22 = vmul.f32 %v5380_v51, %v2822_v28  ;;  %v8235_v60 = vmul.f32 %v5380_v51, %v2886_v10  ;;  %3751 = vst [vmem:[%s8106_s28 + $0x40] sm:$0xff] %v3145_v45  ;;  %v2957_v28 = vmul.f32 %v9217_v6, %v9216_v52  ;;  %v2960_v57 = vmul.f32 %v9223_v5, %v9222_v34  ;;  %v9224_v51 = vld [vmem:[#allocation154_spill] sm:$0xff]  ;;  %v9236_v6 = vld [vmem:[#allocation160_spill] sm:$0xff] }
 0x3c4   : > { %v2961_v13 = vmul.f32 %v9225_v53, %v9224_v51  ;;  %v9242_v5 = vld [vmem:[#allocation138_spill] sm:$0xff]  ;;  %v9244_v53 = vld [vmem:[#allocation52_spill] sm:$0xff] }
 0x3c5   : > { %4690 = vmatmul.mubr.f32.gmra.mrb[190].mxu1 %v2950_v22 }
 0x3c6   : > { %4692 = vmatprep.mubr.f32.mxu1 %v9205_v47 }
 0x3c8   : > { %v4613_v32 = vpop.f32.mrb[138].mxu1 }
 0x3c9   : > { %4693 = vmatmul.mubr.f32.gmra.mrb[192].mxu1 %v2952_v21  ;;  %v3160_v14 = vadd.f32 %v4613_v32, %v8083_v35  ;;  %v3154_v40 = vpop.f32.mrb[139].mxu1  ;;  %v9227_v21 = vld [vmem:[#allocation43_spill] sm:$0xff] }
 0x3ca   : > { %4695 = vmatprep.mubr.f32.mxu1 %v2953_v29  ;;  %v3155_v2 = vadd.f32 %v8083_v35, %v3154_v40  ;;  %v2962_v43 = vmul.f32 %v9227_v21, %v9226_v4  ;;  %v9229_v29 = vld [vmem:[#allocation159_spill] sm:$0xff]  ;;  %v9231_v40 = vld [vmem:[#allocation45_spill] sm:$0xff]  ;;  %v9249_v21 = vld [vmem:[#allocation64_spill] sm:$0xff] }
 0x3cb   : > { %3754 = vst [vmem:[%s8106_s28 + $0x58] sm:$0xff] %v3160_v14  ;;  %v2963_v32 = vmul.f32 %v9229_v29, %v9228_v1  ;;  %v9230_v14 = vld [vmem:[#allocation157_spill] sm:$0xff]  ;;  %v9248_v4 = vld [vmem:[#allocation55_spill] sm:$0xff] }
 0x3cc   : > { %3753 = vst [vmem:[%s8106_s28 + $0x50] sm:$0xff] %v3155_v2  ;;  %v2964_v61 = vmul.f32 %v9231_v40, %v9230_v14  ;;  %v9250_v40 = vld [vmem:[#allocation59_spill] sm:$0xff] }
 0x3cd   : > { %4696 = vmatmul.mubr.f32.gmra.mrb[194].mxu1 %v2954_v62  ;;  %v9233_v62 = vld [vmem:[#allocation46_spill] sm:$0xff] }
 0x3ce   : > { %4698 = vmatprep.mubr.f32.mxu1 %v2955_v36  ;;  %v2965_v2 = vmul.f32 %v9233_v62, %v9232_v23  ;;  %v9252_v62 = vld [vmem:[#allocation141_spill] sm:$0xff] }
 0x3cf   : > { %v4616_v12 = vpop.f32.mrb[140].mxu1 }
 0x3d0   : > { %v3170_v0 = vadd.f32 %v4616_v12, %v8083_v35  ;;  %v3164_v10 = vpop.f32.mrb[141].mxu1 }
 0x3d1   : > { %4699 = vmatmul.mubr.f32.gmra.mrb[196].mxu1 %v2956_v49  ;;  %v3165_v20 = vadd.f32 %v8083_v35, %v3164_v10  ;;  %v2966_v49 = vmul.f32 %v9235_v44, %v9234_v16  ;;  %v9239_v10 = vld [vmem:[#allocation50_spill] sm:$0xff]  ;;  %v9256_v44 = vld [vmem:[#allocation56_spill] sm:$0xff] }
 0x3d2   : > { %4701 = vmatprep.mubr.f32.mxu1 %v2957_v28  ;;  %3756 = vst [vmem:[%s8106_s28 + $0x68] sm:$0xff] %v3170_v0  ;;  %v9237_v28 = vld [vmem:[#allocation48_spill] sm:$0xff]  ;;  %v9238_v0 = vld [vmem:[#allocation49_spill] sm:$0xff] }
 0x3d3   : > { %3755 = vst [vmem:[%s8106_s28 + $0x60] sm:$0xff] %v3165_v20  ;;  %v2967_v12 = vmul.f32 %v9237_v28, %v9236_v6  ;;  %v2968_v20 = vmul.f32 %v9239_v10, %v9238_v0  ;;  %v9258_v0 = vld [vmem:[#allocation69_spill] sm:$0xff]  ;;  %v9259_v10 = vld [vmem:[#allocation152_spill] sm:$0xff] }
 0x3d5   : > { %4702 = vmatmul.mubr.f32.gmra.mrb[198].mxu1 %v2958_v37  ;;  %v2969_v37 = vmul.f32 %v9241_v58, %v9240_v3  ;;  %v9260_v58 = vld [vmem:[#allocation150_spill] sm:$0xff] }
 0x3d6   : > { %4704 = vmatprep.mubr.f32.mxu1 %v2959_v30 }
 0x3d7   : > { %v4619_v45 = vpop.f32.mrb[142].mxu1 }
 0x3d8   : > { %v3180_v22 = vadd.f32 %v4619_v45, %v8083_v35  ;;  %v3174_v47 = vpop.f32.mrb[143].mxu1 }
 0x3d9   : > { %4705 = vmatmul.mubr.f32.gmra.mrb[200].mxu1 %v2960_v57  ;;  %v3175_v56 = vadd.f32 %v8083_v35, %v3174_v47  ;;  %v9243_v57 = vld [vmem:[#allocation54_spill] sm:$0xff]  ;;  %v9247_v47 = vld [vmem:[#allocation57_spill] sm:$0xff] }
 0x3da   : > { %4707 = vmatprep.mubr.f32.mxu1 %v2961_v13  ;;  %3758 = vst [vmem:[%s8106_s28 + $0x78] sm:$0xff] %v3180_v22  ;;  %v2970_v51 = vmul.f32 %v9243_v57, %v9242_v5  ;;  %v9245_v13 = vld [vmem:[#allocation53_spill] sm:$0xff] }
 0x3db   : > { %3757 = vst [vmem:[%s8106_s28 + $0x70] sm:$0xff] %v3175_v56  ;;  %v2971_v45 = vmul.f32 %v9245_v13, %v9244_v53  ;;  %v9246_v22 = vld [vmem:[#allocation137_spill] sm:$0xff] }
 0x3dc   : > { %v2972_v56 = vmul.f32 %v9247_v47, %v9246_v22  ;;  %v9264_v5 = vld [vmem:[#allocation149_spill] sm:$0xff]  ;;  %v9266_v47 = vld [vmem:[#allocation84_spill] sm:$0xff] }
 0x3dd   : > { %4708 = vmatmul.mubr.f32.gmra.mrb[202].mxu1 %v2962_v43  ;;  %v2973_v43 = vmul.f32 %v9249_v21, %v9248_v4  ;;  %v9265_v57 = vld [vmem:[#allocation65_spill] sm:$0xff]  ;;  %v9268_v21 = vld [vmem:[#allocation88_spill] sm:$0xff] }
 0x3de   : > { %4710 = vmatprep.mubr.f32.mxu1 %v2963_v32 }
 0x3e0   : > { %v4622_v50 = vpop.f32.mrb[144].mxu1 }
 0x3e1   : > { %4711 = vmatmul.mubr.f32.gmra.mrb[204].mxu1 %v2964_v61  ;;  %v3190_v7 = vadd.f32 %v4622_v50, %v8083_v35  ;;  %v3184_v36 = vpop.f32.mrb[145].mxu1  ;;  %v9251_v61 = vld [vmem:[#allocation146_spill] sm:$0xff] }
 0x3e2   : > { %4713 = vmatprep.mubr.f32.mxu1 %v2965_v2  ;;  %v3185_v52 = vadd.f32 %v8083_v35, %v3184_v36  ;;  %v2974_v23 = vmul.f32 %v9251_v61, %v9250_v40  ;;  %v9253_v2 = vld [vmem:[#allocation60_spill] sm:$0xff]  ;;  %v9255_v36 = vld [vmem:[#allocation74_spill] sm:$0xff]  ;;  %v9272_v40 = vld [vmem:[#allocation81_spill] sm:$0xff] }
 0x3e3   : > { %3760 = vst [vmem:[%s8106_s28 + $0x88] sm:$0xff] %v3190_v7  ;;  %v2975_v50 = vmul.f32 %v9253_v2, %v9252_v62  ;;  %v9254_v7 = vld [vmem:[#allocation145_spill] sm:$0xff] }
 0x3e4   : > { %3759 = vst [vmem:[%s8106_s28 + $0x80] sm:$0xff] %v3185_v52  ;;  %v2976_v16 = vmul.f32 %v9255_v36, %v9254_v7  ;;  %v9273_v61 = vld [vmem:[#allocation105_spill] sm:$0xff]  ;;  %v9274_v36 = vld [vmem:[#allocation63_spill] sm:$0xff] }
 0x3e5   : > { %4714 = vmatmul.mubr.f32.gmra.mrb[206].mxu1 %v2966_v49  ;;  %v9257_v49 = vld [vmem:[#allocation58_spill] sm:$0xff] }
 0x3e6   : > { %4716 = vmatprep.mubr.f32.mxu1 %v2967_v12  ;;  %v2977_v52 = vmul.f32 %v9257_v49, %v9256_v44  ;;  %v9276_v49 = vld [vmem:[#allocation99_spill] sm:$0xff] }
 0x3e7   : > { %v4625_v24 = vpop.f32.mrb[146].mxu1 }
 0x3e8   : > { %v3200_v9 = vadd.f32 %v4625_v24, %v8083_v35  ;;  %v3194_v30 = vpop.f32.mrb[147].mxu1 }
 0x3e9   : > { %4717 = vmatmul.mubr.f32.gmra.mrb[208].mxu1 %v2968_v20  ;;  %v3195_v34 = vadd.f32 %v8083_v35, %v3194_v30  ;;  %v2978_v20 = vmul.f32 %v9259_v10, %v9258_v0  ;;  %v9263_v30 = vld [vmem:[#allocation61_spill] sm:$0xff]  ;;  %v9280_v10 = vld [vmem:[#allocation110_spill] sm:$0xff] }
 0x3ea   : > { %4719 = vmatprep.mubr.f32.mxu1 %v2969_v37  ;;  %3762 = vst [vmem:[%s8106_s28 + $0x98] sm:$0xff] %v3200_v9  ;;  %v9261_v37 = vld [vmem:[#allocation62_spill] sm:$0xff]  ;;  %v9262_v9 = vld [vmem:[#allocation79_spill] sm:$0xff] }
 0x3eb   : > { %3761 = vst [vmem:[%s8106_s28 + $0x90] sm:$0xff] %v3195_v34  ;;  %v2979_v24 = vmul.f32 %v9261_v37, %v9260_v58  ;;  %v2980_v34 = vmul.f32 %v9263_v30, %v9262_v9  ;;  %v9282_v9 = vld [vmem:[#allocation92_spill] sm:$0xff]  ;;  %v9283_v30 = vld [vmem:[#allocation113_spill] sm:$0xff] }
 0x3ed   : > { %4720 = vmatmul.mubr.f32.gmra.mrb[210].mxu1 %v2970_v51  ;;  %v2981_v51 = vmul.f32 %v9265_v57, %v9264_v5  ;;  %v9284_v57 = vld [vmem:[#allocation112_spill] sm:$0xff] }
 0x3ee   : > { %4722 = vmatprep.mubr.f32.mxu1 %v2971_v45 }
 0x3ef   : > { %v4628_v1 = vpop.f32.mrb[148].mxu1 }
 0x3f0   : > { %v3210_v29 = vadd.f32 %v4628_v1, %v8083_v35  ;;  %v3204_v32 = vpop.f32.mrb[149].mxu1 }
 0x3f1   : > { %4723 = vmatmul.mubr.f32.gmra.mrb[212].mxu1 %v2972_v56  ;;  %v3205_v14 = vadd.f32 %v8083_v35, %v3204_v32  ;;  %v9267_v56 = vld [vmem:[#allocation93_spill] sm:$0xff]  ;;  %v9271_v32 = vld [vmem:[#allocation67_spill] sm:$0xff] }
 0x3f2   : > { %4725 = vmatprep.mubr.f32.mxu1 %v2973_v43  ;;  %3764 = vst [vmem:[%s8106_s28 + $0xa8] sm:$0xff] %v3210_v29  ;;  %v2982_v4 = vmul.f32 %v9267_v56, %v9266_v47  ;;  %v9269_v43 = vld [vmem:[#allocation85_spill] sm:$0xff] }
 0x3f3   : > { %3763 = vst [vmem:[%s8106_s28 + $0xa0] sm:$0xff] %v3205_v14  ;;  %v2983_v1 = vmul.f32 %v9269_v43, %v9268_v21  ;;  %v9270_v29 = vld [vmem:[#allocation25_spill] sm:$0xff] }
 0x3f4   : > { %v2984_v14 = vmul.f32 %v9271_v32, %v9270_v29 }
 0x3f5   : > { %4726 = vmatmul.mubr.f32.gmra.mrb[214].mxu1 %v2974_v23  ;;  %v2985_v23 = vmul.f32 %v9273_v61, %v9272_v40 }
 0x3f6   : > { %4728 = vmatprep.mubr.f32.mxu1 %v2975_v50 }
 0x3f8   : > { %v4631_v6 = vpop.f32.mrb[150].mxu1 }
 0x3f9   : > { %4729 = vmatmul.mubr.f32.gmra.mrb[216].mxu1 %v2976_v16  ;;  %v3220_v28 = vadd.f32 %v4631_v6, %v8083_v35  ;;  %v3214_v12 = vpop.f32.mrb[151].mxu1  ;;  %v9275_v16 = vld [vmem:[#allocation66_spill] sm:$0xff] }
 0x3fa   : > { %4731 = vmatprep.mubr.f32.mxu1 %v2977_v52  ;;  %v3215_v3 = vadd.f32 %v8083_v35, %v3214_v12  ;;  %v2986_v44 = vmul.f32 %v9275_v16, %v9274_v36  ;;  %v9277_v52 = vld [vmem:[#allocation101_spill] sm:$0xff]  ;;  %v9279_v12 = vld [vmem:[#allocation70_spill] sm:$0xff] }
 0x3fb   : > { %3766 = vst [vmem:[%s8106_s28 + $0xb8] sm:$0xff] %v3220_v28  ;;  %v2987_v6 = vmul.f32 %v9277_v52, %v9276_v49  ;;  %v9278_v28 = vld [vmem:[#allocation29_spill] sm:$0xff] }
 0x3fc   : > { %3765 = vst [vmem:[%s8106_s28 + $0xb0] sm:$0xff] %v3215_v3  ;;  %v2988_v0 = vmul.f32 %v9279_v12, %v9278_v28 }
 0x3fd   : > { %4732 = vmatmul.mubr.f32.gmra.mrb[218].mxu1 %v2978_v20  ;;  %v9281_v20 = vld [vmem:[#allocation68_spill] sm:$0xff] }
 0x3fe   : > { %4734 = vmatprep.mubr.f32.mxu1 %v2979_v24  ;;  %v2989_v3 = vmul.f32 %v9281_v20, %v9280_v10 }
 0x400   : > { %v4634_v53 = vpop.f32.mrb[152].mxu1 }
 0x401   : > { %4735 = vmatmul.mubr.f32.gmra.mrb[220].mxu1 %v2980_v34  ;;  %v3230_v13 = vadd.f32 %v4634_v53, %v8083_v35  ;;  %v3224_v45 = vpop.f32.mrb[153].mxu1  ;;  %v2990_v34 = vmul.f32 %v9283_v30, %v9282_v9 }
 0x402   : > { %4737 = vmatprep.mubr.f32.mxu1 %v2981_v51  ;;  %v3225_v22 = vadd.f32 %v8083_v35, %v3224_v45  ;;  %v9285_v51 = vld [vmem:[#allocation72_spill] sm:$0xff]  ;;  %v9287_v45 = vld [vmem:[#allocation118_spill] sm:$0xff] }
 0x403   : > { %3768 = vst [vmem:[%s8106_s28 + $0xc8] sm:$0xff] %v3230_v13  ;;  %v2991_v53 = vmul.f32 %v9285_v51, %v9284_v57  ;;  %v9286_v13 = vld [vmem:[#allocation114_spill] sm:$0xff] }
 0x404   : > { %3767 = vst [vmem:[%s8106_s28 + $0xc0] sm:$0xff] %v3225_v22  ;;  %v2992_v22 = vmul.f32 %v9287_v45, %v9286_v13 }
 0x405   : > { %4738 = vmatmul.mubr.f32.gmra.mrb[222].mxu1 %v2982_v4 }
 0x406   : > { %4740 = vmatprep.mubr.f32.mxu1 %v2983_v1 }
 0x408   : > { %v4637_v62 = vpop.f32.mrb[154].mxu1 }
 0x409   : > { %4741 = vmatmul.mubr.f32.gmra.mrb[224].mxu1 %v2984_v14  ;;  %v3240_v2 = vadd.f32 %v4637_v62, %v8083_v35  ;;  %v3234_v50 = vpop.f32.mrb[155].mxu1 }
 0x40a   : > { %4743 = vmatprep.mubr.f32.mxu1 %v2985_v23  ;;  %v3235_v7 = vadd.f32 %v8083_v35, %v3234_v50 }
 0x40b   : > { %3770 = vst [vmem:[%s8106_s28 + $0xd8] sm:$0xff] %v3240_v2 }
 0x40c   : > { %3769 = vst [vmem:[%s8106_s28 + $0xd0] sm:$0xff] %v3235_v7 }
 0x40d   : > { %4744 = vmatmul.mubr.f32.gmra.mrb[226].mxu1 %v2986_v44 }
 0x40e   : > { %4746 = vmatprep.mubr.f32.mxu1 %v2987_v6 }
 0x411   : > { %4747 = vmatmul.mubr.f32.gmra.mrb[228].mxu1 %v2988_v0  ;;  %v4640_v58 = vpop.f32.mrb[156].mxu1 }
 0x412   : > { %4749 = vmatprep.mubr.f32.mxu1 %v2989_v3  ;;  %v3250_v37 = vadd.f32 %v4640_v58, %v8083_v35  ;;  %v3244_v24 = vpop.f32.mrb[157].mxu1 }
 0x413   : > { %v3245_v5 = vadd.f32 %v8083_v35, %v3244_v24 }
 0x414   : > { %3772 = vst [vmem:[%s8106_s28 + $0xe8] sm:$0xff] %v3250_v37 }
 0x415   : > { %4750 = vmatmul.mubr.f32.gmra.mrb[230].mxu1 %v2990_v34  ;;  %3771 = vst [vmem:[%s8106_s28 + $0xe0] sm:$0xff] %v3245_v5 }
 0x416   : > { %4752 = vmatprep.mubr.f32.mxu1 %v2991_v53 }
 0x419   : > { %v4643_v47 = vpop.f32.mrb[158].mxu1  ;;  %4753 = vmatmul.mubr.f32.gmra.mrb[232].mxu1 %v2992_v22 }
 0x41a   : > { %v3260_v56 = vadd.f32 %v4643_v47, %v8083_v35  ;;  %v3254_v4 = vpop.f32.mrb[159].mxu1  ;;  %4755 = vmatprep.mubr.f32.mxu1 %v8148_v17 }
 0x41b   : > { %v3255_v21 = vadd.f32 %v8083_v35, %v3254_v4 }
 0x41c   : > { %3774 = vst [vmem:[%s8106_s28 + $0xf8] sm:$0xff] %v3260_v56 }
 0x41d   : > { %3773 = vst [vmem:[%s8106_s28 + $0xf0] sm:$0xff] %v3255_v21  ;;  %4756 = vmatmul.mubr.f32.gmra.mrb[234].mxu1 %v8152_v38 }
 0x41e   : > { %4758 = vmatprep.mubr.f32.mxu1 %v8156_v33 }
 0x421   : > { %v4646_v43 = vpop.f32.mrb[160].mxu1  ;;  %4759 = vmatmul.mubr.f32.gmra.mrb[236].mxu1 %v8160_v26 }
 0x422   : > { %v3270_v1 = vadd.f32 %v4646_v43, %v8083_v35  ;;  %v3264_v29 = vpop.f32.mrb[161].mxu1  ;;  %4761 = vmatprep.mubr.f32.mxu1 %v8164_v15 }
 0x423   : > { %v3265_v17 = vadd.f32 %v8083_v35, %v3264_v29 }
 0x424   : > { %3776 = vst [vmem:[%s8106_s28 + $0x108] sm:$0xff] %v3270_v1 }
 0x425   : > { %3775 = vst [vmem:[%s8106_s28 + $0x100] sm:$0xff] %v3265_v17  ;;  %4762 = vmatmul.mubr.f32.gmra.mrb[238].mxu1 %v8168_v11 }
 0x426   : > { %4764 = vmatprep.mubr.f32.mxu1 %v8173_v8 }
 0x429   : > { %4765 = vmatmul.mubr.f32.gmra.mrb[240].mxu1 %v8177_v42 }
 0x42a   : > { %v4649_v38 = vpop.f32.mrb[162].mxu1  ;;  %4767 = vmatprep.mubr.f32.mxu1 %v8181_v31 }
 0x42b   : > { %v3280_v33 = vadd.f32 %v4649_v38, %v8083_v35  ;;  %v3274_v26 = vpop.f32.mrb[163].mxu1 }
 0x42c   : > { %v3275_v15 = vadd.f32 %v8083_v35, %v3274_v26 }
 0x42d   : > { %3778 = vst [vmem:[%s8106_s28 + $0x118] sm:$0xff] %v3280_v33  ;;  %4768 = vmatmul.mubr.f32.gmra.mrb[242].mxu1 %v8185_v54 }
 0x42e   : > { %3777 = vst [vmem:[%s8106_s28 + $0x110] sm:$0xff] %v3275_v15  ;;  %4770 = vmatprep.mubr.f32.mxu1 %v8189_v25 }
 0x431   : > { %v4652_v11 = vpop.f32.mrb[164].mxu1  ;;  %4771 = vmatmul.mubr.f32.gmra.mrb[244].mxu1 %v8193_v18 }
 0x432   : > { %v3290_v8 = vadd.f32 %v4652_v11, %v8083_v35  ;;  %v3284_v42 = vpop.f32.mrb[165].mxu1  ;;  %4773 = vmatprep.mubr.f32.mxu1 %v8198_v41 }
 0x433   : > { %v3285_v31 = vadd.f32 %v8083_v35, %v3284_v42 }
 0x434   : > { %3780 = vst [vmem:[%s8106_s28 + $0x128] sm:$0xff] %v3290_v8 }
 0x435   : > { %3779 = vst [vmem:[%s8106_s28 + $0x120] sm:$0xff] %v3285_v31  ;;  %4774 = vmatmul.mubr.f32.gmra.mrb[246].mxu1 %v8204_v27 }
 0x436   : > { %4776 = vmatprep.mubr.f32.mxu1 %v8208_v59 }
 0x439   : > { %v4655_v54 = vpop.f32.mrb[166].mxu1  ;;  %4777 = vmatmul.mubr.f32.gmra.mrb[248].mxu1 %v8212_v46 }
 0x43a   : > { %v3300_v25 = vadd.f32 %v4655_v54, %v8083_v35  ;;  %v3294_v18 = vpop.f32.mrb[167].mxu1  ;;  %4779 = vmatprep.mubr.f32.mxu1 %v8215_v39 }
 0x43b   : > { %v3295_v41 = vadd.f32 %v8083_v35, %v3294_v18 }
 0x43c   : > { %3782 = vst [vmem:[%s8106_s28 + $0x138] sm:$0xff] %v3300_v25 }
 0x43d   : > { %3781 = vst [vmem:[%s8106_s28 + $0x130] sm:$0xff] %v3295_v41  ;;  %4780 = vmatmul.mubr.f32.gmra.mrb[250].mxu1 %v8219_v55 }
 0x43e   : > { %4782 = vmatprep.mubr.f32.mxu1 %v8223_v48 }
 0x441   : > { %4783 = vmatmul.mubr.f32.gmra.mrb[252].mxu1 %v8227_v63 }
 0x442   : > { %v4658_v27 = vpop.f32.mrb[168].mxu1  ;;  %4785 = vmatprep.mubr.f32.mxu1 %v8231_v19 }
 0x443   : > { %v3310_v59 = vadd.f32 %v4658_v27, %v8083_v35  ;;  %v3304_v46 = vpop.f32.mrb[169].mxu1 }
 0x444   : > { %v3305_v39 = vadd.f32 %v8083_v35, %v3304_v46 }
 0x445   : > { %3784 = vst [vmem:[%s8106_s28 + $0x148] sm:$0xff] %v3310_v59  ;;  %4786 = vmatmul.mubr.f32.gmra.mrb[254].mxu1 %v8235_v60 }
 0x446   : > { %3783 = vst [vmem:[%s8106_s28 + $0x140] sm:$0xff] %v3305_v39 }
 0x449   : > { %v4661_v55 = vpop.f32.mrb[170].mxu1 }
 0x44a   : > { %v3320_v48 = vadd.f32 %v4661_v55, %v8083_v35  ;;  %v3314_v63 = vpop.f32.mrb[171].mxu1 }
 0x44b   : > { %v3315_v32 = vadd.f32 %v8083_v35, %v3314_v63 }
 0x44c   : > { %3786 = vst [vmem:[%s8106_s28 + $0x158] sm:$0xff] %v3320_v48 }
 0x44d   : > { %3785 = vst [vmem:[%s8106_s28 + $0x150] sm:$0xff] %v3315_v32 }
 0x451   : > { %v4664_v19 = vpop.f32.mrb[172].mxu1 }
 0x452   : > { %v3330_v14 = vadd.f32 %v4664_v19, %v8083_v35  ;;  %v3324_v40 = vpop.f32.mrb[173].mxu1 }
 0x453   : > { %v3325_v61 = vadd.f32 %v8083_v35, %v3324_v40 }
 0x454   : > { %3788 = vst [vmem:[%s8106_s28 + $0x168] sm:$0xff] %v3330_v14 }
 0x455   : > { %3787 = vst [vmem:[%s8106_s28 + $0x160] sm:$0xff] %v3325_v61 }
 0x45a   : > { %v4667_v60 = vpop.f32.mrb[174].mxu1 }
 0x45b   : > { %v3340_v23 = vadd.f32 %v4667_v60, %v8083_v35  ;;  %v3334_v62 = vpop.f32.mrb[175].mxu1 }
 0x45c   : > { %v3335_v2 = vadd.f32 %v8083_v35, %v3334_v62 }
 0x45d   : > { %3790 = vst [vmem:[%s8106_s28 + $0x178] sm:$0xff] %v3340_v23 }
 0x45e   : > { %3789 = vst [vmem:[%s8106_s28 + $0x170] sm:$0xff] %v3335_v2 }
 0x461   : > { %v4670_v50 = vpop.f32.mrb[176].mxu1 }
 0x462   : > { %v3350_v7 = vadd.f32 %v4670_v50, %v8083_v35  ;;  %v3344_v36 = vpop.f32.mrb[177].mxu1 }
 0x463   : > { %v3345_v16 = vadd.f32 %v8083_v35, %v3344_v36 }
 0x464   : > { %3792 = vst [vmem:[%s8106_s28 + $0x188] sm:$0xff] %v3350_v7 }
 0x465   : > { %3791 = vst [vmem:[%s8106_s28 + $0x180] sm:$0xff] %v3345_v16 }
 0x469   : > { %v4673_v44 = vpop.f32.mrb[178].mxu1 }
 0x46a   : > { %v3360_v49 = vadd.f32 %v4673_v44, %v8083_v35  ;;  %v3354_v52 = vpop.f32.mrb[179].mxu1 }
 0x46b   : > { %v3355_v6 = vadd.f32 %v8083_v35, %v3354_v52 }
 0x46c   : > { %3794 = vst [vmem:[%s8106_s28 + $0x198] sm:$0xff] %v3360_v49 }
 0x46d   : > { %3793 = vst [vmem:[%s8106_s28 + $0x190] sm:$0xff] %v3355_v6 }
 0x472   : > { %v4676_v28 = vpop.f32.mrb[180].mxu1 }
 0x473   : > { %v3370_v12 = vadd.f32 %v4676_v28, %v8083_v35  ;;  %v3364_v0 = vpop.f32.mrb[181].mxu1 }
 0x474   : > { %v3365_v10 = vadd.f32 %v8083_v35, %v3364_v0 }
 0x475   : > { %3796 = vst [vmem:[%s8106_s28 + $0x1a8] sm:$0xff] %v3370_v12 }
 0x476   : > { %3795 = vst [vmem:[%s8106_s28 + $0x1a0] sm:$0xff] %v3365_v10 }
 0x479   : > { %v4679_v20 = vpop.f32.mrb[182].mxu1 }
 0x47a   : > { %v3380_v3 = vadd.f32 %v4679_v20, %v8083_v35  ;;  %v3374_v58 = vpop.f32.mrb[183].mxu1 }
 0x47b   : > { %v3375_v37 = vadd.f32 %v8083_v35, %v3374_v58 }
 0x47c   : > { %3798 = vst [vmem:[%s8106_s28 + $0x1b8] sm:$0xff] %v3380_v3 }
 0x47d   : > { %3797 = vst [vmem:[%s8106_s28 + $0x1b0] sm:$0xff] %v3375_v37 }
 0x481   : > { %v4682_v24 = vpop.f32.mrb[184].mxu1 }
 0x482   : > { %v3390_v9 = vadd.f32 %v4682_v24, %v8083_v35  ;;  %v3384_v30 = vpop.f32.mrb[185].mxu1 }
 0x483   : > { %v3385_v34 = vadd.f32 %v8083_v35, %v3384_v30 }
 0x484   : > { %3800 = vst [vmem:[%s8106_s28 + $0x1c8] sm:$0xff] %v3390_v9 }
 0x485   : > { %3799 = vst [vmem:[%s8106_s28 + $0x1c0] sm:$0xff] %v3385_v34 }
 0x489   : > { %v4685_v5 = vpop.f32.mrb[186].mxu1 }
 0x48a   : > { %v3400_v57 = vadd.f32 %v4685_v5, %v8083_v35  ;;  %v3394_v51 = vpop.f32.mrb[187].mxu1 }
 0x48b   : > { %v3395_v53 = vadd.f32 %v8083_v35, %v3394_v51 }
 0x48c   : > { %3802 = vst [vmem:[%s8106_s28 + $0x1d8] sm:$0xff] %v3400_v57 }
 0x48d   : > { %3801 = vst [vmem:[%s8106_s28 + $0x1d0] sm:$0xff] %v3395_v53 }
 0x490   : > { %v4688_v13 = vpop.f32.mrb[188].mxu1 }
 0x491   : > { %v3410_v45 = vadd.f32 %v4688_v13, %v8083_v35  ;;  %v3404_v22 = vpop.f32.mrb[189].mxu1 }
 0x492   : > { %v3405_v47 = vadd.f32 %v8083_v35, %v3404_v22 }
 0x493   : > { %3804 = vst [vmem:[%s8106_s28 + $0x1e8] sm:$0xff] %v3410_v45 }
 0x494   : > { %3803 = vst [vmem:[%s8106_s28 + $0x1e0] sm:$0xff] %v3405_v47 }
 0x498   : > { %v4691_v56 = vpop.f32.mrb[190].mxu1 }
 0x499   : > { %v3420_v4 = vadd.f32 %v4691_v56, %v8083_v35  ;;  %v3414_v21 = vpop.f32.mrb[191].mxu1 }
 0x49a   : > { %v3415_v43 = vadd.f32 %v8083_v35, %v3414_v21 }
 0x49b   : > { %3806 = vst [vmem:[%s8106_s28 + $0x1f8] sm:$0xff] %v3420_v4 }
 0x49c   : > { %3805 = vst [vmem:[%s8106_s28 + $0x1f0] sm:$0xff] %v3415_v43  ;;  %v4694_v1 = vpop.f32.mrb[192].mxu1 }
 0x49d   : > { %v3430_v29 = vadd.f32 %v4694_v1, %v8083_v35  ;;  %v3424_v17 = vpop.f32.mrb[193].mxu1 }
 0x49e   : > { %v3425_v38 = vadd.f32 %v8083_v35, %v3424_v17  ;;  %v8516_v17 = vld [vmem:[#allocation10] ss:$0 sm:$0xff] }
 0x49f   : > { %3808 = vst [vmem:[%s8106_s28 + $0x208] sm:$0xff] %v3430_v29 }
 0x4a0   : > { %3807 = vst [vmem:[%s8106_s28 + $0x200] sm:$0xff] %v3425_v38  ;;  %v4697_v33 = vpop.f32.mrb[194].mxu1 }
 0x4a1   : > { %v3440_v26 = vadd.f32 %v4697_v33, %v8083_v35  ;;  %v3434_v15 = vpop.f32.mrb[195].mxu1 }
 0x4a2   : > { %v3435_v11 = vadd.f32 %v8083_v35, %v3434_v15 }
 0x4a3   : > { %3810 = vst [vmem:[%s8106_s28 + $0x218] sm:$0xff] %v3440_v26 }
 0x4a4   : > { %3809 = vst [vmem:[%s8106_s28 + $0x210] sm:$0xff] %v3435_v11  ;;  %v4700_v8 = vpop.f32.mrb[196].mxu1 }
 0x4a5   : > { %v3450_v42 = vadd.f32 %v4700_v8, %v8083_v35  ;;  %v3444_v31 = vpop.f32.mrb[197].mxu1 }
 0x4a6   : > { %v3445_v54 = vadd.f32 %v8083_v35, %v3444_v31 }
 0x4a7   : > { %3812 = vst [vmem:[%s8106_s28 + $0x228] sm:$0xff] %v3450_v42 }
 0x4a8   : > { %3811 = vst [vmem:[%s8106_s28 + $0x220] sm:$0xff] %v3445_v54  ;;  %v4703_v25 = vpop.f32.mrb[198].mxu1 }
 0x4a9   : > { %v3460_v18 = vadd.f32 %v4703_v25, %v8083_v35  ;;  %v3454_v41 = vpop.f32.mrb[199].mxu1 }
 0x4aa   : > { %v3455_v27 = vadd.f32 %v8083_v35, %v3454_v41 }
 0x4ab   : > { %3814 = vst [vmem:[%s8106_s28 + $0x238] sm:$0xff] %v3460_v18 }
 0x4ac   : > { %3813 = vst [vmem:[%s8106_s28 + $0x230] sm:$0xff] %v3455_v27  ;;  %v4706_v59 = vpop.f32.mrb[200].mxu1 }
 0x4ad   : > { %v3470_v46 = vadd.f32 %v4706_v59, %v8083_v35  ;;  %v3464_v39 = vpop.f32.mrb[201].mxu1 }
 0x4ae   : > { %v3465_v55 = vadd.f32 %v8083_v35, %v3464_v39 }
 0x4af   : > { %3816 = vst [vmem:[%s8106_s28 + $0x248] sm:$0xff] %v3470_v46 }
 0x4b0   : > { %3815 = vst [vmem:[%s8106_s28 + $0x240] sm:$0xff] %v3465_v55  ;;  %v4709_v48 = vpop.f32.mrb[202].mxu1 }
 0x4b1   : > { %v3480_v63 = vadd.f32 %v4709_v48, %v8083_v35  ;;  %v3474_v32 = vpop.f32.mrb[203].mxu1 }
 0x4b2   : > { %v3475_v19 = vadd.f32 %v8083_v35, %v3474_v32 }
 0x4b3   : > { %3818 = vst [vmem:[%s8106_s28 + $0x258] sm:$0xff] %v3480_v63 }
 0x4b4   : > { %3817 = vst [vmem:[%s8106_s28 + $0x250] sm:$0xff] %v3475_v19  ;;  %v4712_v14 = vpop.f32.mrb[204].mxu1 }
 0x4b5   : > { %v3490_v40 = vadd.f32 %v4712_v14, %v8083_v35  ;;  %v3484_v61 = vpop.f32.mrb[205].mxu1 }
 0x4b6   : > { %v3485_v60 = vadd.f32 %v8083_v35, %v3484_v61 }
 0x4b7   : > { %3820 = vst [vmem:[%s8106_s28 + $0x268] sm:$0xff] %v3490_v40 }
 0x4b8   : > { %3819 = vst [vmem:[%s8106_s28 + $0x260] sm:$0xff] %v3485_v60  ;;  %v4715_v23 = vpop.f32.mrb[206].mxu1 }
 0x4b9   : > { %v3500_v62 = vadd.f32 %v4715_v23, %v8083_v35  ;;  %v3494_v2 = vpop.f32.mrb[207].mxu1 }
 0x4ba   : > { %v3495_v50 = vadd.f32 %v8083_v35, %v3494_v2 }
 0x4bb   : > { %3822 = vst [vmem:[%s8106_s28 + $0x278] sm:$0xff] %v3500_v62 }
 0x4bc   : > { %3821 = vst [vmem:[%s8106_s28 + $0x270] sm:$0xff] %v3495_v50  ;;  %v4718_v7 = vpop.f32.mrb[208].mxu1 }
 0x4bd   : > { %v3510_v36 = vadd.f32 %v4718_v7, %v8083_v35  ;;  %v3504_v16 = vpop.f32.mrb[209].mxu1 }
 0x4be   : > { %v3505_v44 = vadd.f32 %v8083_v35, %v3504_v16 }
 0x4bf   : > { %3824 = vst [vmem:[%s8106_s28 + $0x288] sm:$0xff] %v3510_v36 }
 0x4c0   : > { %3823 = vst [vmem:[%s8106_s28 + $0x280] sm:$0xff] %v3505_v44  ;;  %v4721_v49 = vpop.f32.mrb[210].mxu1 }
 0x4c1   : > { %v3520_v52 = vadd.f32 %v4721_v49, %v8083_v35  ;;  %v3514_v6 = vpop.f32.mrb[211].mxu1 }
 0x4c2   : > { %v3515_v28 = vadd.f32 %v8083_v35, %v3514_v6 }
 0x4c3   : > { %3826 = vst [vmem:[%s8106_s28 + $0x298] sm:$0xff] %v3520_v52 }
 0x4c4   : > { %3825 = vst [vmem:[%s8106_s28 + $0x290] sm:$0xff] %v3515_v28  ;;  %v4724_v12 = vpop.f32.mrb[212].mxu1 }
 0x4c5   : > { %v3530_v0 = vadd.f32 %v4724_v12, %v8083_v35  ;;  %v3524_v10 = vpop.f32.mrb[213].mxu1 }
 0x4c6   : > { %v3525_v20 = vadd.f32 %v8083_v35, %v3524_v10 }
 0x4c7   : > { %3828 = vst [vmem:[%s8106_s28 + $0x2a8] sm:$0xff] %v3530_v0 }
 0x4c8   : > { %3827 = vst [vmem:[%s8106_s28 + $0x2a0] sm:$0xff] %v3525_v20  ;;  %v4727_v3 = vpop.f32.mrb[214].mxu1 }
 0x4c9   : > { %v3540_v58 = vadd.f32 %v4727_v3, %v8083_v35  ;;  %v3534_v37 = vpop.f32.mrb[215].mxu1 }
 0x4ca   : > { %v3535_v24 = vadd.f32 %v8083_v35, %v3534_v37 }
 0x4cb   : > { %3830 = vst [vmem:[%s8106_s28 + $0x2b8] sm:$0xff] %v3540_v58 }
 0x4cc   : > { %3829 = vst [vmem:[%s8106_s28 + $0x2b0] sm:$0xff] %v3535_v24  ;;  %v4730_v9 = vpop.f32.mrb[216].mxu1 }
 0x4cd   : > { %v3550_v30 = vadd.f32 %v4730_v9, %v8083_v35  ;;  %v3544_v34 = vpop.f32.mrb[217].mxu1 }
 0x4ce   : > { %v3545_v5 = vadd.f32 %v8083_v35, %v3544_v34 }
 0x4cf   : > { %3832 = vst [vmem:[%s8106_s28 + $0x2c8] sm:$0xff] %v3550_v30 }
 0x4d0   : > { %3831 = vst [vmem:[%s8106_s28 + $0x2c0] sm:$0xff] %v3545_v5  ;;  %v4733_v57 = vpop.f32.mrb[218].mxu1 }
 0x4d1   : > { %v3560_v51 = vadd.f32 %v4733_v57, %v8083_v35  ;;  %v3554_v53 = vpop.f32.mrb[219].mxu1 }
 0x4d2   : > { %v3555_v13 = vadd.f32 %v8083_v35, %v3554_v53 }
 0x4d3   : > { %3834 = vst [vmem:[%s8106_s28 + $0x2d8] sm:$0xff] %v3560_v51 }
 0x4d4   : > { %3833 = vst [vmem:[%s8106_s28 + $0x2d0] sm:$0xff] %v3555_v13  ;;  %v4736_v45 = vpop.f32.mrb[220].mxu1 }
 0x4d5   : > { %v3570_v22 = vadd.f32 %v4736_v45, %v8083_v35  ;;  %v3564_v47 = vpop.f32.mrb[221].mxu1 }
 0x4d6   : > { %v3565_v56 = vadd.f32 %v8083_v35, %v3564_v47 }
 0x4d7   : > { %3836 = vst [vmem:[%s8106_s28 + $0x2e8] sm:$0xff] %v3570_v22 }
 0x4d8   : > { %3835 = vst [vmem:[%s8106_s28 + $0x2e0] sm:$0xff] %v3565_v56  ;;  %v4739_v4 = vpop.f32.mrb[222].mxu1 }
 0x4d9   : > { %v3580_v21 = vadd.f32 %v4739_v4, %v8083_v35  ;;  %v3574_v43 = vpop.f32.mrb[223].mxu1 }
 0x4da   : > { %v3575_v1 = vadd.f32 %v8083_v35, %v3574_v43 }
 0x4db   : > { %3838 = vst [vmem:[%s8106_s28 + $0x2f8] sm:$0xff] %v3580_v21 }
 0x4dc   : > { %3837 = vst [vmem:[%s8106_s28 + $0x2f0] sm:$0xff] %v3575_v1  ;;  %v4742_v29 = vpop.f32.mrb[224].mxu1 }
 0x4dd   : > { %v3590_v38 = vadd.f32 %v8516_v17, %v4742_v29  ;;  %v3584_v33 = vpop.f32.mrb[225].mxu1 }
 0x4de   : > { %v3585_v26 = vadd.f32 %v8516_v17, %v3584_v33 }
 0x4df   : > { %3840 = vst [vmem:[%s8106_s28 + $0x308] sm:$0xff] %v3590_v38 }
 0x4e0   : > { %3839 = vst [vmem:[%s8106_s28 + $0x300] sm:$0xff] %v3585_v26  ;;  %v4745_v15 = vpop.f32.mrb[226].mxu1 }
 0x4e1   : > { %v3600_v11 = vadd.f32 %v8516_v17, %v4745_v15  ;;  %v3594_v35 = vpop.f32.mrb[227].mxu1 }
 0x4e2   : > { %v3595_v8 = vadd.f32 %v8516_v17, %v3594_v35 }
 0x4e3   : > { %3842 = vst [vmem:[%s8106_s28 + $0x318] sm:$0xff] %v3600_v11 }
 0x4e4   : > { %3841 = vst [vmem:[%s8106_s28 + $0x310] sm:$0xff] %v3595_v8  ;;  %v4748_v42 = vpop.f32.mrb[228].mxu1 }
 0x4e5   : > { %v3610_v31 = vadd.f32 %v8516_v17, %v4748_v42  ;;  %v3604_v54 = vpop.f32.mrb[229].mxu1 }
 0x4e6   : > { %v3605_v25 = vadd.f32 %v8516_v17, %v3604_v54 }
 0x4e7   : > { %3844 = vst [vmem:[%s8106_s28 + $0x328] sm:$0xff] %v3610_v31 }
 0x4e8   : > { %3843 = vst [vmem:[%s8106_s28 + $0x320] sm:$0xff] %v3605_v25  ;;  %v4751_v18 = vpop.f32.mrb[230].mxu1 }
 0x4e9   : > { %v3620_v41 = vadd.f32 %v8516_v17, %v4751_v18  ;;  %v3614_v27 = vpop.f32.mrb[231].mxu1 }
 0x4ea   : > { %v3615_v59 = vadd.f32 %v8516_v17, %v3614_v27 }
 0x4eb   : > { %3846 = vst [vmem:[%s8106_s28 + $0x338] sm:$0xff] %v3620_v41 }
 0x4ec   : > { %3845 = vst [vmem:[%s8106_s28 + $0x330] sm:$0xff] %v3615_v59  ;;  %v4754_v46 = vpop.f32.mrb[232].mxu1 }
 0x4ed   : > { %v3630_v39 = vadd.f32 %v8516_v17, %v4754_v46  ;;  %v3624_v55 = vpop.f32.mrb[233].mxu1 }
 0x4ee   : > { %v3625_v48 = vadd.f32 %v8516_v17, %v3624_v55 }
 0x4ef   : > { %3848 = vst [vmem:[%s8106_s28 + $0x348] sm:$0xff] %v3630_v39 }
 0x4f0   : > { %3847 = vst [vmem:[%s8106_s28 + $0x340] sm:$0xff] %v3625_v48  ;;  %v4757_v63 = vpop.f32.mrb[234].mxu1 }
 0x4f1   : > { %v3640_v32 = vadd.f32 %v8516_v17, %v4757_v63  ;;  %v3634_v19 = vpop.f32.mrb[235].mxu1 }
 0x4f2   : > { %v3635_v14 = vadd.f32 %v8516_v17, %v3634_v19 }
 0x4f3   : > { %3850 = vst [vmem:[%s8106_s28 + $0x358] sm:$0xff] %v3640_v32 }
 0x4f4   : > { %3849 = vst [vmem:[%s8106_s28 + $0x350] sm:$0xff] %v3635_v14  ;;  %v4760_v40 = vpop.f32.mrb[236].mxu1 }
 0x4f5   : > { %v3650_v61 = vadd.f32 %v8516_v17, %v4760_v40  ;;  %v3644_v60 = vpop.f32.mrb[237].mxu1 }
 0x4f6   : > { %v3645_v23 = vadd.f32 %v8516_v17, %v3644_v60 }
 0x4f7   : > { %3852 = vst [vmem:[%s8106_s28 + $0x368] sm:$0xff] %v3650_v61 }
 0x4f8   : > { %3851 = vst [vmem:[%s8106_s28 + $0x360] sm:$0xff] %v3645_v23  ;;  %v4763_v62 = vpop.f32.mrb[238].mxu1 }
 0x4f9   : > { %v3660_v2 = vadd.f32 %v8516_v17, %v4763_v62  ;;  %v3654_v50 = vpop.f32.mrb[239].mxu1 }
 0x4fa   : > { %v3655_v7 = vadd.f32 %v8516_v17, %v3654_v50 }
 0x4fb   : > { %3854 = vst [vmem:[%s8106_s28 + $0x378] sm:$0xff] %v3660_v2 }
 0x4fc   : > { %3853 = vst [vmem:[%s8106_s28 + $0x370] sm:$0xff] %v3655_v7  ;;  %v4766_v36 = vpop.f32.mrb[240].mxu1 }
 0x4fd   : > { %v3670_v16 = vadd.f32 %v8516_v17, %v4766_v36  ;;  %v3664_v44 = vpop.f32.mrb[241].mxu1 }
 0x4fe   : > { %v3665_v49 = vadd.f32 %v8516_v17, %v3664_v44 }
 0x4ff   : > { %3856 = vst [vmem:[%s8106_s28 + $0x388] sm:$0xff] %v3670_v16 }
 0x500   : > { %3855 = vst [vmem:[%s8106_s28 + $0x380] sm:$0xff] %v3665_v49  ;;  %v4769_v52 = vpop.f32.mrb[242].mxu1 }
 0x501   : > { %v3680_v6 = vadd.f32 %v8516_v17, %v4769_v52  ;;  %v3674_v28 = vpop.f32.mrb[243].mxu1 }
 0x502   : > { %v3675_v12 = vadd.f32 %v8516_v17, %v3674_v28 }
 0x503   : > { %3858 = vst [vmem:[%s8106_s28 + $0x398] sm:$0xff] %v3680_v6 }
 0x504   : > { %3857 = vst [vmem:[%s8106_s28 + $0x390] sm:$0xff] %v3675_v12  ;;  %v4772_v0 = vpop.f32.mrb[244].mxu1 }
 0x505   : > { %v3690_v10 = vadd.f32 %v8516_v17, %v4772_v0  ;;  %v3684_v20 = vpop.f32.mrb[245].mxu1 }
 0x506   : > { %v3685_v3 = vadd.f32 %v8516_v17, %v3684_v20 }
 0x507   : > { %3860 = vst [vmem:[%s8106_s28 + $0x3a8] sm:$0xff] %v3690_v10 }
 0x508   : > { %3859 = vst [vmem:[%s8106_s28 + $0x3a0] sm:$0xff] %v3685_v3  ;;  %v4775_v58 = vpop.f32.mrb[246].mxu1 }
 0x509   : > { %v3700_v37 = vadd.f32 %v8516_v17, %v4775_v58  ;;  %v3694_v24 = vpop.f32.mrb[247].mxu1 }
 0x50a   : > { %v3695_v9 = vadd.f32 %v8516_v17, %v3694_v24 }
 0x50b   : > { %3862 = vst [vmem:[%s8106_s28 + $0x3b8] sm:$0xff] %v3700_v37 }
 0x50c   : > { %3861 = vst [vmem:[%s8106_s28 + $0x3b0] sm:$0xff] %v3695_v9  ;;  %v4778_v30 = vpop.f32.mrb[248].mxu1 }
 0x50d   : > { %v3710_v34 = vadd.f32 %v8516_v17, %v4778_v30  ;;  %v3704_v5 = vpop.f32.mrb[249].mxu1 }
 0x50e   : > { %v3705_v57 = vadd.f32 %v8516_v17, %v3704_v5 }
 0x50f   : > { %3864 = vst [vmem:[%s8106_s28 + $0x3c8] sm:$0xff] %v3710_v34 }
 0x510   : > { %3863 = vst [vmem:[%s8106_s28 + $0x3c0] sm:$0xff] %v3705_v57  ;;  %v4781_v51 = vpop.f32.mrb[250].mxu1 }
 0x511   : > { %v3720_v53 = vadd.f32 %v8516_v17, %v4781_v51  ;;  %v3714_v13 = vpop.f32.mrb[251].mxu1 }
 0x512   : > { %v3715_v45 = vadd.f32 %v8516_v17, %v3714_v13 }
 0x513   : > { %3866 = vst [vmem:[%s8106_s28 + $0x3d8] sm:$0xff] %v3720_v53 }
 0x514   : > { %3865 = vst [vmem:[%s8106_s28 + $0x3d0] sm:$0xff] %v3715_v45  ;;  %v4784_v22 = vpop.f32.mrb[252].mxu1 }
 0x515   : > { %v3730_v47 = vadd.f32 %v8516_v17, %v4784_v22  ;;  %v3724_v56 = vpop.f32.mrb[253].mxu1 }
 0x516   : > { %v3725_v4 = vadd.f32 %v8516_v17, %v3724_v56 }
 0x517   : > { %3868 = vst [vmem:[%s8106_s28 + $0x3e8] sm:$0xff] %v3730_v47 }
 0x518   : > { %3867 = vst [vmem:[%s8106_s28 + $0x3e0] sm:$0xff] %v3725_v4  ;;  %v4787_v21 = vpop.f32.mrb[254].mxu1 }
 0x519   : > { %v3740_v43 = vadd.f32 %v8516_v17, %v4787_v21  ;;  %v3734_v1 = vpop.f32.mrb[255].mxu1 }
 0x51a   : > { %v3735_v29 = vadd.f32 %v8516_v17, %v3734_v1 }
 0x51b   : > { %3870 = vst [vmem:[%s8106_s28 + $0x3f8] sm:$0xff] %v3740_v43 }
 0x51c   : > { %3869 = vst [vmem:[%s8106_s28 + $0x3f0] sm:$0xff] %v3735_v29 }
 0x51d   : > { %s4051_s7 = sshll.u32 %s5616_s22, 13  ;;  %s3901_s23 = sshll.u32 %s8106_s28, 4  ;;  %s3902_s23 = int_to_ptr.vmem [resolvable:$true] %s3901_s23 }
 0x51e   : > { %s3884_s6 = scalar_lea.hbm %s8625_s5, %s4051_s7  ;;  %s5558_s11 = smov 8192  }
 0x51f   : > { %p9288_p0 = scmp.ne.s32.totalorder %s8753_s30, 0  ;;  %s5559_s13 = smov 16384  }
 0x520   : > { %s5560_s14 = smov 64   ;;  %s5561_s16 = smov 128  }
 0x521   : > { %4909 = sst [smem:[#allocation15]] (%p9288_p0), %s5558_s11  ;;  %s5562_s22 = smov 8  }
 0x522   : > { %4910 = sst [smem:[#allocation15 + $0x1]] (%p9288_p0), %s5559_s13  ;;  %s5563_s25 = smov [#allocation14]  }
 0x523   : > { %4911 = sst [smem:[#allocation15 + $0x2]] (%p9288_p0), %s5560_s14  ;;  %s5564_s26 = smov 0  }
 0x524   : > { %4912 = sst [smem:[#allocation15 + $0x3]] (%p9288_p0), %s5561_s16 }
 0x525   : > { %4913 = sst [smem:[#allocation15 + $0x4]] (%p9288_p0), %s5561_s16 }
 0x526   : > { %4914 = sst [smem:[#allocation15 + $0x5]] (%p9288_p0), %s5562_s22 }
 0x527   : > { %4915 = dma.general (%p9288_p0), %s3902_s23, 16384, %s3884_s6, %s3872_s29, %s5563_s25, [#allocation15], %s5564_s26, 0  }
 0x528 PF: > { %s9289_s15 = sld [smem:[#allocation21_spill]]  ;;  %s9290_s8 = sld [smem:[#allocation24_spill]] }
 0x52e   : > { %s3929_s9 = sand.u32 1, %s9289_s15   ;;  %p9291_p7 = scmp.ne.s32.totalorder %s9290_s8, 0 }
 0x52f   : > { %s3930_s12 = scalar_lea.sflag [#allocation4], %s3929_s9 }
 0x530   : > { %p4931_p8 = pnand %p4031_p4, %p9291_p7 }
 0x532   : > { %5524 = dma.done.wait (!%p4931_p8), %s3930_s12, 16384  }
 0x533   : > { %5526 = vsyncadd (!%p4931_p8), %s3930_s12, 4294950912  ;;  %s9292_s21 = sld [smem:[#allocation22_spill]]  ;;  %s9293_s10 = sld [smem:[#allocation23_spill]] }
 0x534   : > { %s9294_s18 = smov %s5533_s19  ;;  %s9295_s19 = smov %s5537_s20 }
 0x539   : > { %p20_p9 = scmp.ge.s32.totalorder %s9292_s21, 4   ;;  %s9296_s20 = smov %s9293_s10 }
 0x53b   :  { %22 = sbr.rel (!%p20_p9) target bundleno = 9 (0x9), region = 111 }
 0x542   :  { %3935 = vsyncpa [#allocation3], 1 }
 0x543   :  { %3937 = vsyncpa [#allocation3 + $0x1], 1 }
 0x544   :  { %3938 = vsyncpa [#allocation6], 1 }
 0x545   :  { %3939 = vsyncpa [#allocation9], 1 }
 0x546   :  { %3940 = vsyncpa [#allocation4], 1 }
 0x547   :  { %3942 = vsyncpa [#allocation4 + $0x1], 1 }

</bundles_post_ra>
